<compile_context>
chip_gen: v7x
topology: tpu7x:2x2x1
jax: 0.10.0
libtpu: 0.0.40
codegen_flags: <defaults>
</compile_context>

<pallas_src>
import functools

import jax
import jax.numpy as jnp
from jax.experimental import pallas as pl
from jax.experimental.pallas import tpu as pltpu


# ----------------------------- small helpers --------------------------------

def _round_up(x, m):
    return ((x + m - 1) // m) * m


def _device_kind():
    try:
        return jax.devices()[0].device_kind.lower()
    except Exception:
        return ""


def _choose_tb(B, n_pad, target_rows=256, min_blocks=1):
    """Graphs per grid block: fill ~target_rows MXU rows, keep >= min_blocks
    blocks (v7x has 2 TensorCores), never exceed the batch."""
    tb = max(1, target_rows // n_pad)
    tb = min(tb, B)
    if min_blocks > 1 and B >= min_blocks:
        tb = min(tb, max(1, B // min_blocks))
    return max(1, tb)


def _block_diag(a, tb):
    """(nb*tb, n, n) -> (nb, tb*n, tb*n): block-diagonal per group of tb graphs."""
    nb = a.shape[0] // tb
    n = a.shape[1]
    a4 = a.reshape(nb, tb, n, n)
    eye = jnp.eye(tb, dtype=a.dtype)
    bd = jnp.einsum('gtab,ts->gtasb', a4, eye)
    return bd.reshape(nb, tb * n, tb * n).astype(a.dtype)


# ------------------------------- the kernel ---------------------------------

def _gnn_kernel(a_in_ref,    # (1, R, R)   block-diag incoming adjacency
                a_out_ref,   # (1, R, R)   block-diag outgoing adjacency
                h_ref,       # (1, R, Hp)  hidden state (f32, lane-padded)
                w_edge_ref,  # (Hp, 2Hp)   [W_edge_in^T | W_edge_out^T]
                b_edge_ref,  # (1, 2Hp)
                w_ii_ref,    # (Hp, 3Hp)   input_in  -> gates (r,i,n)
                w_io_ref,    # (Hp, 3Hp)   input_out -> gates (r,i,n)
                w_hh_ref,    # (Hp, 3Hp)   hidden    -> gates (r,i,n)
                b_gi_ref,    # (1, 3Hp)    b_iah@w_ii + b_oah@w_io + b_ih (folded)
                b_hh_ref,    # (1, 3Hp)
                out_ref,     # (1, R, Hp)
                *, step: int, hp: int):
    f32 = jnp.float32
    mxu = a_in_ref.dtype     # bf16 (v6e/v7x default) or f32

    # Load everything once per block; reused across the step loop.
    a_in = a_in_ref[0]
    a_out = a_out_ref[0]
    w_edge = w_edge_ref[...]
    w_ii = w_ii_ref[...]
    w_io = w_io_ref[...]
    w_hh = w_hh_ref[...]
    b_edge = b_edge_ref[...].astype(f32)
    b_gi = b_gi_ref[...].astype(f32)
    b_hh = b_hh_ref[...].astype(f32)

    def dot(x, w):
        return jnp.dot(x, w, preferred_element_type=f32)

    def cell(h):                                   # h: (R, Hp) f32
        hm = h.astype(mxu)
        # Fused edge linears: (R,Hp)@(Hp,2Hp); slices at 128-lane boundaries.
        eh = dot(hm, w_edge) + b_edge
        # Graph propagation: one full-tile matmul per direction (block-diag A).
        prop_in = dot(a_in, eh[:, :hp].astype(mxu))
        prop_out = dot(a_out, eh[:, hp:].astype(mxu))
        # Fused GRU gate matmuls (gate order r, i, n along the 3Hp axis).
        gi = (dot(prop_in.astype(mxu), w_ii)
              + dot(prop_out.astype(mxu), w_io) + b_gi)
        gh = dot(hm, w_hh) + b_hh
        reset = jax.nn.sigmoid(gi[:, :hp] + gh[:, :hp])
        update = jax.nn.sigmoid(gi[:, hp:2 * hp] + gh[:, hp:2 * hp])
        new = jnp.tanh(gi[:, 2 * hp:] + reset * gh[:, 2 * hp:])
        return new + update * (h - new)

    h = h_ref[0].astype(f32)
    if step <= 4:
        for _ in range(step):                      # small fixed step: unroll
            h = cell(h)
    else:                                          # bound live ranges for big step
        h = jax.lax.fori_loop(0, step, lambda _, hh: cell(hh), h)
    out_ref[0] = h.astype(out_ref.dtype)


# ----------------------------- parameter prep -------------------------------

def prepare_params(params, hp, mxu_dtype):
    """Transpose, split per gate, zero-pad H->hp, fuse gate weights, and fold
    the propagation biases into a single gate bias. All done in the wrapper."""
    H = params["w_hh"].shape[1]
    f32 = jnp.float32

    def pad_mat(w):        # (H, H) -> (hp, hp)
        return jnp.pad(w.astype(f32), ((0, hp - H), (0, hp - H)))

    def pad_vec(b):        # (H,) -> (hp,)
        return jnp.pad(b.astype(f32), (0, hp - H))

    def gate_cat(w_t):     # (H, 3H) -> (hp, 3*hp), per-gate padded blocks
        return jnp.concatenate(
            [pad_mat(w_t[:, g * H:(g + 1) * H]) for g in range(3)], axis=1)

    def gate_vec(b):       # (3H,) -> (3*hp,)
        return jnp.concatenate([pad_vec(b[g * H:(g + 1) * H]) for g in range(3)])

    w_ih_t = params["w_ih"].T.astype(f32)            # (2H, 3H)
    w_ii = gate_cat(w_ih_t[:H])                      # input_in  half
    w_io = gate_cat(w_ih_t[H:2 * H])                 # input_out half
    w_hh = gate_cat(params["w_hh"].T.astype(f32))
    w_edge = jnp.concatenate(
        [pad_mat(params["w_edge_in"].T), pad_mat(params["w_edge_out"].T)], axis=1)
    b_edge = jnp.concatenate(
        [pad_vec(params["b_edge_in"]), pad_vec(params["b_edge_out"])]).reshape(1, 2 * hp)
    b_iah = pad_vec(params["b_iah"]).reshape(1, hp)
    b_oah = pad_vec(params["b_oah"]).reshape(1, hp)
    b_ih = gate_vec(params["b_ih"]).reshape(1, 3 * hp)
    b_hh = gate_vec(params["b_hh"]).reshape(1, 3 * hp)
    # Fold the propagation biases through the GRU input weights (exact, linear):
    b_gi = b_iah @ w_ii + b_oah @ w_io + b_ih

    return {
        "w_edge": w_edge.astype(mxu_dtype),
        "b_edge": b_edge.astype(f32),
        "w_ii": w_ii.astype(mxu_dtype),
        "w_io": w_io.astype(mxu_dtype),
        "w_hh": w_hh.astype(mxu_dtype),
        "b_gi": b_gi.astype(f32),
        "b_hh": b_hh.astype(f32),
    }


# --------------------------------- wrapper -----------------------------------

def gnn_forward(A, hidden, params, step=1, use_bf16=None, target_rows=None):
    """Forward of the PyTorch GNN module: `step` GNNCell iterations fused into
    a single pallas_call. A: [B, N, 2N], hidden: [B, N, H]."""
    B, N, H = hidden.shape
    assert A.shape == (B, N, 2 * N)
    out_dtype = hidden.dtype
    f32 = jnp.float32

    kind = _device_kind()
    if use_bf16 is None:                                   # bf16 MXU on v6e/v7x
        use_bf16 = ("v6" in kind) or ("v7" in kind) or ("7x" in kind)
    if target_rows is None:                                # MXU M dim per gen
        target_rows = 128 if "v5" in kind else 256
    min_blocks = 2 if (("v7" in kind) or ("7x" in kind)) else 1
    mxu_dtype = jnp.bfloat16 if use_bf16 else f32

    hp = _round_up(max(H, 1), 128)                         # lane-dense hidden
    row_align = 16 if use_bf16 else 8                      # sublane alignment
    n_pad = _round_up(N, row_align)

    tb = _choose_tb(B, n_pad, target_rows=target_rows, min_blocks=min_blocks)
    nb = -(-B // tb)            # number of grid blocks
    bp = nb * tb                # padded batch
    r = tb * n_pad              # MXU rows per block

    # Hidden: pad (B,N,H) -> (bp,n_pad,hp), group tb graphs per block -> (nb,R,hp).
    h_blocks = jnp.pad(hidden.astype(f32),
                       ((0, bp - B), (0, n_pad - N), (0, hp - H))).reshape(nb, r, hp)

    # Adjacency: split in/out, pad, block-diagonalize per group of tb graphs.
    pad_a = ((0, bp - B), (0, n_pad - N), (0, n_pad - N))
    a_in = _block_diag(jnp.pad(A[:, :, :N], pad_a).astype(mxu_dtype), tb)
    a_out = _block_diag(jnp.pad(A[:, :, N:2 * N], pad_a).astype(mxu_dtype), tb)

    p = prepare_params(params, hp, mxu_dtype)
    operands = (a_in, a_out, h_blocks, p["w_edge"], p["b_edge"],
                p["w_ii"], p["w_io"], p["w_hh"], p["b_gi"], p["b_hh"])
    const_shapes = [(hp, 2 * hp), (1, 2 * hp), (hp, 3 * hp), (hp, 3 * hp),
                    (hp, 3 * hp), (1, 3 * hp), (1, 3 * hp)]

    # VMEM budget derived from block sizes (v7x has only 64 MiB physical).
    mxu_isz = jnp.dtype(mxu_dtype).itemsize
    out_isz = jnp.dtype(out_dtype).itemsize
    weight_bytes = sum(int(x.size) * x.dtype.itemsize for x in operands[3:])
    vmem_est = (2 * 2 * r * r * mxu_isz       # A_in + A_out blocks, double-buffered
                + 2 * r * hp * 4              # hidden block, double-buffered
                + 2 * r * hp * out_isz        # output block, double-buffered
                + 2 * weight_bytes            # weights (<=2 buffers)
                + 16 * r * hp * 4)            # live f32 intermediates of one cell
    vmem_limit = int(min(64 * 1024 * 1024, max(2 * vmem_est, 16 * 1024 * 1024)))

    flops = step * nb * (22 * r * hp * hp + 4 * r * r * hp)
    transcendentals = step * nb * 3 * r * hp
    bytes_accessed = (sum(int(x.size) * x.dtype.itemsize for x in operands)
                      + nb * r * hp * out_isz)

    def data_spec(last):
        return pl.BlockSpec((1, r, last), lambda b: (b, 0, 0))

    def build(single_buffer_consts):
        def const_spec(shape):
            idx = lambda b: (0,) * len(shape)
            if single_buffer_consts:
                # Constants never change block index: single-buffer them.
                return pl.BlockSpec(shape, idx, pipeline_mode=pl.Buffered(1))
            return pl.BlockSpec(shape, idx)

        in_specs = [data_spec(r), data_spec(r), data_spec(hp)]
        in_specs += [const_spec(s) for s in const_shapes]

        return pl.pallas_call(
            functools.partial(_gnn_kernel, step=step, hp=hp),
            out_shape=jax.ShapeDtypeStruct((nb, r, hp), out_dtype),
            grid_spec=pltpu.PrefetchScalarGridSpec(
                num_scalar_prefetch=0,
                grid=(nb,),
                in_specs=in_specs,
                out_specs=data_spec(hp)),
            compiler_params=pltpu.CompilerParams(
                dimension_semantics=("parallel",),
                vmem_limit_bytes=vmem_limit),
            cost_estimate=pl.CostEstimate(
                flops=int(flops),
                transcendentals=int(transcendentals),
                bytes_accessed=int(bytes_accessed)),
        )(*operands)

    try:
        out_blocks = build(single_buffer_consts=True)
        out_blocks.block_until_ready()
    except Exception:
        # Fallback if pipeline_mode / Buffered(1) is unsupported in this jax.
        out_blocks = build(single_buffer_consts=False)

    return out_blocks.reshape(bp, n_pad, hp)[:B, :N, :H]


# ------------------------ synthetic params & reference ----------------------

def init_params(key, hidden_size, max_seq_length):
    """Deterministic synthetic init; shapes mirror the PyTorch module."""
    H = hidden_size
    ks = jax.random.split(key, 12)
    scale = 1.0 / jnp.sqrt(jnp.float32(H))

    def u(k, shape):
        return jax.random.uniform(k, shape, jnp.float32, -scale, scale)

    return {
        "w_ih": u(ks[0], (3 * H, 2 * H)),
        "w_hh": u(ks[1], (3 * H, H)),
        "b_ih": u(ks[2], (3 * H,)),
        "b_hh": u(ks[3], (3 * H,)),
        "b_iah": u(ks[4], (H,)),
        "b_oah": u(ks[5], (H,)),
        "w_edge_in": u(ks[6], (H, H)),
        "b_edge_in": u(ks[7], (H,)),
        "w_edge_out": u(ks[8], (H, H)),
        "b_edge_out": u(ks[9], (H,)),
        # Present in the PyTorch __init__ but unused by forward():
        "w_edge_f": u(ks[10], (H, H)),
        "b_edge_f": u(ks[11], (H,)),
        "ln_weight": jnp.ones((H,), jnp.float32),
        "ln_bias": jnp.zeros((H,), jnp.float32),
        "complex_weight": 0.02 * jax.random.normal(
            jax.random.PRNGKey(123), (1, max_seq_length // 2 + 1, H, 2),
            jnp.float32),
    }


def _reference_gnn_cell(A, hidden, params):
    """Pure-JAX reference mirroring the PyTorch GNNCell (original weight layout)."""
    N = A.shape[1]
    eh_in = hidden @ params["w_edge_in"].T + params["b_edge_in"]
    eh_out = hidden @ params["w_edge_out"].T + params["b_edge_out"]
    input_in = jnp.matmul(A[:, :, :N], eh_in) + params["b_iah"]
    input_out = jnp.matmul(A[:, :, N:2 * N], eh_out) + params["b_oah"]
    inputs = jnp.concatenate([input_in, input_out], axis=2)
    gi = inputs @ params["w_ih"].T + params["b_ih"]
    gh = hidden @ params["w_hh"].T + params["b_hh"]
    i_r, i_i, i_n = jnp.split(gi, 3, axis=2)
    h_r, h_i, h_n = jnp.split(gh, 3, axis=2)
    resetgate = jax.nn.sigmoid(i_r + h_r)
    inputgate = jax.nn.sigmoid(i_i + h_i)
    newgate = jnp.tanh(i_n + resetgate * h_n)
    return newgate + inputgate * (hidden - newgate)


# ----------------------------------- test ------------------------------------

if __name__ == "__main__":
    B, N, H = 8, 8, 32          # batch (graphs), nodes per graph, hidden size
    STEP = 2                    # exercises the unrolled in-kernel step loop

    key = jax.random.PRNGKey(0)
    k_a, k_h, k_p = jax.random.split(key, 3)

    A = jax.random.uniform(k_a, (B, N, 2 * N), jnp.float32)
    hidden = jax.random.normal(k_h, (B, N, H), jnp.float32)
    params = init_params(k_p, H, N)

    ref = hidden
    for _ in range(STEP):
        ref = _reference_gnn_cell(A, ref, params)

    # 1) f32 MXU path: tight numerical check.
    out_f32 = jax.block_until_ready(
        gnn_forward(A, hidden, params, step=STEP, use_bf16=False))
    assert out_f32.shape == (B, N, H)
    err = float(jnp.max(jnp.abs(out_f32 - ref)))
    assert err < 1e-3, f"f32 max abs err {err}"

    # 2) Auto precision (bf16 MXU operands on v6e/v7x): loose sanity check
    #    (expected bf16 quantization error).
    out_auto = jax.block_until_ready(gnn_forward(A, hidden, params, step=STEP))
    err_auto = float(jnp.max(jnp.abs(out_auto - ref)))
    assert err_auto < 0.3, f"auto-precision max abs err {err_auto}"

    # 3) step > 4 exercises the in-kernel lax.fori_loop path.
    STEP_DEEP = 6
    ref_deep = hidden
    for _ in range(STEP_DEEP):
        ref_deep = _reference_gnn_cell(A, ref_deep, params)
    out_deep = jax.block_until_ready(
        gnn_forward(A, hidden, params, step=STEP_DEEP, use_bf16=False))
    err_deep = float(jnp.max(jnp.abs(out_deep - ref_deep)))
    assert err_deep < 5e-3, f"deep-step max abs err {err_deep}"

    print("KERNEL_OK")
</pallas_src>

<mosaic_0001>
module attributes {stable_mosaic.version = 11 : i64} {
  func.func @_gnn_kernel(%arg0: i32, %arg1: memref<1x64x64xf32, #tpu.memory_space<vmem>>, %arg2: memref<1x64x64xf32, #tpu.memory_space<vmem>>, %arg3: memref<1x64x128xf32, #tpu.memory_space<vmem>>, %arg4: memref<128x256xf32, #tpu.memory_space<vmem>>, %arg5: memref<1x256xf32, #tpu.memory_space<vmem>>, %arg6: memref<128x384xf32, #tpu.memory_space<vmem>>, %arg7: memref<128x384xf32, #tpu.memory_space<vmem>>, %arg8: memref<128x384xf32, #tpu.memory_space<vmem>>, %arg9: memref<1x384xf32, #tpu.memory_space<vmem>>, %arg10: memref<1x384xf32, #tpu.memory_space<vmem>>, %arg11: memref<1x64x128xf32, #tpu.memory_space<vmem>>) attributes {dimension_semantics = [#tpu.dimension_semantics<parallel>], iteration_bounds = array<i64: 1>, scalar_prefetch = 0 : i64, scratch_operands = 0 : i64, tpu.core_type = #tpu.core_type<tc>, window_params = [{transform_indices = @transform_0, window_bounds = array<i64: 1, 64, 64>}, {transform_indices = @transform_1, window_bounds = array<i64: 1, 64, 64>}, {transform_indices = @transform_2, window_bounds = array<i64: 1, 64, 128>}, {pipeline_mode = #tpu.pipeline_mode<synchronous>, transform_indices = @transform_3, window_bounds = array<i64: 128, 256>}, {pipeline_mode = #tpu.pipeline_mode<synchronous>, transform_indices = @transform_4, window_bounds = array<i64: 1, 256>}, {pipeline_mode = #tpu.pipeline_mode<synchronous>, transform_indices = @transform_5, window_bounds = array<i64: 128, 384>}, {pipeline_mode = #tpu.pipeline_mode<synchronous>, transform_indices = @transform_6, window_bounds = array<i64: 128, 384>}, {pipeline_mode = #tpu.pipeline_mode<synchronous>, transform_indices = @transform_7, window_bounds = array<i64: 128, 384>}, {pipeline_mode = #tpu.pipeline_mode<synchronous>, transform_indices = @transform_8, window_bounds = array<i64: 1, 384>}, {pipeline_mode = #tpu.pipeline_mode<synchronous>, transform_indices = @transform_9, window_bounds = array<i64: 1, 384>}, {transform_indices = @transform_10, window_bounds = array<i64: 1, 64, 128>}]} {
    %c0 = arith.constant 0 : index
    %c0_0 = arith.constant 0 : index
    %c0_1 = arith.constant 0 : index
    %0 = vector.load %arg1[%c0, %c0_0, %c0_1] : memref<1x64x64xf32, #tpu.memory_space<vmem>>, vector<1x64x64xf32>
    %1 = vector.shape_cast %0 : vector<1x64x64xf32> to vector<64x64xf32>
    %c0_2 = arith.constant 0 : index
    %c0_3 = arith.constant 0 : index
    %c0_4 = arith.constant 0 : index
    %2 = vector.load %arg2[%c0_2, %c0_3, %c0_4] : memref<1x64x64xf32, #tpu.memory_space<vmem>>, vector<1x64x64xf32>
    %3 = vector.shape_cast %2 : vector<1x64x64xf32> to vector<64x64xf32>
    %c0_5 = arith.constant 0 : index
    %c0_6 = arith.constant 0 : index
    %4 = vector.load %arg4[%c0_5, %c0_6] : memref<128x256xf32, #tpu.memory_space<vmem>>, vector<128x256xf32>
    %c0_7 = arith.constant 0 : index
    %c0_8 = arith.constant 0 : index
    %5 = vector.load %arg6[%c0_7, %c0_8] : memref<128x384xf32, #tpu.memory_space<vmem>>, vector<128x384xf32>
    %c0_9 = arith.constant 0 : index
    %c0_10 = arith.constant 0 : index
    %6 = vector.load %arg7[%c0_9, %c0_10] : memref<128x384xf32, #tpu.memory_space<vmem>>, vector<128x384xf32>
    %c0_11 = arith.constant 0 : index
    %c0_12 = arith.constant 0 : index
    %7 = vector.load %arg8[%c0_11, %c0_12] : memref<128x384xf32, #tpu.memory_space<vmem>>, vector<128x384xf32>
    %c0_13 = arith.constant 0 : index
    %c0_14 = arith.constant 0 : index
    %8 = vector.load %arg5[%c0_13, %c0_14] : memref<1x256xf32, #tpu.memory_space<vmem>>, vector<1x256xf32>
    %c0_15 = arith.constant 0 : index
    %c0_16 = arith.constant 0 : index
    %9 = vector.load %arg9[%c0_15, %c0_16] : memref<1x384xf32, #tpu.memory_space<vmem>>, vector<1x384xf32>
    %c0_17 = arith.constant 0 : index
    %c0_18 = arith.constant 0 : index
    %10 = vector.load %arg10[%c0_17, %c0_18] : memref<1x384xf32, #tpu.memory_space<vmem>>, vector<1x384xf32>
    %c0_19 = arith.constant 0 : index
    %c0_20 = arith.constant 0 : index
    %c0_21 = arith.constant 0 : index
    %11 = vector.load %arg3[%c0_19, %c0_20, %c0_21] : memref<1x64x128xf32, #tpu.memory_space<vmem>>, vector<1x64x128xf32>
    %12 = vector.shape_cast %11 : vector<1x64x128xf32> to vector<64x128xf32>
    %cst = arith.constant dense<0.000000e+00> : vector<64x256xf32>
    %13 = tpu.matmul %12, %4, %cst {dimension_numbers = #tpu.dot_dimension_numbers<[1], [0], [0], [1], [0, 0, 1, 1], [], []>} : vector<64x128xf32>, vector<128x256xf32>, vector<64x256xf32> -> vector<64x256xf32>
    %14 = vector.broadcast %8 : vector<1x256xf32> to vector<64x256xf32>
    %15 = arith.addf %13, %14 : vector<64x256xf32>
    %16 = vector.extract_strided_slice %15 {offsets = [0, 0], sizes = [64, 128], strides = [1, 1]} : vector<64x256xf32> to vector<64x128xf32>
    %cst_22 = arith.constant dense<0.000000e+00> : vector<64x128xf32>
    %17 = tpu.matmul %1, %16, %cst_22 {dimension_numbers = #tpu.dot_dimension_numbers<[1], [0], [0], [1], [0, 0, 1, 1], [], []>} : vector<64x64xf32>, vector<64x128xf32>, vector<64x128xf32> -> vector<64x128xf32>
    %18 = vector.extract_strided_slice %15 {offsets = [0, 128], sizes = [64, 128], strides = [1, 1]} : vector<64x256xf32> to vector<64x128xf32>
    %cst_23 = arith.constant dense<0.000000e+00> : vector<64x128xf32>
    %19 = tpu.matmul %3, %18, %cst_23 {dimension_numbers = #tpu.dot_dimension_numbers<[1], [0], [0], [1], [0, 0, 1, 1], [], []>} : vector<64x64xf32>, vector<64x128xf32>, vector<64x128xf32> -> vector<64x128xf32>
    %cst_24 = arith.constant dense<0.000000e+00> : vector<64x384xf32>
    %20 = tpu.matmul %17, %5, %cst_24 {dimension_numbers = #tpu.dot_dimension_numbers<[1], [0], [0], [1], [0, 0, 1, 1], [], []>} : vector<64x128xf32>, vector<128x384xf32>, vector<64x384xf32> -> vector<64x384xf32>
    %cst_25 = arith.constant dense<0.000000e+00> : vector<64x384xf32>
    %21 = tpu.matmul %19, %6, %cst_25 {dimension_numbers = #tpu.dot_dimension_numbers<[1], [0], [0], [1], [0, 0, 1, 1], [], []>} : vector<64x128xf32>, vector<128x384xf32>, vector<64x384xf32> -> vector<64x384xf32>
    %22 = arith.addf %20, %21 : vector<64x384xf32>
    %23 = vector.broadcast %9 : vector<1x384xf32> to vector<64x384xf32>
    %24 = arith.addf %22, %23 : vector<64x384xf32>
    %cst_26 = arith.constant dense<0.000000e+00> : vector<64x384xf32>
    %25 = tpu.matmul %12, %7, %cst_26 {dimension_numbers = #tpu.dot_dimension_numbers<[1], [0], [0], [1], [0, 0, 1, 1], [], []>} : vector<64x128xf32>, vector<128x384xf32>, vector<64x384xf32> -> vector<64x384xf32>
    %26 = vector.broadcast %10 : vector<1x384xf32> to vector<64x384xf32>
    %27 = arith.addf %25, %26 : vector<64x384xf32>
    %28 = vector.extract_strided_slice %24 {offsets = [0, 0], sizes = [64, 128], strides = [1, 1]} : vector<64x384xf32> to vector<64x128xf32>
    %29 = vector.extract_strided_slice %27 {offsets = [0, 0], sizes = [64, 128], strides = [1, 1]} : vector<64x384xf32> to vector<64x128xf32>
    %30 = arith.addf %28, %29 : vector<64x128xf32>
    %31 = arith.negf %30 : vector<64x128xf32>
    %32 = math.exp %31 : vector<64x128xf32>
    %cst_27 = arith.constant 1.000000e+00 : f32
    %33 = vector.broadcast %cst_27 : f32 to vector<64x128xf32>
    %34 = arith.addf %33, %32 : vector<64x128xf32>
    %35 = arith.divf %33, %34 : vector<64x128xf32>
    %36 = vector.extract_strided_slice %24 {offsets = [0, 128], sizes = [64, 128], strides = [1, 1]} : vector<64x384xf32> to vector<64x128xf32>
    %37 = vector.extract_strided_slice %27 {offsets = [0, 128], sizes = [64, 128], strides = [1, 1]} : vector<64x384xf32> to vector<64x128xf32>
    %38 = arith.addf %36, %37 : vector<64x128xf32>
    %39 = arith.negf %38 : vector<64x128xf32>
    %40 = math.exp %39 : vector<64x128xf32>
    %cst_28 = arith.constant 1.000000e+00 : f32
    %41 = vector.broadcast %cst_28 : f32 to vector<64x128xf32>
    %42 = arith.addf %41, %40 : vector<64x128xf32>
    %43 = arith.divf %41, %42 : vector<64x128xf32>
    %44 = vector.extract_strided_slice %24 {offsets = [0, 256], sizes = [64, 128], strides = [1, 1]} : vector<64x384xf32> to vector<64x128xf32>
    %45 = vector.extract_strided_slice %27 {offsets = [0, 256], sizes = [64, 128], strides = [1, 1]} : vector<64x384xf32> to vector<64x128xf32>
    %46 = arith.mulf %35, %45 : vector<64x128xf32>
    %47 = arith.addf %44, %46 : vector<64x128xf32>
    %48 = math.tanh %47 : vector<64x128xf32>
    %49 = arith.subf %12, %48 : vector<64x128xf32>
    %50 = arith.mulf %43, %49 : vector<64x128xf32>
    %51 = arith.addf %48, %50 : vector<64x128xf32>
    %cst_29 = arith.constant dense<0.000000e+00> : vector<64x256xf32>
    %52 = tpu.matmul %51, %4, %cst_29 {dimension_numbers = #tpu.dot_dimension_numbers<[1], [0], [0], [1], [0, 0, 1, 1], [], []>} : vector<64x128xf32>, vector<128x256xf32>, vector<64x256xf32> -> vector<64x256xf32>
    %53 = vector.broadcast %8 : vector<1x256xf32> to vector<64x256xf32>
    %54 = arith.addf %52, %53 : vector<64x256xf32>
    %55 = vector.extract_strided_slice %54 {offsets = [0, 0], sizes = [64, 128], strides = [1, 1]} : vector<64x256xf32> to vector<64x128xf32>
    %cst_30 = arith.constant dense<0.000000e+00> : vector<64x128xf32>
    %56 = tpu.matmul %1, %55, %cst_30 {dimension_numbers = #tpu.dot_dimension_numbers<[1], [0], [0], [1], [0, 0, 1, 1], [], []>} : vector<64x64xf32>, vector<64x128xf32>, vector<64x128xf32> -> vector<64x128xf32>
    %57 = vector.extract_strided_slice %54 {offsets = [0, 128], sizes = [64, 128], strides = [1, 1]} : vector<64x256xf32> to vector<64x128xf32>
    %cst_31 = arith.constant dense<0.000000e+00> : vector<64x128xf32>
    %58 = tpu.matmul %3, %57, %cst_31 {dimension_numbers = #tpu.dot_dimension_numbers<[1], [0], [0], [1], [0, 0, 1, 1], [], []>} : vector<64x64xf32>, vector<64x128xf32>, vector<64x128xf32> -> vector<64x128xf32>
    %cst_32 = arith.constant dense<0.000000e+00> : vector<64x384xf32>
    %59 = tpu.matmul %56, %5, %cst_32 {dimension_numbers = #tpu.dot_dimension_numbers<[1], [0], [0], [1], [0, 0, 1, 1], [], []>} : vector<64x128xf32>, vector<128x384xf32>, vector<64x384xf32> -> vector<64x384xf32>
    %cst_33 = arith.constant dense<0.000000e+00> : vector<64x384xf32>
    %60 = tpu.matmul %58, %6, %cst_33 {dimension_numbers = #tpu.dot_dimension_numbers<[1], [0], [0], [1], [0, 0, 1, 1], [], []>} : vector<64x128xf32>, vector<128x384xf32>, vector<64x384xf32> -> vector<64x384xf32>
    %61 = arith.addf %59, %60 : vector<64x384xf32>
    %62 = vector.broadcast %9 : vector<1x384xf32> to vector<64x384xf32>
    %63 = arith.addf %61, %62 : vector<64x384xf32>
    %cst_34 = arith.constant dense<0.000000e+00> : vector<64x384xf32>
    %64 = tpu.matmul %51, %7, %cst_34 {dimension_numbers = #tpu.dot_dimension_numbers<[1], [0], [0], [1], [0, 0, 1, 1], [], []>} : vector<64x128xf32>, vector<128x384xf32>, vector<64x384xf32> -> vector<64x384xf32>
    %65 = vector.broadcast %10 : vector<1x384xf32> to vector<64x384xf32>
    %66 = arith.addf %64, %65 : vector<64x384xf32>
    %67 = vector.extract_strided_slice %63 {offsets = [0, 0], sizes = [64, 128], strides = [1, 1]} : vector<64x384xf32> to vector<64x128xf32>
    %68 = vector.extract_strided_slice %66 {offsets = [0, 0], sizes = [64, 128], strides = [1, 1]} : vector<64x384xf32> to vector<64x128xf32>
    %69 = arith.addf %67, %68 : vector<64x128xf32>
    %70 = arith.negf %69 : vector<64x128xf32>
    %71 = math.exp %70 : vector<64x128xf32>
    %cst_35 = arith.constant 1.000000e+00 : f32
    %72 = vector.broadcast %cst_35 : f32 to vector<64x128xf32>
    %73 = arith.addf %72, %71 : vector<64x128xf32>
    %74 = arith.divf %72, %73 : vector<64x128xf32>
    %75 = vector.extract_strided_slice %63 {offsets = [0, 128], sizes = [64, 128], strides = [1, 1]} : vector<64x384xf32> to vector<64x128xf32>
    %76 = vector.extract_strided_slice %66 {offsets = [0, 128], sizes = [64, 128], strides = [1, 1]} : vector<64x384xf32> to vector<64x128xf32>
    %77 = arith.addf %75, %76 : vector<64x128xf32>
    %78 = arith.negf %77 : vector<64x128xf32>
    %79 = math.exp %78 : vector<64x128xf32>
    %cst_36 = arith.constant 1.000000e+00 : f32
    %80 = vector.broadcast %cst_36 : f32 to vector<64x128xf32>
    %81 = arith.addf %80, %79 : vector<64x128xf32>
    %82 = arith.divf %80, %81 : vector<64x128xf32>
    %83 = vector.extract_strided_slice %63 {offsets = [0, 256], sizes = [64, 128], strides = [1, 1]} : vector<64x384xf32> to vector<64x128xf32>
    %84 = vector.extract_strided_slice %66 {offsets = [0, 256], sizes = [64, 128], strides = [1, 1]} : vector<64x384xf32> to vector<64x128xf32>
    %85 = arith.mulf %74, %84 : vector<64x128xf32>
    %86 = arith.addf %83, %85 : vector<64x128xf32>
    %87 = math.tanh %86 : vector<64x128xf32>
    %88 = arith.subf %51, %87 : vector<64x128xf32>
    %89 = arith.mulf %82, %88 : vector<64x128xf32>
    %90 = arith.addf %87, %89 : vector<64x128xf32>
    %c0_37 = arith.constant 0 : index
    %c0_38 = arith.constant 0 : index
    %c0_39 = arith.constant 0 : index
    %91 = vector.load %arg11[%c0_37, %c0_38, %c0_39] : memref<1x64x128xf32, #tpu.memory_space<vmem>>, vector<1x64x128xf32>
    %92 = vector.shape_cast %91 : vector<1x64x128xf32> to vector<64x128xf32>
    %93 = vector.shape_cast %90 : vector<64x128xf32> to vector<1x64x128xf32>
    tpu.vector_store %arg11[%c0_37, %c0_38, %c0_39], %93 {strides = array<i32>} : memref<1x64x128xf32, #tpu.memory_space<vmem>>, vector<1x64x128xf32>,
    return
  }
  func.func @transform_0(%arg0: i32) -> (i32, i32, i32) {
    %c0_i32 = arith.constant 0 : i32
    %c0_i32_0 = arith.constant 0 : i32
    %c0_i32_1 = arith.constant 0 : i32
    return %arg0, %c0_i32, %c0_i32_0 : i32, i32, i32
  }
  func.func @transform_1(%arg0: i32) -> (i32, i32, i32) {
    %c0_i32 = arith.constant 0 : i32
    %c0_i32_0 = arith.constant 0 : i32
    %c0_i32_1 = arith.constant 0 : i32
    return %arg0, %c0_i32, %c0_i32_0 : i32, i32, i32
  }
  func.func @transform_2(%arg0: i32) -> (i32, i32, i32) {
    %c0_i32 = arith.constant 0 : i32
    %c0_i32_0 = arith.constant 0 : i32
    %c0_i32_1 = arith.constant 0 : i32
    return %arg0, %c0_i32, %c0_i32_0 : i32, i32, i32
  }
  func.func @transform_3(%arg0: i32) -> (i32, i32) {
    %c0_i32 = arith.constant 0 : i32
    %c0_i32_0 = arith.constant 0 : i32
    %c0_i32_1 = arith.constant 0 : i32
    return %c0_i32, %c0_i32_0 : i32, i32
  }
  func.func @transform_4(%arg0: i32) -> (i32, i32) {
    %c0_i32 = arith.constant 0 : i32
    %c0_i32_0 = arith.constant 0 : i32
    %c0_i32_1 = arith.constant 0 : i32
    return %c0_i32, %c0_i32_0 : i32, i32
  }
  func.func @transform_5(%arg0: i32) -> (i32, i32) {
    %c0_i32 = arith.constant 0 : i32
    %c0_i32_0 = arith.constant 0 : i32
    %c0_i32_1 = arith.constant 0 : i32
    return %c0_i32, %c0_i32_0 : i32, i32
  }
  func.func @transform_6(%arg0: i32) -> (i32, i32) {
    %c0_i32 = arith.constant 0 : i32
    %c0_i32_0 = arith.constant 0 : i32
    %c0_i32_1 = arith.constant 0 : i32
    return %c0_i32, %c0_i32_0 : i32, i32
  }
  func.func @transform_7(%arg0: i32) -> (i32, i32) {
    %c0_i32 = arith.constant 0 : i32
    %c0_i32_0 = arith.constant 0 : i32
    %c0_i32_1 = arith.constant 0 : i32
    return %c0_i32, %c0_i32_0 : i32, i32
  }
  func.func @transform_8(%arg0: i32) -> (i32, i32) {
    %c0_i32 = arith.constant 0 : i32
    %c0_i32_0 = arith.constant 0 : i32
    %c0_i32_1 = arith.constant 0 : i32
    return %c0_i32, %c0_i32_0 : i32, i32
  }
  func.func @transform_9(%arg0: i32) -> (i32, i32) {
    %c0_i32 = arith.constant 0 : i32
    %c0_i32_0 = arith.constant 0 : i32
    %c0_i32_1 = arith.constant 0 : i32
    return %c0_i32, %c0_i32_0 : i32, i32
  }
  func.func @transform_10(%arg0: i32) -> (i32, i32, i32) {
    %c0_i32 = arith.constant 0 : i32
    %c0_i32_0 = arith.constant 0 : i32
    %c0_i32_1 = arith.constant 0 : i32
    return %arg0, %c0_i32, %c0_i32_0 : i32, i32, i32
  }
}

module attributes {stable_mosaic.version = 11 : i64} {
  func.func @_gnn_kernel(%arg0: i32, %arg1: memref<1x64x64xf32, #tpu.memory_space<vmem>>, %arg2: memref<1x64x64xf32, #tpu.memory_space<vmem>>, %arg3: memref<1x64x128xf32, #tpu.memory_space<vmem>>, %arg4: memref<128x256xf32, #tpu.memory_space<vmem>>, %arg5: memref<1x256xf32, #tpu.memory_space<vmem>>, %arg6: memref<128x384xf32, #tpu.memory_space<vmem>>, %arg7: memref<128x384xf32, #tpu.memory_space<vmem>>, %arg8: memref<128x384xf32, #tpu.memory_space<vmem>>, %arg9: memref<1x384xf32, #tpu.memory_space<vmem>>, %arg10: memref<1x384xf32, #tpu.memory_space<vmem>>, %arg11: memref<1x64x128xf32, #tpu.memory_space<vmem>>) attributes {dimension_semantics = [#tpu.dimension_semantics<parallel>], iteration_bounds = array<i64: 1>, scalar_prefetch = 0 : i64, scratch_operands = 0 : i64, tpu.core_type = #tpu.core_type<tc>, window_params = [{transform_indices = @transform_0, window_bounds = array<i64: 1, 64, 64>}, {transform_indices = @transform_1, window_bounds = array<i64: 1, 64, 64>}, {transform_indices = @transform_2, window_bounds = array<i64: 1, 64, 128>}, {pipeline_mode = #tpu.pipeline_mode<synchronous>, transform_indices = @transform_3, window_bounds = array<i64: 128, 256>}, {pipeline_mode = #tpu.pipeline_mode<synchronous>, transform_indices = @transform_4, window_bounds = array<i64: 1, 256>}, {pipeline_mode = #tpu.pipeline_mode<synchronous>, transform_indices = @transform_5, window_bounds = array<i64: 128, 384>}, {pipeline_mode = #tpu.pipeline_mode<synchronous>, transform_indices = @transform_6, window_bounds = array<i64: 128, 384>}, {pipeline_mode = #tpu.pipeline_mode<synchronous>, transform_indices = @transform_7, window_bounds = array<i64: 128, 384>}, {pipeline_mode = #tpu.pipeline_mode<synchronous>, transform_indices = @transform_8, window_bounds = array<i64: 1, 384>}, {pipeline_mode = #tpu.pipeline_mode<synchronous>, transform_indices = @transform_9, window_bounds = array<i64: 1, 384>}, {transform_indices = @transform_10, window_bounds = array<i64: 1, 64, 128>}]} {
    %c0 = arith.constant 0 : index
    %c0_0 = arith.constant 0 : index
    %c0_1 = arith.constant 0 : index
    %0 = vector.load %arg1[%c0, %c0_0, %c0_1] : memref<1x64x64xf32, #tpu.memory_space<vmem>>, vector<1x64x64xf32>
    %1 = vector.shape_cast %0 : vector<1x64x64xf32> to vector<64x64xf32>
    %c0_2 = arith.constant 0 : index
    %c0_3 = arith.constant 0 : index
    %c0_4 = arith.constant 0 : index
    %2 = vector.load %arg2[%c0_2, %c0_3, %c0_4] : memref<1x64x64xf32, #tpu.memory_space<vmem>>, vector<1x64x64xf32>
    %3 = vector.shape_cast %2 : vector<1x64x64xf32> to vector<64x64xf32>
    %c0_5 = arith.constant 0 : index
    %c0_6 = arith.constant 0 : index
    %4 = vector.load %arg4[%c0_5, %c0_6] : memref<128x256xf32, #tpu.memory_space<vmem>>, vector<128x256xf32>
    %c0_7 = arith.constant 0 : index
    %c0_8 = arith.constant 0 : index
    %5 = vector.load %arg6[%c0_7, %c0_8] : memref<128x384xf32, #tpu.memory_space<vmem>>, vector<128x384xf32>
    %c0_9 = arith.constant 0 : index
    %c0_10 = arith.constant 0 : index
    %6 = vector.load %arg7[%c0_9, %c0_10] : memref<128x384xf32, #tpu.memory_space<vmem>>, vector<128x384xf32>
    %c0_11 = arith.constant 0 : index
    %c0_12 = arith.constant 0 : index
    %7 = vector.load %arg8[%c0_11, %c0_12] : memref<128x384xf32, #tpu.memory_space<vmem>>, vector<128x384xf32>
    %c0_13 = arith.constant 0 : index
    %c0_14 = arith.constant 0 : index
    %8 = vector.load %arg5[%c0_13, %c0_14] : memref<1x256xf32, #tpu.memory_space<vmem>>, vector<1x256xf32>
    %c0_15 = arith.constant 0 : index
    %c0_16 = arith.constant 0 : index
    %9 = vector.load %arg9[%c0_15, %c0_16] : memref<1x384xf32, #tpu.memory_space<vmem>>, vector<1x384xf32>
    %c0_17 = arith.constant 0 : index
    %c0_18 = arith.constant 0 : index
    %10 = vector.load %arg10[%c0_17, %c0_18] : memref<1x384xf32, #tpu.memory_space<vmem>>, vector<1x384xf32>
    %c0_19 = arith.constant 0 : index
    %c0_20 = arith.constant 0 : index
    %c0_21 = arith.constant 0 : index
    %11 = vector.load %arg3[%c0_19, %c0_20, %c0_21] : memref<1x64x128xf32, #tpu.memory_space<vmem>>, vector<1x64x128xf32>
    %12 = vector.shape_cast %11 : vector<1x64x128xf32> to vector<64x128xf32>
    %cst = arith.constant dense<0.000000e+00> : vector<64x256xf32>
    %13 = tpu.matmul %12, %4, %cst {dimension_numbers = #tpu.dot_dimension_numbers<[1], [0], [0], [1], [0, 0, 1, 1], [], []>} : vector<64x128xf32>, vector<128x256xf32>, vector<64x256xf32> -> vector<64x256xf32>
    %14 = vector.broadcast %8 : vector<1x256xf32> to vector<64x256xf32>
    %15 = arith.addf %13, %14 : vector<64x256xf32>
    %16 = vector.extract_strided_slice %15 {offsets = [0, 0], sizes = [64, 128], strides = [1, 1]} : vector<64x256xf32> to vector<64x128xf32>
    %cst_22 = arith.constant dense<0.000000e+00> : vector<64x128xf32>
    %17 = tpu.matmul %1, %16, %cst_22 {dimension_numbers = #tpu.dot_dimension_numbers<[1], [0], [0], [1], [0, 0, 1, 1], [], []>} : vector<64x64xf32>, vector<64x128xf32>, vector<64x128xf32> -> vector<64x128xf32>
    %18 = vector.extract_strided_slice %15 {offsets = [0, 128], sizes = [64, 128], strides = [1, 1]} : vector<64x256xf32> to vector<64x128xf32>
    %cst_23 = arith.constant dense<0.000000e+00> : vector<64x128xf32>
    %19 = tpu.matmul %3, %18, %cst_23 {dimension_numbers = #tpu.dot_dimension_numbers<[1], [0], [0], [1], [0, 0, 1, 1], [], []>} : vector<64x64xf32>, vector<64x128xf32>, vector<64x128xf32> -> vector<64x128xf32>
    %cst_24 = arith.constant dense<0.000000e+00> : vector<64x384xf32>
    %20 = tpu.matmul %17, %5, %cst_24 {dimension_numbers = #tpu.dot_dimension_numbers<[1], [0], [0], [1], [0, 0, 1, 1], [], []>} : vector<64x128xf32>, vector<128x384xf32>, vector<64x384xf32> -> vector<64x384xf32>
    %cst_25 = arith.constant dense<0.000000e+00> : vector<64x384xf32>
    %21 = tpu.matmul %19, %6, %cst_25 {dimension_numbers = #tpu.dot_dimension_numbers<[1], [0], [0], [1], [0, 0, 1, 1], [], []>} : vector<64x128xf32>, vector<128x384xf32>, vector<64x384xf32> -> vector<64x384xf32>
    %22 = arith.addf %20, %21 : vector<64x384xf32>
    %23 = vector.broadcast %9 : vector<1x384xf32> to vector<64x384xf32>
    %24 = arith.addf %22, %23 : vector<64x384xf32>
    %cst_26 = arith.constant dense<0.000000e+00> : vector<64x384xf32>
    %25 = tpu.matmul %12, %7, %cst_26 {dimension_numbers = #tpu.dot_dimension_numbers<[1], [0], [0], [1], [0, 0, 1, 1], [], []>} : vector<64x128xf32>, vector<128x384xf32>, vector<64x384xf32> -> vector<64x384xf32>
    %26 = vector.broadcast %10 : vector<1x384xf32> to vector<64x384xf32>
    %27 = arith.addf %25, %26 : vector<64x384xf32>
    %28 = vector.extract_strided_slice %24 {offsets = [0, 0], sizes = [64, 128], strides = [1, 1]} : vector<64x384xf32> to vector<64x128xf32>
    %29 = vector.extract_strided_slice %27 {offsets = [0, 0], sizes = [64, 128], strides = [1, 1]} : vector<64x384xf32> to vector<64x128xf32>
    %30 = arith.addf %28, %29 : vector<64x128xf32>
    %31 = arith.negf %30 : vector<64x128xf32>
    %32 = math.exp %31 : vector<64x128xf32>
    %cst_27 = arith.constant 1.000000e+00 : f32
    %33 = vector.broadcast %cst_27 : f32 to vector<64x128xf32>
    %34 = arith.addf %33, %32 : vector<64x128xf32>
    %35 = arith.divf %33, %34 : vector<64x128xf32>
    %36 = vector.extract_strided_slice %24 {offsets = [0, 128], sizes = [64, 128], strides = [1, 1]} : vector<64x384xf32> to vector<64x128xf32>
    %37 = vector.extract_strided_slice %27 {offsets = [0, 128], sizes = [64, 128], strides = [1, 1]} : vector<64x384xf32> to vector<64x128xf32>
    %38 = arith.addf %36, %37 : vector<64x128xf32>
    %39 = arith.negf %38 : vector<64x128xf32>
    %40 = math.exp %39 : vector<64x128xf32>
    %cst_28 = arith.constant 1.000000e+00 : f32
    %41 = vector.broadcast %cst_28 : f32 to vector<64x128xf32>
    %42 = arith.addf %41, %40 : vector<64x128xf32>
    %43 = arith.divf %41, %42 : vector<64x128xf32>
    %44 = vector.extract_strided_slice %24 {offsets = [0, 256], sizes = [64, 128], strides = [1, 1]} : vector<64x384xf32> to vector<64x128xf32>
    %45 = vector.extract_strided_slice %27 {offsets = [0, 256], sizes = [64, 128], strides = [1, 1]} : vector<64x384xf32> to vector<64x128xf32>
    %46 = arith.mulf %35, %45 : vector<64x128xf32>
    %47 = arith.addf %44, %46 : vector<64x128xf32>
    %48 = math.tanh %47 : vector<64x128xf32>
    %49 = arith.subf %12, %48 : vector<64x128xf32>
    %50 = arith.mulf %43, %49 : vector<64x128xf32>
    %51 = arith.addf %48, %50 : vector<64x128xf32>
    %cst_29 = arith.constant dense<0.000000e+00> : vector<64x256xf32>
    %52 = tpu.matmul %51, %4, %cst_29 {dimension_numbers = #tpu.dot_dimension_numbers<[1], [0], [0], [1], [0, 0, 1, 1], [], []>} : vector<64x128xf32>, vector<128x256xf32>, vector<64x256xf32> -> vector<64x256xf32>
    %53 = vector.broadcast %8 : vector<1x256xf32> to vector<64x256xf32>
    %54 = arith.addf %52, %53 : vector<64x256xf32>
    %55 = vector.extract_strided_slice %54 {offsets = [0, 0], sizes = [64, 128], strides = [1, 1]} : vector<64x256xf32> to vector<64x128xf32>
    %cst_30 = arith.constant dense<0.000000e+00> : vector<64x128xf32>
    %56 = tpu.matmul %1, %55, %cst_30 {dimension_numbers = #tpu.dot_dimension_numbers<[1], [0], [0], [1], [0, 0, 1, 1], [], []>} : vector<64x64xf32>, vector<64x128xf32>, vector<64x128xf32> -> vector<64x128xf32>
    %57 = vector.extract_strided_slice %54 {offsets = [0, 128], sizes = [64, 128], strides = [1, 1]} : vector<64x256xf32> to vector<64x128xf32>
    %cst_31 = arith.constant dense<0.000000e+00> : vector<64x128xf32>
    %58 = tpu.matmul %3, %57, %cst_31 {dimension_numbers = #tpu.dot_dimension_numbers<[1], [0], [0], [1], [0, 0, 1, 1], [], []>} : vector<64x64xf32>, vector<64x128xf32>, vector<64x128xf32> -> vector<64x128xf32>
    %cst_32 = arith.constant dense<0.000000e+00> : vector<64x384xf32>
    %59 = tpu.matmul %56, %5, %cst_32 {dimension_numbers = #tpu.dot_dimension_numbers<[1], [0], [0], [1], [0, 0, 1, 1], [], []>} : vector<64x128xf32>, vector<128x384xf32>, vector<64x384xf32> -> vector<64x384xf32>
    %cst_33 = arith.constant dense<0.000000e+00> : vector<64x384xf32>
    %60 = tpu.matmul %58, %6, %cst_33 {dimension_numbers = #tpu.dot_dimension_numbers<[1], [0], [0], [1], [0, 0, 1, 1], [], []>} : vector<64x128xf32>, vector<128x384xf32>, vector<64x384xf32> -> vector<64x384xf32>
    %61 = arith.addf %59, %60 : vector<64x384xf32>
    %62 = vector.broadcast %9 : vector<1x384xf32> to vector<64x384xf32>
    %63 = arith.addf %61, %62 : vector<64x384xf32>
    %cst_34 = arith.constant dense<0.000000e+00> : vector<64x384xf32>
    %64 = tpu.matmul %51, %7, %cst_34 {dimension_numbers = #tpu.dot_dimension_numbers<[1], [0], [0], [1], [0, 0, 1, 1], [], []>} : vector<64x128xf32>, vector<128x384xf32>, vector<64x384xf32> -> vector<64x384xf32>
    %65 = vector.broadcast %10 : vector<1x384xf32> to vector<64x384xf32>
    %66 = arith.addf %64, %65 : vector<64x384xf32>
    %67 = vector.extract_strided_slice %63 {offsets = [0, 0], sizes = [64, 128], strides = [1, 1]} : vector<64x384xf32> to vector<64x128xf32>
    %68 = vector.extract_strided_slice %66 {offsets = [0, 0], sizes = [64, 128], strides = [1, 1]} : vector<64x384xf32> to vector<64x128xf32>
    %69 = arith.addf %67, %68 : vector<64x128xf32>
    %70 = arith.negf %69 : vector<64x128xf32>
    %71 = math.exp %70 : vector<64x128xf32>
    %cst_35 = arith.constant 1.000000e+00 : f32
    %72 = vector.broadcast %cst_35 : f32 to vector<64x128xf32>
    %73 = arith.addf %72, %71 : vector<64x128xf32>
    %74 = arith.divf %72, %73 : vector<64x128xf32>
    %75 = vector.extract_strided_slice %63 {offsets = [0, 128], sizes = [64, 128], strides = [1, 1]} : vector<64x384xf32> to vector<64x128xf32>
    %76 = vector.extract_strided_slice %66 {offsets = [0, 128], sizes = [64, 128], strides = [1, 1]} : vector<64x384xf32> to vector<64x128xf32>
    %77 = arith.addf %75, %76 : vector<64x128xf32>
    %78 = arith.negf %77 : vector<64x128xf32>
    %79 = math.exp %78 : vector<64x128xf32>
    %cst_36 = arith.constant 1.000000e+00 : f32
    %80 = vector.broadcast %cst_36 : f32 to vector<64x128xf32>
    %81 = arith.addf %80, %79 : vector<64x128xf32>
    %82 = arith.divf %80, %81 : vector<64x128xf32>
    %83 = vector.extract_strided_slice %63 {offsets = [0, 256], sizes = [64, 128], strides = [1, 1]} : vector<64x384xf32> to vector<64x128xf32>
    %84 = vector.extract_strided_slice %66 {offsets = [0, 256], sizes = [64, 128], strides = [1, 1]} : vector<64x384xf32> to vector<64x128xf32>
    %85 = arith.mulf %74, %84 : vector<64x128xf32>
    %86 = arith.addf %83, %85 : vector<64x128xf32>
    %87 = math.tanh %86 : vector<64x128xf32>
    %88 = arith.subf %51, %87 : vector<64x128xf32>
    %89 = arith.mulf %82, %88 : vector<64x128xf32>
    %90 = arith.addf %87, %89 : vector<64x128xf32>
    %c0_37 = arith.constant 0 : index
    %c0_38 = arith.constant 0 : index
    %c0_39 = arith.constant 0 : index
    %91 = vector.load %arg11[%c0_37, %c0_38, %c0_39] : memref<1x64x128xf32, #tpu.memory_space<vmem>>, vector<1x64x128xf32>
    %92 = vector.shape_cast %91 : vector<1x64x128xf32> to vector<64x128xf32>
    %93 = vector.shape_cast %90 : vector<64x128xf32> to vector<1x64x128xf32>
    tpu.vector_store %arg11[%c0_37, %c0_38, %c0_39], %93 {strides = array<i32>} : memref<1x64x128xf32, #tpu.memory_space<vmem>>, vector<1x64x128xf32>,
    return
  }
  func.func @transform_0(%arg0: i32) -> (i32, i32, i32) {
    %c0_i32 = arith.constant 0 : i32
    %c0_i32_0 = arith.constant 0 : i32
    %c0_i32_1 = arith.constant 0 : i32
    return %arg0, %c0_i32, %c0_i32_0 : i32, i32, i32
  }
  func.func @transform_1(%arg0: i32) -> (i32, i32, i32) {
    %c0_i32 = arith.constant 0 : i32
    %c0_i32_0 = arith.constant 0 : i32
    %c0_i32_1 = arith.constant 0 : i32
    return %arg0, %c0_i32, %c0_i32_0 : i32, i32, i32
  }
  func.func @transform_2(%arg0: i32) -> (i32, i32, i32) {
    %c0_i32 = arith.constant 0 : i32
    %c0_i32_0 = arith.constant 0 : i32
    %c0_i32_1 = arith.constant 0 : i32
    return %arg0, %c0_i32, %c0_i32_0 : i32, i32, i32
  }
  func.func @transform_3(%arg0: i32) -> (i32, i32) {
    %c0_i32 = arith.constant 0 : i32
    %c0_i32_0 = arith.constant 0 : i32
    %c0_i32_1 = arith.constant 0 : i32
    return %c0_i32, %c0_i32_0 : i32, i32
  }
  func.func @transform_4(%arg0: i32) -> (i32, i32) {
    %c0_i32 = arith.constant 0 : i32
    %c0_i32_0 = arith.constant 0 : i32
    %c0_i32_1 = arith.constant 0 : i32
    return %c0_i32, %c0_i32_0 : i32, i32
  }
  func.func @transform_5(%arg0: i32) -> (i32, i32) {
    %c0_i32 = arith.constant 0 : i32
    %c0_i32_0 = arith.constant 0 : i32
    %c0_i32_1 = arith.constant 0 : i32
    return %c0_i32, %c0_i32_0 : i32, i32
  }
  func.func @transform_6(%arg0: i32) -> (i32, i32) {
    %c0_i32 = arith.constant 0 : i32
    %c0_i32_0 = arith.constant 0 : i32
    %c0_i32_1 = arith.constant 0 : i32
    return %c0_i32, %c0_i32_0 : i32, i32
  }
  func.func @transform_7(%arg0: i32) -> (i32, i32) {
    %c0_i32 = arith.constant 0 : i32
    %c0_i32_0 = arith.constant 0 : i32
    %c0_i32_1 = arith.constant 0 : i32
    return %c0_i32, %c0_i32_0 : i32, i32
  }
  func.func @transform_8(%arg0: i32) -> (i32, i32) {
    %c0_i32 = arith.constant 0 : i32
    %c0_i32_0 = arith.constant 0 : i32
    %c0_i32_1 = arith.constant 0 : i32
    return %c0_i32, %c0_i32_0 : i32, i32
  }
  func.func @transform_9(%arg0: i32) -> (i32, i32) {
    %c0_i32 = arith.constant 0 : i32
    %c0_i32_0 = arith.constant 0 : i32
    %c0_i32_1 = arith.constant 0 : i32
    return %c0_i32, %c0_i32_0 : i32, i32
  }
  func.func @transform_10(%arg0: i32) -> (i32, i32, i32) {
    %c0_i32 = arith.constant 0 : i32
    %c0_i32_0 = arith.constant 0 : i32
    %c0_i32_1 = arith.constant 0 : i32
    return %arg0, %c0_i32, %c0_i32_0 : i32, i32, i32
  }
}

</mosaic_0001>

<bundles_post_ra>
// kernel: tpu_custom_call.1
= control target key start
LH: loop header
LB: loop body
LE: loop exit
PB: predicated region body
PF: predicated region fallthrough
CT: control target
= control target key end

     0   :  { %15 = vsyncpa [#allocation3], 0  ;;  %s5556_s0 = inlined_call_operand.hbm [shape: f32[1,64,64], index: 0, kind: input, shape index: {}]   ;;  %s5557_s1 = inlined_call_operand.hbm [shape: f32[1,64,64], index: 1, kind: input, shape index: {}]   ;;  %s5558_s2 = inlined_call_operand.hbm [shape: f32[1,64,128], index: 2, kind: input, shape index: {}]   ;;  %s5559_s3 = inlined_call_operand.hbm [shape: f32[128,256], index: 3, kind: input, shape index: {}]   ;;  %s5560_s4 = inlined_call_operand.vmem [shape: f32[1,256], index: 4, kind: input, shape index: {}]   ;;  %s5561_s5 = inlined_call_operand.hbm [shape: f32[128,384], index: 5, kind: input, shape index: {}]   ;;  %s5562_s6 = inlined_call_operand.hbm [shape: f32[128,384], index: 6, kind: input, shape index: {}]   ;;  %s5563_s7 = inlined_call_operand.hbm [shape: f32[128,384], index: 7, kind: input, shape index: {}]   ;;  %s5564_s8 = inlined_call_operand.vmem [shape: f32[1,384], index: 8, kind: input, shape index: {}]   ;;  %s5565_s9 = inlined_call_operand.vmem [shape: f32[1,384], index: 9, kind: input, shape index: {}]   ;;  %s5566_s10 = inlined_call_operand.hbm [shape: f32[1,64,128], index: 10, kind: output, shape index: {}]  }
   0x1   :  { %16 = vsyncpa [#allocation6], 0 }
   0x2   :  { %17 = vsyncpa [#allocation9], 0 }
   0x3   :  { %18 = vsyncpa [#allocation12], 0 }
   0x4   :  { %19 = vsyncpa [#allocation4], 0  ;;  %s4464_s13 = smov [#allocation5]   ;;  %s4465_s15 = smov [#allocation8]  }
   0x5   :  { %s37_s14 = sshll.u32 %s4464_s13, 4  ;;  %s61_s16 = sshll.u32 %s4465_s15, 4  ;;  %s38_s14 = int_to_ptr.vmem [resolvable:$true] %s37_s14  ;;  %s4534_s16 = int_to_ptr.vmem [resolvable:$true] %s61_s16 }
   0x6   :  { %s4278_s19 = scalar_lea.hbm %s5557_s1, 1024 }
   0x7   :  { %p4279_p0 = scmp.ne.s32.totalorder %s5557_s1, %s4278_s19  ;;  %p4282_p1 = scmp.lt.u32.totalorder %s4278_s19, %s5557_s1 }
   0x9   :  { %p4284_p2 = pnand %p4282_p1, %p4279_p0 }
   0xb   :  { %4287 = shalt.err (!%p4284_p2)
}
   0xc   :  { %s4288_s24 = scalar_lea.vmem %s38_s14, 1024  ;;  %p4293_p4 = scmp.lt.s32.totalorder %s38_s14, %s38_s14 }
   0xd   :  { %p4289_p3 = scmp.ne.s32.totalorder %s38_s14, %s4288_s24  ;;  %p4294_p5 = scmp.lt.s32.totalorder %s4288_s24, %s4288_s24 }
   0xf   :  { %p4295_p6 = por %p4294_p5, %p4293_p4 }
  0x11   :  { %p4296_p7 = pnand %p4295_p6, %p4289_p3 }
  0x13   :  { %4299 = shalt.err (!%p4296_p7)
}
  0x14   :  { %s4466_s25 = smov 128   ;;  %s4467_s26 = smov 8  }
  0x15   :  { %43 = dma.hbm_to_vmem [thread:$0]  %s5557_s1, 1024, %s38_s14, [#allocation6], %s4466_s25, %s4466_s25, %s4467_s26  }
  0x16   :  { %s4300_s11 = scalar_lea.hbm %s5559_s3, 4096 }
  0x17   :  { %p4301_p8 = scmp.ne.s32.totalorder %s5559_s3, %s4300_s11  ;;  %p4304_p9 = scmp.lt.u32.totalorder %s4300_s11, %s5559_s3 }
  0x19   :  { %p4306_p10 = pnand %p4304_p9, %p4301_p8 }
  0x1b   :  { %4309 = shalt.err (!%p4306_p10)
}
  0x1c   :  { %s4310_s18 = scalar_lea.vmem %s4534_s16, 4096  ;;  %p4315_p12 = scmp.lt.s32.totalorder %s4534_s16, %s4534_s16 }
  0x1d   :  { %p4311_p11 = scmp.ne.s32.totalorder %s4534_s16, %s4310_s18  ;;  %p4316_p13 = scmp.lt.s32.totalorder %s4310_s18, %s4310_s18 }
  0x1f   :  { %p4317_p0 = por %p4316_p13, %p4315_p12 }
  0x21   :  { %p4318_p1 = pnand %p4317_p0, %p4311_p11 }
  0x23   :  { %4321 = shalt.err (!%p4318_p1)
}
  0x24   :  { %s4468_s1 = smov 256   ;;  %s4469_s14 = smov 16  }
  0x25   :  { %67 = dma.hbm_to_vmem [thread:$0]  %s5559_s3, 4096, %s4534_s16, [#allocation9], %s4468_s1, %s4468_s1, %s4469_s14  }
  0x26   :  { %s4470_s21 = smov [#allocation11]   ;;  %s4471_s23 = smov [#allocation2]  }
  0x27   :  { %s87_s22 = sshll.u32 %s4470_s21, 4  ;;  %s25_s24 = sshll.u32 %s4471_s23, 4  ;;  %s88_s22 = int_to_ptr.vmem [resolvable:$true] %s87_s22  ;;  %s4568_s24 = int_to_ptr.vmem [resolvable:$true] %s25_s24 }
  0x28   :  { %s4322_s29 = scalar_lea.hbm %s5562_s6, 6144 }
  0x29   :  { %p4323_p2 = scmp.ne.s32.totalorder %s5562_s6, %s4322_s29  ;;  %p4326_p3 = scmp.lt.u32.totalorder %s4322_s29, %s5562_s6 }
  0x2b   :  { %p4328_p4 = pnand %p4326_p3, %p4323_p2 }
  0x2d   :  { %4331 = shalt.err (!%p4328_p4)
}
  0x2e   :  { %s4332_s3 = scalar_lea.vmem %s88_s22, 6144  ;;  %p4337_p6 = scmp.lt.s32.totalorder %s88_s22, %s88_s22 }
  0x2f   :  { %p4333_p5 = scmp.ne.s32.totalorder %s88_s22, %s4332_s3  ;;  %p4338_p7 = scmp.lt.s32.totalorder %s4332_s3, %s4332_s3 }
  0x31   :  { %p4339_p8 = por %p4338_p7, %p4337_p6 }
  0x33   :  { %p4340_p9 = pnand %p4339_p8, %p4333_p5 }
  0x35   :  { %4343 = shalt.err (!%p4340_p9)
}
  0x36   :  { %s4472_s16 = smov 384   ;;  %s4473_s15 = smov 24  }
  0x37   :  { %93 = dma.hbm_to_vmem [thread:$0]  %s5562_s6, 6144, %s88_s22, [#allocation12], %s4472_s16, %s4472_s16, %s4473_s15  }
  0x38   :  { %s4344_s19 = scalar_lea.hbm %s5556_s0, 1024 }
  0x39   :  { %p4345_p10 = scmp.ne.s32.totalorder %s5556_s0, %s4344_s19  ;;  %p4348_p11 = scmp.lt.u32.totalorder %s4344_s19, %s5556_s0 }
  0x3b   :  { %p4350_p12 = pnand %p4348_p11, %p4345_p10 }
  0x3d   :  { %4353 = shalt.err (!%p4350_p12)
}
  0x3e   :  { %s4354_s28 = scalar_lea.vmem %s4568_s24, 1024  ;;  %p4359_p0 = scmp.lt.s32.totalorder %s4568_s24, %s4568_s24 }
  0x3f   :  { %p4355_p13 = scmp.ne.s32.totalorder %s4568_s24, %s4354_s28  ;;  %p4360_p1 = scmp.lt.s32.totalorder %s4354_s28, %s4354_s28 }
  0x41   :  { %p4361_p2 = por %p4360_p1, %p4359_p0 }
  0x43   :  { %p4362_p3 = pnand %p4361_p2, %p4355_p13 }
  0x45   :  { %4365 = shalt.err (!%p4362_p3)
}
  0x46   :  { %31 = dma.hbm_to_vmem [thread:$0]  %s5556_s0, 1024, %s4568_s24, [#allocation3], %s4466_s25, %s4466_s25, %s4467_s26  }
  0x47   :  { %s4474_s29 = smov [#allocation7]   ;;  %s4475_s11 = smov [#allocation10]  }
  0x48   :  { %s49_s30 = sshll.u32 %s4474_s29, 4  ;;  %s75_s12 = sshll.u32 %s4475_s11, 4  ;;  %s50_s30 = int_to_ptr.vmem [resolvable:$true] %s49_s30  ;;  %s4605_s12 = int_to_ptr.vmem [resolvable:$true] %s75_s12 }
  0x49   :  { %s4366_s17 = scalar_lea.hbm %s5558_s2, 1024 }
  0x4a   :  { %p4367_p4 = scmp.ne.s32.totalorder %s5558_s2, %s4366_s17  ;;  %p4370_p5 = scmp.lt.u32.totalorder %s4366_s17, %s5558_s2 }
  0x4c   :  { %p4372_p6 = pnand %p4370_p5, %p4367_p4 }
  0x4e   :  { %4375 = shalt.err (!%p4372_p6)
}
  0x4f   :  { %s4376_s0 = scalar_lea.vmem %s50_s30, 1024  ;;  %p4381_p8 = scmp.lt.s32.totalorder %s50_s30, %s50_s30 }
  0x50   :  { %p4377_p7 = scmp.ne.s32.totalorder %s50_s30, %s4376_s0  ;;  %p4382_p9 = scmp.lt.s32.totalorder %s4376_s0, %s4376_s0 }
  0x52   :  { %p4383_p10 = por %p4382_p9, %p4381_p8 }
  0x54   :  { %p4384_p11 = pnand %p4383_p10, %p4377_p7 }
  0x56   :  { %4387 = shalt.err (!%p4384_p11)
}
  0x57   :  { %55 = dma.hbm_to_vmem [thread:$0]  %s5558_s2, 1024, %s50_s30, [#allocation6], %s4466_s25, %s4466_s25, %s4467_s26  }
  0x58   :  { %s4388_s27 = scalar_lea.hbm %s5561_s5, 6144 }
  0x59   :  { %p4389_p12 = scmp.ne.s32.totalorder %s5561_s5, %s4388_s27  ;;  %p4392_p13 = scmp.lt.u32.totalorder %s4388_s27, %s5561_s5 }
  0x5b   :  { %p4394_p0 = pnand %p4392_p13, %p4389_p12 }
  0x5d   :  { %4397 = shalt.err (!%p4394_p0)
}
  0x5e   :  { %s4398_s11 = scalar_lea.vmem %s4605_s12, 6144  ;;  %p4403_p2 = scmp.lt.s32.totalorder %s4605_s12, %s4605_s12 }
  0x5f   :  { %p4399_p1 = scmp.ne.s32.totalorder %s4605_s12, %s4398_s11  ;;  %p4404_p3 = scmp.lt.s32.totalorder %s4398_s11, %s4398_s11 }
  0x61   :  { %p4405_p4 = por %p4404_p3, %p4403_p2 }
  0x63   :  { %p4406_p5 = pnand %p4405_p4, %p4399_p1 }
  0x65   :  { %4409 = shalt.err (!%p4406_p5)
}
  0x66   :  { %81 = dma.hbm_to_vmem [thread:$0]  %s5561_s5, 6144, %s4605_s12, [#allocation9], %s4472_s16, %s4472_s16, %s4473_s15  }
  0x67   :  { %s4476_s13 = smov [#allocation13]   ;;  %s4410_s1 = scalar_lea.hbm %s5563_s7, 6144 }
  0x68   :  { %s99_s3 = sshll.u32 %s4476_s13, 4  ;;  %p4411_p6 = scmp.ne.s32.totalorder %s5563_s7, %s4410_s1  ;;  %s100_s3 = int_to_ptr.vmem [resolvable:$true] %s99_s3 }
  0x69   :  { %p4414_p7 = scmp.lt.u32.totalorder %s4410_s1, %s5563_s7 }
  0x6b   :  { %p4416_p8 = pnand %p4414_p7, %p4411_p6 }
  0x6d   :  { %4419 = shalt.err (!%p4416_p8)
}
  0x6e   :  { %s4420_s20 = scalar_lea.vmem %s100_s3, 6144  ;;  %p4425_p10 = scmp.lt.s32.totalorder %s100_s3, %s100_s3 }
  0x6f   :  { %p4421_p9 = scmp.ne.s32.totalorder %s100_s3, %s4420_s20  ;;  %p4426_p11 = scmp.lt.s32.totalorder %s4420_s20, %s4420_s20 }
  0x71   :  { %p4427_p12 = por %p4426_p11, %p4425_p10 }
  0x73   :  { %p4428_p13 = pnand %p4427_p12, %p4421_p9 }
  0x75   :  { %4431 = shalt.err (!%p4428_p13)
}
  0x76   :  { %105 = dma.hbm_to_vmem [thread:$0]  %s5563_s7, 6144, %s100_s3, [#allocation12], %s4472_s16, %s4472_s16, %s4473_s15  }
  0x77   :  { %4454 = dma.done.wait [#allocation3], 1024  }
  0x78   :  { %4455 = vsyncadd [#allocation3], 4294966272 }
  0x79   :  { %4456 = dma.done.wait [#allocation6], 2048  }
  0x7a   :  { %4457 = vsyncadd [#allocation6], 4294965248 }
  0x7b   :  { %4458 = dma.done.wait [#allocation9], 10240  }
  0x7c   :  { %4459 = vsyncadd [#allocation9], 4294957056 }
  0x7d   :  { %4460 = dma.done.wait [#allocation12], 12288  }
  0x7e   :  { %4461 = vsyncadd [#allocation12], 4294955008  ;;  %v5567_v0 = vmov 0.0   ;;  %v148_v1 = vld [vmem:[#allocation8 + $0x8] sm:$0xff]  ;;  %v150_v2 = vld [vmem:[#allocation8 + $0x18] sm:$0xff]  ;;  %vm458_vm0 = vcmask 523264  }
  0x7f   :  { %409 = vmatprep.mubr.f32.mxu0 %v5567_v0  ;;  %v147_v3 = vld [vmem:[#allocation8] sm:$0xff]  ;;  %v4658_v4 = vpack.c.bf16 %v150_v2, %v148_v1  ;;  %v149_v5 = vld [vmem:[#allocation8 + $0x10] sm:$0xff]  ;;  %v152_v6 = vld [vmem:[#allocation8 + $0x28] sm:$0xff] }
  0x80   :  { %v154_v7 = vld [vmem:[#allocation8 + $0x38] sm:$0xff]  ;;  %v4660_v8 = vpack.c.bf16 %v149_v5, %v147_v3  ;;  %v151_v10 = vld [vmem:[#allocation8 + $0x20] sm:$0xff]  ;;  %v153_v11 = vld [vmem:[#allocation8 + $0x30] sm:$0xff] }
  0x81   :  { %v4662_v9 = vpack.c.bf16 %v154_v7, %v152_v6  ;;  %v156_v12 = vld [vmem:[#allocation8 + $0x48] sm:$0xff]  ;;  %3425 = vmatprep.subr.bf16.mxu0 %v4658_v4  ;;  %v158_v13 = vld [vmem:[#allocation8 + $0x58] sm:$0xff]  ;;  %v4666_v14 = vpack.c.bf16 %v153_v11, %v151_v10  ;;  %v155_v16 = vld [vmem:[#allocation8 + $0x40] sm:$0xff] }
  0x82   :  { %3427 = vmatpush1.bf16.msra.mxu0 %v4660_v8  ;;  %v4669_v15 = vpack.c.bf16 %v158_v13, %v156_v12  ;;  %v157_v17 = vld [vmem:[#allocation8 + $0x50] sm:$0xff]  ;;  %v160_v18 = vld [vmem:[#allocation8 + $0x68] sm:$0xff]  ;;  %v162_v19 = vld [vmem:[#allocation8 + $0x78] sm:$0xff] }
  0x83   :  { %3429 = vmatprep.subr.bf16.mxu0 %v4662_v9  ;;  %v4672_v20 = vpack.c.bf16 %v157_v17, %v155_v16  ;;  %v4675_v21 = vpack.c.bf16 %v162_v19, %v160_v18  ;;  %v159_v22 = vld [vmem:[#allocation8 + $0x60] sm:$0xff]  ;;  %v161_v23 = vld [vmem:[#allocation8 + $0x70] sm:$0xff]  ;;  %v164_v24 = vld [vmem:[#allocation8 + $0x88] sm:$0xff] }
  0x84   :  { %v166_v25 = vld [vmem:[#allocation8 + $0x98] sm:$0xff]  ;;  %v4678_v26 = vpack.c.bf16 %v161_v23, %v159_v22  ;;  %v163_v28 = vld [vmem:[#allocation8 + $0x80] sm:$0xff]  ;;  %v165_v29 = vld [vmem:[#allocation8 + $0x90] sm:$0xff] }
  0x85   :  { %v4681_v27 = vpack.c.bf16 %v166_v25, %v164_v24  ;;  %v168_v30 = vld [vmem:[#allocation8 + $0xa8] sm:$0xff]  ;;  %v170_v31 = vld [vmem:[#allocation8 + $0xb8] sm:$0xff]  ;;  %v4684_v32 = vpack.c.bf16 %v165_v29, %v163_v28  ;;  %v167_v34 = vld [vmem:[#allocation8 + $0xa0] sm:$0xff]  ;;  %v335_v28 = vlaneseq }
  0x86   :  { %3431 = vmatpush1.bf16.msra.mxu0 %v4666_v14  ;;  %v4687_v33 = vpack.c.bf16 %v170_v31, %v168_v30  ;;  %v169_v35 = vld [vmem:[#allocation8 + $0xb0] sm:$0xff]  ;;  %v172_v36 = vld [vmem:[#allocation8 + $0xc8] sm:$0xff]  ;;  %v174_v37 = vld [vmem:[#allocation8 + $0xd8] sm:$0xff] }
  0x87   :  { %3433 = vmatprep.subr.bf16.mxu0 %v4669_v15  ;;  %v4690_v38 = vpack.c.bf16 %v169_v35, %v167_v34  ;;  %v4693_v39 = vpack.c.bf16 %v174_v37, %v172_v36  ;;  %v171_v40 = vld [vmem:[#allocation8 + $0xc0] sm:$0xff]  ;;  %v173_v41 = vld [vmem:[#allocation8 + $0xd0] sm:$0xff]  ;;  %v176_v42 = vld [vmem:[#allocation8 + $0xe8] sm:$0xff]  ;;  %v4766_v29 = vshrl.u32 %v335_v28, 7 }
  0x88   :  { %v178_v43 = vld [vmem:[#allocation8 + $0xf8] sm:$0xff]  ;;  %v4696_v44 = vpack.c.bf16 %v173_v41, %v171_v40  ;;  %v175_v46 = vld [vmem:[#allocation8 + $0xe0] sm:$0xff]  ;;  %v177_v47 = vld [vmem:[#allocation8 + $0xf0] sm:$0xff] }
  0x89   :  { %v4699_v45 = vpack.c.bf16 %v178_v43, %v176_v42  ;;  %v4702_v48 = vpack.c.bf16 %v177_v47, %v175_v46  ;;  %v4706_v49 = vld [vmem:[#allocation7] sm:$0xff]  ;;  %v4710_v50 = vld [vmem:[#allocation7 + $0x8] sm:$0xff]  ;;  %v4714_v51 = vld [vmem:[#allocation7 + $0x10] sm:$0xff]  ;;  %v4769_v30 = vsub.s32 0, %v4766_v29  ;;  %v4775_v34 = vsub.s32 1, %v4766_v29 }
  0x8a   :  { %3435 = vmatpush1.bf16.msra.mxu0 %v4672_v20  ;;  %v4718_v52 = vld [vmem:[#allocation7 + $0x18] sm:$0xff]  ;;  %v4722_v53 = vld [vmem:[#allocation7 + $0x20] sm:$0xff]  ;;  %v4726_v54 = vld [vmem:[#allocation7 + $0x28] sm:$0xff] }
  0x8b   :  { %3437 = vmatprep.subr.bf16.mxu0 %v4675_v21  ;;  %v4730_v55 = vld [vmem:[#allocation7 + $0x30] sm:$0xff]  ;;  %v4734_v56 = vld [vmem:[#allocation7 + $0x38] sm:$0xff]  ;;  %v4738_v57 = vld [vmem:[#allocation2] sm:$0xff] }
  0x8c   :  { %3064 = vmatprep.mubr.msk.f32.mxu1 %vm458_vm0, %v4738_v57  ;;  %v228_v58 = vld [vmem:[#allocation11 + $0x8] sm:$0xff]  ;;  %v231_v59 = vld [vmem:[#allocation11 + $0x20] sm:$0xff]  ;;  %v230_v62 = vld [vmem:[#allocation11 + $0x18] sm:$0xff] }
  0x8d   :  { %v4742_v60 = vpack.c.bf16 %v231_v59, %v228_v58  ;;  %v227_v61 = vld [vmem:[#allocation11] sm:$0xff]  ;;  %v234_v1 = vld [vmem:[#allocation11 + $0x38] sm:$0xff]  ;;  %v237_v2 = vld [vmem:[#allocation11 + $0x50] sm:$0xff] }
  0x8e   :  { %3439 = vmatpush1.bf16.msra.mxu0 %v4678_v26  ;;  %v4744_v63 = vpack.c.bf16 %v230_v62, %v227_v61  ;;  %v4747_v3 = vpack.c.bf16 %v237_v2, %v234_v1  ;;  %v233_v5 = vld [vmem:[#allocation11 + $0x30] sm:$0xff]  ;;  %v236_v6 = vld [vmem:[#allocation11 + $0x48] sm:$0xff]  ;;  %v243_v11 = vld [vmem:[#allocation11 + $0x80] sm:$0xff] }
  0x8f   :  { %3441 = vmatprep.subr.bf16.mxu0 %v4681_v27  ;;  %v4750_v7 = vpack.c.bf16 %v236_v6, %v233_v5  ;;  %v240_v10 = vld [vmem:[#allocation11 + $0x68] sm:$0xff]  ;;  %v239_v13 = vld [vmem:[#allocation11 + $0x60] sm:$0xff]  ;;  %v242_v16 = vld [vmem:[#allocation11 + $0x78] sm:$0xff] }
  0x90   :  { %v4753_v12 = vpack.c.bf16 %v243_v11, %v240_v10  ;;  %v246_v17 = vld [vmem:[#allocation11 + $0x98] sm:$0xff]  ;;  %v249_v18 = vld [vmem:[#allocation11 + $0xb0] sm:$0xff]  ;;  %v4756_v19 = vpack.c.bf16 %v242_v16, %v239_v13  ;;  %v248_v24 = vld [vmem:[#allocation11 + $0xa8] sm:$0xff] }
  0x91   :  { %v4759_v22 = vpack.c.bf16 %v249_v18, %v246_v17  ;;  %v245_v23 = vld [vmem:[#allocation11 + $0x90] sm:$0xff]  ;;  %v323_v31 = vld [vmem:[%s5560_s4] sm:$0x3] }
  0x92   :  { %3443 = vmatpush1.bf16.msra.mxu0 %v4684_v32  ;;  %v4762_v25 = vpack.c.bf16 %v248_v24, %v245_v23  ;;  %v4778_v36 = vrot.slane %v323_v31, %v4769_v30  ;;  %v4781_v40 = vrot.slane %v323_v31, %v4775_v34 }
  0x93   :  { %3445 = vmatprep.subr.bf16.mxu0 %v4687_v33  ;;  %5638 = vst [vmem:[#allocation20_spill] sm:$0xff] %v4759_v22 }
  0x94   :  { %5639 = vst [vmem:[#allocation21_spill] sm:$0xff] %v4762_v25  ;;  %5640 = vst [vmem:[#allocation22_spill] sm:$0xff] %v4778_v36 }
  0x95   :  { %5641 = vst [vmem:[#allocation23_spill] sm:$0xff] %v4781_v40 }
  0x96   :  { %3447 = vmatpush1.bf16.msra.mxu0 %v4690_v38 }
  0x97   :  { %3449 = vmatprep.subr.bf16.mxu0 %v4693_v39 }
  0x9a   :  { %3451 = vmatpush1.bf16.msra.mxu0 %v4696_v44 }
  0x9b   :  { %3453 = vmatprep.subr.bf16.mxu0 %v4699_v45 }
  0x9e   :  { %3455 = vmatpush1.bf16.msra.mxu0 %v4702_v48 }
  0x9f   :  { %3489 = vmatprep.subr.bf16.mxu0 %v4742_v60 }
  0xa1   :  { %410 = vmatmul.mubr.f32.vlgmr.msra.gmra.mrb[0].mxu0 %v4706_v49 }
  0xa2   :  { %415 = vmatprep.mubr.f32.mxu0 %v5567_v0  ;;  %3491 = vmatpush1.bf16.msra.mxu0 %v4744_v63 }
  0xa3   :  { %3493 = vmatprep.subr.bf16.mxu0 %v4747_v3 }
  0xa5   :  { %416 = vmatmul.mubr.f32.gmra.mrb[2].mxu0 %v4710_v50 }
  0xa6   :  { %421 = vmatprep.mubr.f32.mxu0 %v5567_v0  ;;  %3495 = vmatpush1.bf16.msra.mxu0 %v4750_v7 }
  0xa7   :  { %3497 = vmatprep.subr.bf16.mxu0 %v4753_v12 }
  0xa9   :  { %422 = vmatmul.mubr.f32.gmra.mrb[4].mxu0 %v4714_v51 }
  0xaa   :  { %427 = vmatprep.mubr.f32.mxu0 %v5567_v0  ;;  %3499 = vmatpush1.bf16.msra.mxu0 %v4756_v19 }
  0xab   :  { %3501 = vmatprep.subr.bf16.mxu0 %v4759_v22 }
  0xad   :  { %428 = vmatmul.mubr.f32.gmra.mrb[6].mxu0 %v4718_v52 }
  0xae   :  { %433 = vmatprep.mubr.f32.mxu0 %v5567_v0  ;;  %3503 = vmatpush1.bf16.msra.mxu0 %v4762_v25  ;;  %v208_v25 = vld [vmem:[#allocation10 + $0xe8] sm:$0xff] }
  0xb1   :  { %434 = vmatmul.mubr.f32.gmra.mrb[8].mxu0 %v4722_v53 }
  0xb2   :  { %439 = vmatprep.mubr.f32.mxu0 %v5567_v0 }
  0xb5   :  { %440 = vmatmul.mubr.f32.gmra.mrb[10].mxu0 %v4726_v54 }
  0xb6   :  { %445 = vmatprep.mubr.f32.mxu0 %v5567_v0 }
  0xb9   :  { %446 = vmatmul.mubr.f32.gmra.mrb[12].mxu0 %v4730_v55 }
  0xba   :  { %451 = vmatprep.mubr.f32.mxu0 %v5567_v0 }
  0xbd   :  { %452 = vmatmul.mubr.f32.gmra.mrb[14].mxu0 %v4734_v56 }
  0xbe   :  { %781 = vmatprep.mubr.f32.mxu0 %v5567_v0 }
 0x174   :  { %v411_v35 = vpop.f32.mrb[0].mxu0 }
 0x175   :  { %v413_v37 = vpop.f32.mrb[1].mxu0  ;;  %v412_v42 = vadd.f32 %v411_v35, %v4778_v36 }
 0x176   :  { %v414_v47 = vadd.f32 %v413_v37, %v4781_v40 }
 0x178   :  { %v417_v41 = vpop.f32.mrb[2].mxu0 }
 0x179   :  { %v418_v43 = vadd.f32 %v417_v41, %v4778_v36  ;;  %v419_v46 = vpop.f32.mrb[3].mxu0 }
 0x17a   :  { %v420_v58 = vadd.f32 %v419_v46, %v4781_v40 }
 0x17b   :  { %v3456_v59 = vpack.c.bf16 %v418_v43, %v412_v42 }
 0x17c   :  { %v3472_v61 = vpack.c.bf16 %v420_v58, %v414_v47  ;;  %v423_v62 = vpop.f32.mrb[4].mxu0 }
 0x17d   :  { %v425_v1 = vpop.f32.mrb[5].mxu0  ;;  %3457 = vmatprep.subr.bf16.mxu1 %v3456_v59  ;;  %v424_v5 = vadd.f32 %v423_v62, %v4778_v36 }
 0x17e   :  { %3459 = vmatpush3.bf16.msra.mxu1 %v3456_v59  ;;  %v426_v11 = vadd.f32 %v425_v1, %v4781_v40 }
 0x180   :  { %v429_v2 = vpop.f32.mrb[6].mxu0 }
 0x181   :  { %v430_v6 = vadd.f32 %v429_v2, %v4778_v36  ;;  %v431_v10 = vpop.f32.mrb[7].mxu0 }
 0x182   :  { %v432_v13 = vadd.f32 %v431_v10, %v4781_v40 }
 0x183   :  { %v3460_v16 = vpack.c.bf16 %v430_v6, %v424_v5 }
 0x184   :  { %v3476_v17 = vpack.c.bf16 %v432_v13, %v426_v11  ;;  %v435_v18 = vpop.f32.mrb[8].mxu0  ;;  %v132_v11 = vld [vmem:[#allocation2 + $0x8] sm:$0xff]  ;;  %v133_v13 = vld [vmem:[#allocation2 + $0x10] sm:$0xff] }
 0x185   :  { %v437_v23 = vpop.f32.mrb[9].mxu0  ;;  %3461 = vmatprep.subr.bf16.mxu1 %v3460_v16  ;;  %v436_v28 = vadd.f32 %v435_v18, %v4778_v36  ;;  %v135_v18 = vld [vmem:[#allocation2 + $0x20] sm:$0xff] }
 0x186   :  { %3463 = vmatpush3.bf16.msra.mxu1 %v3460_v16  ;;  %v438_v37 = vadd.f32 %v437_v23, %v4781_v40  ;;  %v134_v16 = vld [vmem:[#allocation2 + $0x18] sm:$0xff]  ;;  %v136_v23 = vld [vmem:[#allocation2 + $0x28] sm:$0xff] }
 0x188   :  { %v441_v24 = vpop.f32.mrb[10].mxu0 }
 0x189   :  { %v442_v31 = vadd.f32 %v441_v24, %v4778_v36  ;;  %v443_v35 = vpop.f32.mrb[11].mxu0  ;;  %v137_v24 = vld [vmem:[#allocation2 + $0x30] sm:$0xff] }
 0x18a   :  { %v444_v41 = vadd.f32 %v443_v35, %v4781_v40  ;;  %v139_v35 = vld [vmem:[#allocation5] sm:$0xff] }
 0x18b   :  { %v3464_v42 = vpack.c.bf16 %v442_v31, %v436_v28  ;;  %v229_v28 = vld [vmem:[#allocation11 + $0x10] sm:$0xff]  ;;  %v232_v31 = vld [vmem:[#allocation11 + $0x28] sm:$0xff] }
 0x18c   :  { %v3480_v43 = vpack.c.bf16 %v444_v41, %v438_v37  ;;  %v447_v46 = vpop.f32.mrb[12].mxu0  ;;  %v4805_v37 = vpack.c.bf16 %v232_v31, %v229_v28  ;;  %v235_v41 = vld [vmem:[#allocation11 + $0x40] sm:$0xff]  ;;  %v256_v28 = vld [vmem:[#allocation11 + $0xe8] sm:$0xff] }
 0x18d   :  { %v449_v47 = vpop.f32.mrb[13].mxu0  ;;  %3465 = vmatprep.subr.bf16.mxu1 %v3464_v42  ;;  %v448_v59 = vadd.f32 %v447_v46, %v4778_v36  ;;  %v141_v46 = vld [vmem:[#allocation5 + $0x10] sm:$0xff]  ;;  %v251_v31 = vld [vmem:[#allocation11 + $0xc0] sm:$0xff] }
 0x18e   :  { %3467 = vmatpush3.bf16.msra.mxu1 %v3464_v42  ;;  %v450_v2 = vadd.f32 %v449_v47, %v4781_v40  ;;  %5642 = vst [vmem:[#allocation24_spill] sm:$0xff] %v4805_v37  ;;  %v238_v42 = vld [vmem:[#allocation11 + $0x58] sm:$0xff] }
 0x18f   :  { %v4810_v47 = vpack.c.bf16 %v238_v42, %v235_v41  ;;  %v258_v42 = vld [vmem:[#allocation11 + $0xf8] sm:$0xff] }
 0x190   :  { %v453_v58 = vpop.f32.mrb[14].mxu0 }
 0x191   :  { %v454_v62 = vadd.f32 %v453_v58, %v4778_v36  ;;  %v455_v1 = vpop.f32.mrb[15].mxu0  ;;  %5643 = vst [vmem:[#allocation25_spill] sm:$0xff] %v4810_v47  ;;  %v244_v58 = vld [vmem:[#allocation11 + $0x88] sm:$0xff] }
 0x192   :  { %v456_v5 = vadd.f32 %v455_v1, %v4781_v40  ;;  %v185_v40 = vld [vmem:[#allocation10 + $0x30] sm:$0xff]  ;;  %v188_v36 = vld [vmem:[#allocation10 + $0x48] sm:$0xff] }
 0x193   :  { %v3468_v6 = vpack.c.bf16 %v454_v62, %v448_v59  ;;  %v142_v59 = vld [vmem:[#allocation5 + $0x18] sm:$0xff]  ;;  %v143_v62 = vld [vmem:[#allocation5 + $0x20] sm:$0xff] }
 0x194   :  { %v3484_v10 = vpack.c.bf16 %v456_v5, %v450_v2  ;;  %v247_v2 = vld [vmem:[#allocation11 + $0xa0] sm:$0xff]  ;;  %v250_v5 = vld [vmem:[#allocation11 + $0xb8] sm:$0xff] }
 0x195   :  { %3469 = vmatprep.subr.bf16.mxu1 %v3468_v6 }
 0x196   :  { %3471 = vmatpush3.bf16.msra.mxu1 %v3468_v6  ;;  %v144_v6 = vld [vmem:[#allocation5 + $0x28] sm:$0xff] }
 0x197   :  { %3473 = vmatprep.subr.bf16.mxu1 %v3472_v61 }
 0x199   :  { %3065 = vmatmul.mubr.msk.f32.vlgmr.msra.gmra.mrb[0].mxu1 %vm458_vm0, %v132_v11  ;;  %v4822_v11 = vpack.c.bf16 %v250_v5, %v247_v2 }
 0x19a   :  { %3475 = vmatpush3.bf16.msra.mxu1 %v3472_v61  ;;  %3067 = vmatprep.mubr.msk.f32.mxu1 %vm458_vm0, %v133_v13  ;;  %v138_v61 = vld [vmem:[#allocation2 + $0x38] sm:$0xff] }
 0x19b   :  { %3477 = vmatprep.subr.bf16.mxu1 %v3476_v17  ;;  %5645 = vst [vmem:[#allocation27_spill] sm:$0xff] %v4822_v11  ;;  %v146_v13 = vld [vmem:[#allocation5 + $0x38] sm:$0xff] }
 0x19d   :  { %3068 = vmatmul.mubr.msk.f32.gmra.mrb[2].mxu1 %vm458_vm0, %v134_v16  ;;  %v252_v16 = vld [vmem:[#allocation11 + $0xc8] sm:$0xff] }
 0x19e   :  { %3479 = vmatpush3.bf16.msra.mxu1 %v3476_v17  ;;  %3070 = vmatprep.mubr.msk.f32.mxu1 %vm458_vm0, %v135_v18  ;;  %v140_v17 = vld [vmem:[#allocation5 + $0x8] sm:$0xff]  ;;  %v255_v18 = vld [vmem:[#allocation11 + $0xe0] sm:$0xff] }
 0x19f   :  { %3481 = vmatprep.subr.bf16.mxu1 %v3480_v43 }
 0x1a1   :  { %3071 = vmatmul.mubr.msk.f32.gmra.mrb[4].mxu1 %vm458_vm0, %v136_v23  ;;  %v253_v23 = vld [vmem:[#allocation11 + $0xd0] sm:$0xff] }
 0x1a2   :  { %3483 = vmatpush3.bf16.msra.mxu1 %v3480_v43  ;;  %3073 = vmatprep.mubr.msk.f32.mxu1 %vm458_vm0, %v137_v24  ;;  %v241_v43 = vld [vmem:[#allocation11 + $0x70] sm:$0xff]  ;;  %v4830_v24 = vpack.c.bf16 %v255_v18, %v252_v16  ;;  %v268_v18 = vld [vmem:[#allocation11 + $0x148] sm:$0xff] }
 0x1a3   :  { %3485 = vmatprep.subr.bf16.mxu1 %v3484_v10  ;;  %v4816_v1 = vpack.c.bf16 %v244_v58, %v241_v43  ;;  %v262_v58 = vld [vmem:[#allocation11 + $0x118] sm:$0xff] }
 0x1a4   :  { %5646 = vst [vmem:[#allocation28_spill] sm:$0xff] %v4830_v24  ;;  %3505 = vmatprep.subr.bf16.mxu0 %v4830_v24  ;;  %v198_v24 = vld [vmem:[#allocation10 + $0x98] sm:$0xff] }
 0x1a5   :  { %3074 = vmatmul.mubr.msk.f32.gmra.mrb[6].mxu1 %vm458_vm0, %v138_v61  ;;  %5644 = vst [vmem:[#allocation26_spill] sm:$0xff] %v4816_v1  ;;  %v254_v61 = vld [vmem:[#allocation11 + $0xd8] sm:$0xff] }
 0x1a6   :  { %3487 = vmatpush3.bf16.msra.mxu1 %v3484_v10  ;;  %3092 = vmatprep.mubr.msk.f32.mxu1 %vm458_vm0, %v139_v35  ;;  %v145_v10 = vld [vmem:[#allocation5 + $0x30] sm:$0xff]  ;;  %v4832_v35 = vpack.c.bf16 %v256_v28, %v253_v23  ;;  %v4834_v41 = vpack.c.bf16 %v254_v61, %v251_v31  ;;  %v263_v23 = vld [vmem:[#allocation11 + $0x120] sm:$0xff]  ;;  %v266_v28 = vld [vmem:[#allocation11 + $0x138] sm:$0xff] }
 0x1a7   :  { %3521 = vmatprep.subr.bf16.mxu1 %v4805_v37  ;;  %v4854_v61 = vpack.c.bf16 %v266_v28, %v263_v23  ;;  %v183_v23 = vld [vmem:[#allocation10 + $0x20] sm:$0xff]  ;;  %v181_v28 = vld [vmem:[#allocation10 + $0x10] sm:$0xff] }
 0x1a8   :  { %5647 = vst [vmem:[#allocation29_spill] sm:$0xff] %v4832_v35  ;;  %5648 = vst [vmem:[#allocation30_spill] sm:$0xff] %v4834_v41  ;;  %3507 = vmatpush1.bf16.msra.mxu0 %v4834_v41  ;;  %v4899_v41 = vpack.c.bf16 %v188_v36, %v185_v40  ;;  %v201_v36 = vld [vmem:[#allocation10 + $0xb0] sm:$0xff]  ;;  %v199_v40 = vld [vmem:[#allocation10 + $0xa0] sm:$0xff] }
 0x1a9   :  { %3093 = vmatmul.mubr.msk.f32.vlgmr.msra.gmra.mrb[8].mxu1 %vm458_vm0, %v140_v17  ;;  %v261_v17 = vld [vmem:[#allocation11 + $0x110] sm:$0xff]  ;;  %5654 = vst [vmem:[#allocation36_spill] sm:$0xff] %v4854_v61 }
 0x1aa   :  { %3095 = vmatprep.mubr.msk.f32.mxu1 %vm458_vm0, %v141_v46  ;;  %3523 = vmatpush3.bf16.msra.mxu1 %v4805_v37  ;;  %v259_v46 = vld [vmem:[#allocation11 + $0x100] sm:$0xff]  ;;  %v4840_v43 = vpack.c.bf16 %v261_v17, %v258_v42  ;;  %v270_v42 = vld [vmem:[#allocation11 + $0x158] sm:$0xff]  ;;  %v273_v17 = vld [vmem:[#allocation11 + $0x170] sm:$0xff]  ;;  %5663 = vst [vmem:[#allocation45_spill] sm:$0xff] %v4899_v41 }
 0x1ab   :  { %3525 = vmatprep.subr.bf16.mxu1 %v4810_v47  ;;  %v4842_v2 = vpack.c.bf16 %v262_v58, %v259_v46  ;;  %v271_v46 = vld [vmem:[#allocation11 + $0x160] sm:$0xff]  ;;  %v4860_v58 = vpack.c.bf16 %v273_v17, %v270_v42  ;;  %v184_v17 = vld [vmem:[#allocation10 + $0x28] sm:$0xff] }
 0x1ac   :  { %5649 = vst [vmem:[#allocation31_spill] sm:$0xff] %v4840_v43  ;;  %3509 = vmatprep.subr.bf16.mxu0 %v4840_v43  ;;  %v4872_v0 = vpack.c.bf16 %v184_v17, %v181_v28  ;;  %v182_v28 = vld [vmem:[#allocation10 + $0x18] sm:$0xff]  ;;  %v196_v43 = vld [vmem:[#allocation10 + $0x88] sm:$0xff] }
 0x1ad   :  { %3096 = vmatmul.mubr.msk.f32.gmra.mrb[10].mxu1 %vm458_vm0, %v142_v59  ;;  %v257_v59 = vld [vmem:[#allocation11 + $0xf0] sm:$0xff]  ;;  %5650 = vst [vmem:[#allocation32_spill] sm:$0xff] %v4842_v2  ;;  %5655 = vst [vmem:[#allocation37_spill] sm:$0xff] %v4860_v58 }
 0x1ae   :  { %3098 = vmatprep.mubr.msk.f32.mxu1 %vm458_vm0, %v143_v62  ;;  %3527 = vmatpush3.bf16.msra.mxu1 %v4810_v47  ;;  %v260_v62 = vld [vmem:[#allocation11 + $0x108] sm:$0xff]  ;;  %5659 = vst [vmem:[#allocation41_spill] sm:$0xff] %v4872_v0 }
 0x1af   :  { %3529 = vmatprep.subr.bf16.mxu1 %v4816_v1  ;;  %v4844_v5 = vpack.c.bf16 %v260_v62, %v257_v59  ;;  %v274_v59 = vld [vmem:[#allocation11 + $0x178] sm:$0xff]  ;;  %v269_v62 = vld [vmem:[#allocation11 + $0x150] sm:$0xff] }
 0x1b1   :  { %3099 = vmatmul.mubr.msk.f32.gmra.mrb[12].mxu1 %vm458_vm0, %v144_v6  ;;  %5651 = vst [vmem:[#allocation33_spill] sm:$0xff] %v4844_v5  ;;  %3511 = vmatpush1.bf16.msra.mxu0 %v4844_v5  ;;  %v264_v6 = vld [vmem:[#allocation11 + $0x128] sm:$0xff]  ;;  %v193_v5 = vld [vmem:[#allocation10 + $0x70] sm:$0xff] }
 0x1b2   :  { %3101 = vmatprep.mubr.msk.f32.mxu1 %vm458_vm0, %v145_v10  ;;  %3531 = vmatpush3.bf16.msra.mxu1 %v4816_v1  ;;  %v267_v10 = vld [vmem:[#allocation11 + $0x140] sm:$0xff]  ;;  %v190_v1 = vld [vmem:[#allocation10 + $0x58] sm:$0xff] }
 0x1b3   :  { %3533 = vmatprep.subr.bf16.mxu1 %v4822_v11  ;;  %v4850_v16 = vpack.c.bf16 %v267_v10, %v264_v6  ;;  %v272_v6 = vld [vmem:[#allocation11 + $0x168] sm:$0xff]  ;;  %v4862_v10 = vpack.c.bf16 %v274_v59, %v271_v46 }
 0x1b5   :  { %3102 = vmatmul.mubr.msk.f32.gmra.mrb[14].mxu1 %vm458_vm0, %v146_v13  ;;  %v265_v13 = vld [vmem:[#allocation11 + $0x130] sm:$0xff]  ;;  %5652 = vst [vmem:[#allocation34_spill] sm:$0xff] %v4850_v16  ;;  %3513 = vmatprep.subr.bf16.mxu0 %v4850_v16  ;;  %5656 = vst [vmem:[#allocation38_spill] sm:$0xff] %v4862_v10  ;;  %v195_v16 = vld [vmem:[#allocation10 + $0x80] sm:$0xff] }
 0x1b6   :  { %3535 = vmatpush3.bf16.msra.mxu1 %v4822_v11  ;;  %v4852_v31 = vpack.c.bf16 %v268_v18, %v265_v13  ;;  %3515 = vmatpush1.bf16.msra.mxu0 %v4854_v61  ;;  %v4864_v13 = vpack.c.bf16 %v272_v6, %v269_v62  ;;  %v180_v18 = vld [vmem:[#allocation10 + $0x8] sm:$0xff]  ;;  %v187_v11 = vld [vmem:[#allocation10 + $0x40] sm:$0xff] }
 0x1b7   :  { %3537 = vmatprep.subr.bf16.mxu1 %v4832_v35  ;;  %3517 = vmatprep.subr.bf16.mxu0 %v4860_v58  ;;  %v4870_v42 = vpack.c.bf16 %v183_v23, %v180_v18  ;;  %v179_v23 = vld [vmem:[#allocation10] sm:$0xff]  ;;  %v4896_v58 = vpack.c.bf16 %v190_v1, %v187_v11  ;;  %v192_v61 = vld [vmem:[#allocation10 + $0x68] sm:$0xff] }
 0x1b8   :  { %5653 = vst [vmem:[#allocation35_spill] sm:$0xff] %v4852_v31  ;;  %5657 = vst [vmem:[#allocation39_spill] sm:$0xff] %v4864_v13  ;;  %v4892_v47 = vpack.c.bf16 %v182_v28, %v179_v23  ;;  %v5664_v28 = vmov 0.0   ;;  %v4905_v11 = vpack.c.bf16 %v195_v16, %v192_v61  ;;  %v197_v16 = vld [vmem:[#allocation10 + $0x90] sm:$0xff]  ;;  %v200_v61 = vld [vmem:[#allocation10 + $0xa8] sm:$0xff] }
 0x1b9   :  { %5658 = vst [vmem:[#allocation40_spill] sm:$0xff] %v4870_v42  ;;  %5662 = vst [vmem:[#allocation44_spill] sm:$0xff] %v4896_v58 }
 0x1ba   :  { %3539 = vmatpush3.bf16.msra.mxu1 %v4832_v35  ;;  %3519 = vmatpush1.bf16.msra.mxu0 %v4864_v13  ;;  %v189_v35 = vld [vmem:[#allocation10 + $0x50] sm:$0xff]  ;;  %5660 = vst [vmem:[#allocation42_spill] sm:$0xff] %v4892_v47  ;;  %5665 = vst [vmem:[#allocation46_spill] sm:$0xff] %v4905_v11 }
 0x1bb   :  { %3541 = vmatprep.subr.bf16.mxu1 %v4842_v2  ;;  %3553 = vmatprep.subr.bf16.mxu0 %v4870_v42 }
 0x1be   :  { %3543 = vmatpush3.bf16.msra.mxu1 %v4842_v2  ;;  %v186_v2 = vld [vmem:[#allocation10 + $0x38] sm:$0xff] }
 0x1bf   :  { %3545 = vmatprep.subr.bf16.mxu1 %v4852_v31  ;;  %v4894_v13 = vpack.c.bf16 %v189_v35, %v186_v2  ;;  %v191_v35 = vld [vmem:[#allocation10 + $0x60] sm:$0xff]  ;;  %v194_v2 = vld [vmem:[#allocation10 + $0x78] sm:$0xff] }
 0x1c1   :  { %5661 = vst [vmem:[#allocation43_spill] sm:$0xff] %v4894_v13 }
 0x1c2   :  { %3547 = vmatpush3.bf16.msra.mxu1 %v4852_v31 }
 0x1c3   :  { %3549 = vmatprep.subr.bf16.mxu1 %v4862_v10 }
 0x1c6   :  { %3551 = vmatpush3.bf16.msra.mxu1 %v4862_v10 }
 0x1c7   :  { %3585 = vmatprep.subr.bf16.mxu1 %v4872_v0 }
 0x26c   :  { %v4876_v46 = vpop.f32.mrb[0].mxu1 }
 0x26d   :  { %v4878_v59 = vpop.f32.mrb[1].mxu1 }
 0x270   :  { %v4880_v62 = vpop.f32.mrb[2].mxu1 }
 0x271   :  { %v4882_v6 = vpop.f32.mrb[3].mxu1 }
 0x274   :  { %v4884_v31 = vpop.f32.mrb[4].mxu1 }
 0x275   :  { %v4886_v10 = vpop.f32.mrb[5].mxu1 }
 0x278   :  { %v4888_v18 = vpop.f32.mrb[6].mxu1 }
 0x279   :  { %v4890_v17 = vpop.f32.mrb[7].mxu1 }
 0x27c   :  { %v3094_v37 = vpop.f32.mrb[8].mxu1 }
 0x27d   :  { %v678_v42 = vpop.f32.mrb[9].mxu1 }
 0x27e   :  { %782 = vmatmul.mubr.f32.vlgmr.msra.gmra.mrb[16].mxu0 %v678_v42  ;;  %3136 = vmatprep.mubr.f32.mxu1 %v678_v42  ;;  %v4907_v42 = vpack.c.bf16 %v196_v43, %v193_v5 }
 0x27f   :  { %3137 = vmatmul.mubr.f32.vlgmr.msra.gmra.mrb[16].mxu1 %v3094_v37  ;;  %3555 = vmatpush1.bf16.msra.mxu0 %v4892_v47  ;;  %v202_v47 = vld [vmem:[#allocation10 + $0xb8] sm:$0xff] }
 0x280   :  { %3587 = vmatpush3.bf16.msra.mxu1 %v4872_v0  ;;  %v3097_v23 = vpop.f32.mrb[10].mxu1  ;;  %787 = vmatprep.mubr.f32.mxu0 %v5664_v28  ;;  %5666 = vst [vmem:[#allocation47_spill] sm:$0xff] %v4907_v42  ;;  %v4910_v0 = vpack.c.bf16 %v194_v2, %v191_v35  ;;  %v4918_v5 = vpack.c.bf16 %v202_v47, %v199_v40  ;;  %v204_v35 = vld [vmem:[#allocation10 + $0xc8] sm:$0xff]  ;;  %v207_v2 = vld [vmem:[#allocation10 + $0xe0] sm:$0xff]  ;;  %v206_v47 = vld [vmem:[#allocation10 + $0xd8] sm:$0xff] }
 0x281   :  { %v688_v1 = vpop.f32.mrb[11].mxu1  ;;  %3557 = vmatprep.subr.bf16.mxu0 %v4894_v13  ;;  %3589 = vmatprep.subr.bf16.mxu1 %v4896_v58  ;;  %v210_v40 = vld [vmem:[#allocation10 + $0xf8] sm:$0xff] }
 0x282   :  { %788 = vmatmul.mubr.f32.gmra.mrb[18].mxu0 %v3094_v37  ;;  %3139 = vmatprep.mubr.f32.mxu1 %v688_v1  ;;  %5667 = vst [vmem:[#allocation48_spill] sm:$0xff] %v4910_v0  ;;  %v4916_v37 = vpack.c.bf16 %v201_v36, %v198_v24  ;;  %5669 = vst [vmem:[#allocation50_spill] sm:$0xff] %v4918_v5  ;;  %v203_v24 = vld [vmem:[#allocation10 + $0xc0] sm:$0xff] }
 0x283   :  { %3140 = vmatmul.mubr.f32.gmra.mrb[18].mxu1 %v3097_v23  ;;  %3559 = vmatpush1.bf16.msra.mxu0 %v4899_v41  ;;  %v4921_v41 = vpack.c.bf16 %v200_v61, %v197_v16  ;;  %v213_v16 = vld [vmem:[#allocation10 + $0x110] sm:$0xff]  ;;  %v4935_v22 = vpack.c.bf16 %v206_v47, %v203_v24  ;;  %v220_v47 = vld [vmem:[#allocation10 + $0x148] sm:$0xff] }
 0x284   :  { %3591 = vmatpush3.bf16.msra.mxu1 %v4896_v58  ;;  %v3100_v13 = vpop.f32.mrb[12].mxu1  ;;  %793 = vmatprep.mubr.f32.mxu0 %v5664_v28  ;;  %5668 = vst [vmem:[#allocation49_spill] sm:$0xff] %v4916_v37  ;;  %v205_v58 = vld [vmem:[#allocation10 + $0xd0] sm:$0xff] }
 0x285   :  { %v698_v43 = vpop.f32.mrb[13].mxu1  ;;  %3561 = vmatprep.subr.bf16.mxu0 %v4905_v11  ;;  %3593 = vmatprep.subr.bf16.mxu1 %v4907_v42  ;;  %5670 = vst [vmem:[#allocation51_spill] sm:$0xff] %v4921_v41  ;;  %v4931_v61 = vpack.c.bf16 %v208_v25, %v205_v58  ;;  %5672 = vst [vmem:[#allocation53_spill] sm:$0xff] %v4935_v22  ;;  %v216_v58 = vld [vmem:[#allocation10 + $0x128] sm:$0xff]  ;;  %v217_v24 = vld [vmem:[#allocation10 + $0x130] sm:$0xff] }
 0x286   :  { %794 = vmatmul.mubr.f32.gmra.mrb[20].mxu0 %v688_v1  ;;  %3142 = vmatprep.mubr.f32.mxu1 %v698_v43  ;;  %v4929_v1 = vpack.c.bf16 %v207_v2, %v204_v35  ;;  %v4939_v35 = vpack.c.bf16 %v213_v16, %v210_v40  ;;  %v209_v2 = vld [vmem:[#allocation10 + $0xf0] sm:$0xff] }
 0x287   :  { %3143 = vmatmul.mubr.f32.gmra.mrb[20].mxu1 %v3100_v13  ;;  %3563 = vmatpush1.bf16.msra.mxu0 %v4910_v0  ;;  %v211_v0 = vld [vmem:[#allocation10 + $0x100] sm:$0xff] }
 0x288   :  { %3595 = vmatpush3.bf16.msra.mxu1 %v4907_v42  ;;  %v4924_v11 = vpop.f32.mrb[14].mxu1  ;;  %799 = vmatprep.mubr.f32.mxu0 %v5664_v28  ;;  %5671 = vst [vmem:[#allocation52_spill] sm:$0xff] %v4929_v1  ;;  %v214_v42 = vld [vmem:[#allocation10 + $0x118] sm:$0xff]  ;;  %5673 = vst [vmem:[#allocation54_spill] sm:$0xff] %v4939_v35 }
 0x289   :  { %v708_v36 = vpop.f32.mrb[15].mxu1  ;;  %3565 = vmatprep.subr.bf16.mxu0 %v4916_v37  ;;  %3597 = vmatprep.subr.bf16.mxu1 %v4918_v5  ;;  %v212_v37 = vld [vmem:[#allocation10 + $0x108] sm:$0xff]  ;;  %v4943_v25 = vpack.c.bf16 %v214_v42, %v211_v0  ;;  %v215_v0 = vld [vmem:[#allocation10 + $0x120] sm:$0xff]  ;;  %v218_v42 = vld [vmem:[#allocation10 + $0x138] sm:$0xff] }
 0x28a   :  { %800 = vmatmul.mubr.f32.gmra.mrb[22].mxu0 %v3097_v23  ;;  %3145 = vmatprep.mubr.f32.mxu1 %v708_v36  ;;  %v219_v23 = vld [vmem:[#allocation10 + $0x140] sm:$0xff]  ;;  %v4948_v40 = vpack.c.bf16 %v212_v37, %v209_v2  ;;  %v4959_v37 = vpack.c.bf16 %v218_v42, %v215_v0  ;;  %v285_v42 = vld [vmem:[#allocation13 + $0x50] sm:$0xff] }
 0x28b   :  { %3146 = vmatmul.mubr.f32.gmra.mrb[22].mxu1 %v4924_v11  ;;  %3567 = vmatpush1.bf16.msra.mxu0 %v4921_v41  ;;  %v4952_v16 = vpack.c.bf16 %v219_v23, %v216_v58  ;;  %v225_v41 = vld [vmem:[#allocation10 + $0x170] sm:$0xff]  ;;  %v224_v23 = vld [vmem:[#allocation10 + $0x168] sm:$0xff] }
 0x28c   :  { %3599 = vmatpush3.bf16.msra.mxu1 %v4918_v5  ;;  %3180 = vmatprep.mubr.f32.mxu1 %v4878_v59  ;;  %5674 = vst [vmem:[#allocation55_spill] sm:$0xff] %v4948_v40  ;;  %v226_v5 = vld [vmem:[#allocation10 + $0x178] sm:$0xff]  ;;  %v221_v58 = vld [vmem:[#allocation10 + $0x150] sm:$0xff] }
 0x28d   :  { %805 = vmatprep.mubr.f32.mxu0 %v5664_v28  ;;  %3569 = vmatprep.subr.bf16.mxu0 %v4929_v1  ;;  %v222_v1 = vld [vmem:[#allocation10 + $0x158] sm:$0xff]  ;;  %v4970_v0 = vpack.c.bf16 %v224_v23, %v221_v58  ;;  %v283_v23 = vld [vmem:[#allocation13 + $0x40] sm:$0xff] }
 0x28e   :  { %806 = vmatmul.mubr.f32.gmra.mrb[24].mxu0 %v698_v43  ;;  %3601 = vmatprep.subr.bf16.mxu1 %v4931_v61  ;;  %v4955_v43 = vpack.c.bf16 %v220_v47, %v217_v24  ;;  %v4963_v2 = vpack.c.bf16 %v225_v41, %v222_v1  ;;  %v279_v47 = vld [vmem:[#allocation13 + $0x20] sm:$0xff] }
 0x28f   :  { %3571 = vmatpush1.bf16.msra.mxu0 %v4935_v22  ;;  %811 = vmatprep.mubr.f32.mxu0 %v5664_v28  ;;  %v223_v22 = vld [vmem:[#allocation10 + $0x160] sm:$0xff]  ;;  %5676 = vst [vmem:[#allocation57_spill] sm:$0xff] %v4970_v0 }
 0x290   :  { %3603 = vmatpush3.bf16.msra.mxu1 %v4931_v61  ;;  %3573 = vmatprep.subr.bf16.mxu0 %v4939_v35  ;;  %5675 = vst [vmem:[#allocation56_spill] sm:$0xff] %v4963_v2  ;;  %v4966_v24 = vpack.c.bf16 %v226_v5, %v223_v22  ;;  %v280_v35 = vld [vmem:[#allocation13 + $0x28] sm:$0xff]  ;;  %v275_v1 = vld [vmem:[#allocation13] sm:$0xff]  ;;  %v278_v22 = vld [vmem:[#allocation13 + $0x18] sm:$0xff] }
 0x291   :  { %3605 = vmatprep.subr.bf16.mxu1 %v4943_v25  ;;  %v4982_v58 = vpack.c.bf16 %v278_v22, %v275_v1  ;;  %v289_v22 = vld [vmem:[#allocation13 + $0x70] sm:$0xff] }
 0x292   :  { %812 = vmatmul.mubr.f32.gmra.mrb[26].mxu0 %v3100_v13  ;;  %v276_v13 = vld [vmem:[#allocation13 + $0x8] sm:$0xff] }
 0x293   :  { %3575 = vmatpush1.bf16.msra.mxu0 %v4948_v40  ;;  %817 = vmatprep.mubr.f32.mxu0 %v5664_v28  ;;  %v277_v40 = vld [vmem:[#allocation13 + $0x10] sm:$0xff]  ;;  %v4974_v41 = vpack.c.bf16 %v279_v47, %v276_v13  ;;  %5678 = vst [vmem:[#allocation59_spill] sm:$0xff] %v4982_v58  ;;  %v284_v47 = vld [vmem:[#allocation13 + $0x48] sm:$0xff] }
 0x294   :  { %3607 = vmatpush3.bf16.msra.mxu1 %v4943_v25  ;;  %3577 = vmatprep.subr.bf16.mxu0 %v4952_v16  ;;  %v4977_v5 = vpack.c.bf16 %v280_v35, %v277_v40  ;;  %v281_v13 = vld [vmem:[#allocation13 + $0x30] sm:$0xff]  ;;  %v291_v40 = vld [vmem:[#allocation13 + $0x80] sm:$0xff] }
 0x295   :  { %3609 = vmatprep.subr.bf16.mxu1 %v4955_v43  ;;  %5677 = vst [vmem:[#allocation58_spill] sm:$0xff] %v4974_v41  ;;  %v4994_v1 = vpack.c.bf16 %v284_v47, %v281_v13 }
 0x296   :  { %818 = vmatmul.mubr.f32.gmra.mrb[28].mxu0 %v708_v36  ;;  %v282_v36 = vld [vmem:[#allocation13 + $0x38] sm:$0xff] }
 0x297   :  { %3579 = vmatpush1.bf16.msra.mxu0 %v4959_v37  ;;  %823 = vmatprep.mubr.f32.mxu0 %v5664_v28  ;;  %v4986_v35 = vpack.c.bf16 %v285_v42, %v282_v36  ;;  %5681 = vst [vmem:[#allocation62_spill] sm:$0xff] %v4994_v1  ;;  %v287_v36 = vld [vmem:[#allocation13 + $0x60] sm:$0xff]  ;;  %v290_v42 = vld [vmem:[#allocation13 + $0x78] sm:$0xff] }
 0x298   :  { %3611 = vmatpush3.bf16.msra.mxu1 %v4955_v43  ;;  %3581 = vmatprep.subr.bf16.mxu0 %v4963_v2  ;;  %v286_v2 = vld [vmem:[#allocation13 + $0x58] sm:$0xff]  ;;  %v5008_v47 = vpack.c.bf16 %v290_v42, %v287_v36 }
 0x299   :  { %3613 = vmatprep.subr.bf16.mxu1 %v4966_v24  ;;  %5679 = vst [vmem:[#allocation60_spill] sm:$0xff] %v4986_v35 }
 0x29a   :  { %824 = vmatmul.mubr.f32.gmra.mrb[30].mxu0 %v4924_v11  ;;  %v288_v11 = vld [vmem:[#allocation13 + $0x68] sm:$0xff]  ;;  %5684 = vst [vmem:[#allocation65_spill] sm:$0xff] %v5008_v47 }
 0x29b   :  { %3583 = vmatpush1.bf16.msra.mxu0 %v4970_v0  ;;  %999 = vmatprep.mubr.f32.mxu0 %v5664_v28  ;;  %v4990_v0 = vpack.c.bf16 %v286_v2, %v283_v23  ;;  %v294_v2 = vld [vmem:[#allocation13 + $0x98] sm:$0xff]  ;;  %v297_v23 = vld [vmem:[#allocation13 + $0xb0] sm:$0xff] }
 0x29c   :  { %3615 = vmatpush3.bf16.msra.mxu1 %v4966_v24  ;;  %3617 = vmatprep.subr.bf16.mxu0 %v4974_v41  ;;  %v292_v41 = vld [vmem:[#allocation13 + $0x88] sm:$0xff] }
 0x29d   :  { %3649 = vmatprep.subr.bf16.mxu1 %v4977_v5  ;;  %5680 = vst [vmem:[#allocation61_spill] sm:$0xff] %v4990_v0  ;;  %v5004_v13 = vpack.c.bf16 %v292_v41, %v289_v22  ;;  %v300_v41 = vld [vmem:[#allocation13 + $0xc8] sm:$0xff]  ;;  %v303_v22 = vld [vmem:[#allocation13 + $0xe0] sm:$0xff] }
 0x29e   :  { %1000 = vmatmul.mubr.f32.vlgmr.msra.gmra.mrb[16].mxu0 %v4878_v59  ;;  %v4999_v59 = vpack.c.bf16 %v291_v40, %v288_v11  ;;  %v293_v11 = vld [vmem:[#allocation13 + $0x90] sm:$0xff]  ;;  %v5013_v40 = vpack.c.bf16 %v297_v23, %v294_v2  ;;  %v5026_v2 = vpack.c.bf16 %v303_v22, %v300_v41  ;;  %v299_v23 = vld [vmem:[#allocation13 + $0xc0] sm:$0xff]  ;;  %v310_v22 = vld [vmem:[#allocation13 + $0x118] sm:$0xff] }
 0x29f   :  { %3181 = vmatmul.mubr.f32.vlgmr.msra.gmra.mrb[16].mxu1 %v4876_v46  ;;  %3619 = vmatpush1.bf16.msra.mxu0 %v4982_v58  ;;  %5683 = vst [vmem:[#allocation64_spill] sm:$0xff] %v5004_v13  ;;  %v295_v58 = vld [vmem:[#allocation13 + $0xa0] sm:$0xff] }
 0x2a0   :  { %3183 = vmatprep.mubr.f32.mxu1 %v4882_v6  ;;  %1005 = vmatprep.mubr.f32.mxu0 %v5664_v28  ;;  %5682 = vst [vmem:[#allocation63_spill] sm:$0xff] %v4999_v59  ;;  %5685 = vst [vmem:[#allocation66_spill] sm:$0xff] %v5013_v40  ;;  %v307_v41 = vld [vmem:[#allocation13 + $0x100] sm:$0xff] }
 0x2a1   :  { %3621 = vmatprep.subr.bf16.mxu0 %v4986_v35  ;;  %3651 = vmatpush3.bf16.msra.mxu1 %v4977_v5  ;;  %v298_v35 = vld [vmem:[#allocation13 + $0xb8] sm:$0xff]  ;;  %5687 = vst [vmem:[#allocation68_spill] sm:$0xff] %v5026_v2 }
 0x2a2   :  { %1006 = vmatmul.mubr.f32.gmra.mrb[18].mxu0 %v4876_v46  ;;  %3653 = vmatprep.subr.bf16.mxu1 %v4990_v0  ;;  %v296_v46 = vld [vmem:[#allocation13 + $0xa8] sm:$0xff]  ;;  %v5018_v36 = vpack.c.bf16 %v298_v35, %v295_v58  ;;  %v306_v58 = vld [vmem:[#allocation13 + $0xf8] sm:$0xff]  ;;  %v309_v35 = vld [vmem:[#allocation13 + $0x110] sm:$0xff] }
 0x2a3   :  { %3184 = vmatmul.mubr.f32.gmra.mrb[18].mxu1 %v4880_v62  ;;  %3623 = vmatpush1.bf16.msra.mxu0 %v4994_v1  ;;  %v5022_v42 = vpack.c.bf16 %v296_v46, %v293_v11  ;;  %v301_v1 = vld [vmem:[#allocation13 + $0xd0] sm:$0xff] }
 0x2a4   :  { %3186 = vmatprep.mubr.f32.mxu1 %v4886_v10  ;;  %1011 = vmatprep.mubr.f32.mxu0 %v5664_v28 }
 0x2a5   :  { %3625 = vmatprep.subr.bf16.mxu0 %v4999_v59  ;;  %3655 = vmatpush3.bf16.msra.mxu1 %v4990_v0  ;;  %5686 = vst [vmem:[#allocation67_spill] sm:$0xff] %v5022_v42  ;;  %v304_v59 = vld [vmem:[#allocation13 + $0xe8] sm:$0xff]  ;;  %v315_v0 = vld [vmem:[#allocation13 + $0x140] sm:$0xff] }
 0x2a6   :  { %1012 = vmatmul.mubr.f32.gmra.mrb[20].mxu0 %v4882_v6  ;;  %3657 = vmatprep.subr.bf16.mxu1 %v5004_v13  ;;  %v302_v6 = vld [vmem:[#allocation13 + $0xd8] sm:$0xff]  ;;  %v5032_v11 = vpack.c.bf16 %v304_v59, %v301_v1  ;;  %v5046_v1 = vpack.c.bf16 %v310_v22, %v307_v41 }
 0x2a7   :  { %3187 = vmatmul.mubr.f32.gmra.mrb[20].mxu1 %v4884_v31  ;;  %3627 = vmatpush1.bf16.msra.mxu0 %v5008_v47  ;;  %v5036_v46 = vpack.c.bf16 %v302_v6, %v299_v23  ;;  %v305_v47 = vld [vmem:[#allocation13 + $0xf0] sm:$0xff]  ;;  %v316_v6 = vld [vmem:[#allocation13 + $0x148] sm:$0xff] }
 0x2a8   :  { %3189 = vmatprep.mubr.f32.mxu1 %v4890_v17  ;;  %1017 = vmatprep.mubr.f32.mxu0 %v5664_v28  ;;  %v313_v23 = vld [vmem:[#allocation13 + $0x130] sm:$0xff] }
 0x2a9   :  { %3629 = vmatprep.subr.bf16.mxu0 %v5013_v40  ;;  %3659 = vmatpush3.bf16.msra.mxu1 %v5004_v13  ;;  %v5040_v40 = vpack.c.bf16 %v309_v35, %v306_v58  ;;  %v312_v13 = vld [vmem:[#allocation13 + $0x128] sm:$0xff]  ;;  %v311_v35 = vld [vmem:[#allocation13 + $0x120] sm:$0xff]  ;;  %v5058_v41 = vpack.c.bf16 %v316_v6, %v313_v23 }
 0x2aa   :  { %1018 = vmatmul.mubr.f32.gmra.mrb[22].mxu0 %v4880_v62  ;;  %3661 = vmatprep.subr.bf16.mxu1 %v5018_v36  ;;  %v308_v62 = vld [vmem:[#allocation13 + $0x108] sm:$0xff]  ;;  %v5053_v58 = vpack.c.bf16 %v315_v0, %v312_v13  ;;  %v319_v0 = vld [vmem:[#allocation13 + $0x160] sm:$0xff]  ;;  %v322_v13 = vld [vmem:[#allocation13 + $0x178] sm:$0xff] }
 0x2ab   :  { %3190 = vmatmul.mubr.f32.gmra.mrb[22].mxu1 %v4888_v18  ;;  %3631 = vmatpush1.bf16.msra.mxu0 %v5022_v42  ;;  %5688 = vst [vmem:[#allocation69_spill] sm:$0xff] %v5040_v40  ;;  %v5050_v59 = vpack.c.bf16 %v308_v62, %v305_v47  ;;  %v318_v42 = vld [vmem:[#allocation13 + $0x158] sm:$0xff]  ;;  %v317_v62 = vld [vmem:[#allocation13 + $0x150] sm:$0xff] }
 0x2ac   :  { %1023 = vmatprep.mubr.f32.mxu0 %v5664_v28  ;;  %3633 = vmatprep.subr.bf16.mxu0 %v5026_v2  ;;  %v314_v2 = vld [vmem:[#allocation13 + $0x138] sm:$0xff] }
 0x2ad   :  { %3663 = vmatpush3.bf16.msra.mxu1 %v5018_v36  ;;  %3224 = vmatprep.mubr.f32.mxu1 %v4706_v49  ;;  %v5062_v47 = vpack.c.bf16 %v314_v2, %v311_v35 }
 0x2ae   :  { %1024 = vmatmul.mubr.f32.gmra.mrb[24].mxu0 %v4886_v10  ;;  %3665 = vmatprep.subr.bf16.mxu1 %v5032_v11  ;;  %v321_v10 = vld [vmem:[#allocation13 + $0x170] sm:$0xff] }
 0x2af   :  { %3635 = vmatpush1.bf16.msra.mxu0 %v5036_v46  ;;  %1029 = vmatprep.mubr.f32.mxu0 %v5664_v28  ;;  %v5065_v22 = vpack.c.bf16 %v321_v10, %v318_v42 }
 0x2b0   :  { %3637 = vmatprep.subr.bf16.mxu0 %v5040_v40  ;;  %v320_v40 = vld [vmem:[#allocation13 + $0x168] sm:$0xff] }
 0x2b1   :  { %3667 = vmatpush3.bf16.msra.mxu1 %v5032_v11  ;;  %v5074_v2 = vpack.c.bf16 %v320_v40, %v317_v62 }
 0x2b2   :  { %1030 = vmatmul.mubr.f32.gmra.mrb[26].mxu0 %v4884_v31  ;;  %3669 = vmatprep.subr.bf16.mxu1 %v5046_v1  ;;  %v5070_v31 = vpack.c.bf16 %v322_v13, %v319_v0 }
 0x2b3   :  { %3639 = vmatpush1.bf16.msra.mxu0 %v5050_v59  ;;  %1035 = vmatprep.mubr.f32.mxu0 %v5664_v28  ;;  %5690 = vst [vmem:[#allocation71_spill] sm:$0xff] %v5074_v2 }
 0x2b4   :  { %3641 = vmatprep.subr.bf16.mxu0 %v5053_v58  ;;  %5689 = vst [vmem:[#allocation70_spill] sm:$0xff] %v5070_v31 }
 0x2b5   :  { %3671 = vmatpush3.bf16.msra.mxu1 %v5046_v1 }
 0x2b6   :  { %1036 = vmatmul.mubr.f32.gmra.mrb[28].mxu0 %v4890_v17  ;;  %3673 = vmatprep.subr.bf16.mxu1 %v5058_v41 }
 0x2b7   :  { %3643 = vmatpush1.bf16.msra.mxu0 %v5062_v47  ;;  %1041 = vmatprep.mubr.f32.mxu0 %v5664_v28 }
 0x2b8   :  { %3645 = vmatprep.subr.bf16.mxu0 %v5065_v22 }
 0x2b9   :  { %3675 = vmatpush3.bf16.msra.mxu1 %v5058_v41 }
 0x2ba   :  { %1042 = vmatmul.mubr.f32.gmra.mrb[30].mxu0 %v4888_v18  ;;  %3677 = vmatprep.subr.bf16.mxu1 %v5070_v31 }
 0x2bb   :  { %3647 = vmatpush1.bf16.msra.mxu0 %v5074_v2  ;;  %1273 = vmatprep.mubr.f32.mxu0 %v5664_v28 }
 0x2bc   :  { %3681 = vmatprep.subr.bf16.mxu0 %v4658_v4  ;;  %v5117_v4 = vld [vmem:[#allocation7 + $0x30] sm:$0xff] }
 0x2bd   :  { %3679 = vmatpush3.bf16.msra.mxu1 %v5070_v31 }
 0x2be   :  { %1274 = vmatmul.mubr.f32.vlgmr.msra.gmra.mrb[16].mxu0 %v4706_v49 }
 0x2bf   :  { %1279 = vmatprep.mubr.f32.mxu0 %v5664_v28  ;;  %3683 = vmatpush1.bf16.msra.mxu0 %v4660_v8  ;;  %v5123_v8 = vld [vmem:[#allocation7 + $0x38] sm:$0xff] }
 0x2c0   :  { %3225 = vmatmul.mubr.f32.vlgmr.msra.gmra.mrb[24].mxu1 %v4710_v50  ;;  %3685 = vmatprep.subr.bf16.mxu0 %v4662_v9 }
 0x2c1   :  { %3227 = vmatprep.mubr.f32.mxu1 %v4714_v51 }
 0x2c2   :  { %1280 = vmatmul.mubr.f32.gmra.mrb[18].mxu0 %v4710_v50 }
 0x2c3   :  { %1285 = vmatprep.mubr.f32.mxu0 %v5664_v28  ;;  %3687 = vmatpush1.bf16.msra.mxu0 %v4666_v14 }
 0x2c4   :  { %3228 = vmatmul.mubr.f32.gmra.mrb[26].mxu1 %v4718_v52  ;;  %3689 = vmatprep.subr.bf16.mxu0 %v4669_v15 }
 0x2c5   :  { %3230 = vmatprep.mubr.f32.mxu1 %v4722_v53 }
 0x2c6   :  { %1286 = vmatmul.mubr.f32.gmra.mrb[20].mxu0 %v4714_v51 }
 0x2c7   :  { %1291 = vmatprep.mubr.f32.mxu0 %v5664_v28  ;;  %3691 = vmatpush1.bf16.msra.mxu0 %v4672_v20 }
 0x2c8   :  { %3231 = vmatmul.mubr.f32.gmra.mrb[28].mxu1 %v4726_v54  ;;  %3693 = vmatprep.subr.bf16.mxu0 %v4675_v21 }
 0x2c9   :  { %3233 = vmatprep.mubr.f32.mxu1 %v4730_v55 }
 0x2ca   :  { %1292 = vmatmul.mubr.f32.gmra.mrb[22].mxu0 %v4718_v52 }
 0x2cb   :  { %1297 = vmatprep.mubr.f32.mxu0 %v5664_v28  ;;  %3695 = vmatpush1.bf16.msra.mxu0 %v4678_v26 }
 0x2cc   :  { %3234 = vmatmul.mubr.f32.gmra.mrb[30].mxu1 %v4734_v56  ;;  %3697 = vmatprep.subr.bf16.mxu0 %v4681_v27 }
 0x2cd   :  { %3252 = vmatprep.mubr.msk.f32.mxu1 %vm458_vm0, %v4738_v57 }
 0x2ce   :  { %1298 = vmatmul.mubr.f32.gmra.mrb[24].mxu0 %v4722_v53 }
 0x2cf   :  { %1303 = vmatprep.mubr.f32.mxu0 %v5664_v28  ;;  %3699 = vmatpush1.bf16.msra.mxu0 %v4684_v32 }
 0x2d0   :  { %3701 = vmatprep.subr.bf16.mxu0 %v4687_v33  ;;  %v325_v33 = vld [vmem:[%s5565_s9] sm:$0x7] }
 0x2d1   :  { %v1201_v49 = vrot.slane %v325_v33, %v4775_v34 }
 0x2d2   :  { %1304 = vmatmul.mubr.f32.gmra.mrb[26].mxu0 %v4726_v54 }
 0x2d3   :  { %1309 = vmatprep.mubr.f32.mxu0 %v5664_v28  ;;  %3703 = vmatpush1.bf16.msra.mxu0 %v4690_v38  ;;  %v324_v38 = vld [vmem:[%s5564_s8] sm:$0x7]  ;;  %s4478_s8 = smov [#allocation14]  }
 0x2d4   :  { %3705 = vmatprep.subr.bf16.mxu0 %v4693_v39  ;;  %v1157_v39 = vrot.slane %v324_v38, %v4769_v30  ;;  %s2761_s9 = sshll.u32 %s4478_s8, 4  ;;  %s2762_s9 = int_to_ptr.vmem [resolvable:$true] %s2761_s9 }
 0x2d5   :  { %s4432_s27 = scalar_lea.vmem %s2762_s9, 1024  ;;  %p4437_p1 = scmp.lt.s32.totalorder %s2762_s9, %s2762_s9 }
 0x2d6   :  { %1310 = vmatmul.mubr.f32.gmra.mrb[28].mxu0 %v5117_v4  ;;  %p4433_p0 = scmp.ne.s32.totalorder %s2762_s9, %s4432_s27  ;;  %p4438_p2 = scmp.lt.s32.totalorder %s4432_s27, %s4432_s27 }
 0x2d7   :  { %1315 = vmatprep.mubr.f32.mxu0 %v5664_v28  ;;  %3707 = vmatpush1.bf16.msra.mxu0 %v4696_v44  ;;  %v1197_v44 = vrot.slane %v325_v33, %v4769_v30 }
 0x2d8   :  { %3709 = vmatprep.subr.bf16.mxu0 %v4699_v45  ;;  %p4439_p3 = por %p4438_p2, %p4437_p1 }
 0x2d9   :  { %v5153_v45 = vadd.f32 %v1197_v44, %v1157_v39 }
 0x2da   :  { %1316 = vmatmul.mubr.f32.gmra.mrb[30].mxu0 %v5123_v8  ;;  %p4440_p4 = pnand %p4439_p3, %p4433_p0 }
 0x2db   :  { %3711 = vmatpush1.bf16.msra.mxu0 %v4702_v48  ;;  %1651 = vmatprep.mubr.f32.mxu0 %v5664_v28  ;;  %v1161_v48 = vrot.slane %v324_v38, %v4775_v34 }
 0x2dc   :  { %3745 = vmatprep.subr.bf16.mxu0 %v4742_v60 }
 0x2dd   :  { %v5160_v55 = vadd.f32 %v1201_v49, %v1161_v48 }
 0x372   :  { %v5129_v9 = vpop.f32.mrb[16].mxu1 }
 0x373   :  { %v5131_v14 = vpop.f32.mrb[17].mxu1 }
 0x376   :  { %v5133_v15 = vpop.f32.mrb[18].mxu1 }
 0x377   :  { %v5135_v20 = vpop.f32.mrb[19].mxu1 }
 0x37a   :  { %v5137_v21 = vpop.f32.mrb[20].mxu1 }
 0x37b   :  { %v5139_v26 = vpop.f32.mrb[21].mxu1 }
 0x37e   :  { %v5141_v27 = vpop.f32.mrb[22].mxu1 }
 0x37f   :  { %v5143_v32 = vpop.f32.mrb[23].mxu1 }
 0x391   :  { %v1275_v50 = vpop.f32.mrb[16].mxu0 }
 0x392   :  { %v3937_v51 = vadd.f32 %v5153_v45, %v1275_v50  ;;  %v1277_v52 = vpop.f32.mrb[17].mxu0 }
 0x393   :  { %v5158_v53 = vpop.f32.mrb[24].mxu1  ;;  %v3939_v17 = vadd.f32 %v5160_v55, %v1277_v52 }
 0x394   :  { %v2792_v54 = vmul.f32 -1.442695, %v3937_v51  ;;  %v1388_v56 = vpop.f32.mrb[25].mxu1 }
 0x395   :  { %v1281_v57 = vpop.f32.mrb[18].mxu0  ;;  %v2800_v10 = vmul.f32 -1.442695, %v3939_v17 }
 0x396   :  { %4095 = vpow2.f32 %v2792_v54  ;;  %v3941_v60 = vadd.f32 %v5153_v45, %v1281_v57  ;;  %v1283_v30 = vpop.f32.mrb[19].mxu0 }
 0x397   :  { %v5163_v18 = vpop.f32.mrb[26].mxu1  ;;  %v3943_v50 = vadd.f32 %v5160_v55, %v1283_v30 }
 0x398   :  { %v2793_v34 = vmul.f32 -1.442695, %v3941_v60  ;;  %v5166_v40 = vpop.f32.mrb[27].mxu1 }
 0x399   :  { %v1287_v42 = vpop.f32.mrb[20].mxu0 }
 0x39a   :  { %4097 = vpow2.f32 %v2793_v34  ;;  %v3945_v23 = vadd.f32 %v5153_v45, %v1287_v42  ;;  %v1289_v6 = vpop.f32.mrb[21].mxu0  ;;  %v1164_v42 = vsub.s32 2, %v4766_v29 }
 0x39b   :  { %v5169_v35 = vpop.f32.mrb[28].mxu1 }
 0x39c   :  { %v2794_v0 = vmul.f32 -1.442695, %v3945_v23  ;;  %v5171_v13 = vpop.f32.mrb[29].mxu1  ;;  %v2801_v23 = vmul.f32 -1.442695, %v3943_v50 }
 0x39d   :  { %v1293_v62 = vpop.f32.mrb[22].mxu0 }
 0x39e   :  { %4099 = vpow2.f32 %v2794_v0  ;;  %v3949_v39 = vadd.f32 %v5153_v45, %v1293_v62  ;;  %v1295_v44 = vpop.f32.mrb[23].mxu0  ;;  %v3947_v0 = vadd.f32 %v5160_v55, %v1289_v6 }
 0x39f   :  { %v5174_v48 = vpop.f32.mrb[30].mxu1  ;;  %4101 = vpow2.f32 %v2800_v10  ;;  %v3951_v30 = vadd.f32 %v5160_v55, %v1295_v44 }
 0x3a0   :  { %v4096_v49 = vpop.eup %4095  ;;  %v2795_v51 = vmul.f32 -1.442695, %v3949_v39  ;;  %v5177_v52 = vpop.f32.mrb[31].mxu1  ;;  %v2802_v29 = vmul.f32 -1.442695, %v3947_v0 }
 0x3a1   :  { %v1459_v54 = vadd.f32 1.0, %v4096_v49  ;;  %v1299_v57 = vpop.f32.mrb[24].mxu0  ;;  %v2803_v6 = vmul.f32 -1.442695, %v3951_v30 }
 0x3a2   :  { %4103 = vpow2.f32 %v2795_v51  ;;  %v3953_v60 = vadd.f32 %v5153_v45, %v1299_v57  ;;  %v1301_v17 = vpop.f32.mrb[25].mxu0  ;;  %v5184_v51 = vrot.slane %v325_v33, %v1164_v42 }
 0x3a3   :  { %4105 = vrcp.f32 %v1459_v54  ;;  %v5186_v54 = vrot.slane %v324_v38, %v1164_v42 }
 0x3a4   :  { %v4098_v34 = vpop.eup %4097  ;;  %v2796_v62 = vmul.f32 -1.442695, %v3953_v60  ;;  %v3955_v60 = vadd.f32 %v5160_v55, %v1301_v17  ;;  %v1389_v33 = vadd.f32 %v1388_v56, %v5184_v51 }
 0x3a5   :  { %v1460_v10 = vadd.f32 1.0, %v4098_v34  ;;  %v1305_v39 = vpop.f32.mrb[26].mxu0  ;;  %v1171_v38 = vadd.f32 %v5186_v54, %v5131_v14  ;;  %v1174_v14 = vadd.f32 %v5129_v9, %v5186_v54 }
 0x3a6   :  { %4107 = vpow2.f32 %v2796_v62  ;;  %v3957_v49 = vadd.f32 %v5153_v45, %v1305_v39  ;;  %v1307_v2 = vpop.f32.mrb[27].mxu0  ;;  %v2804_v17 = vmul.f32 -1.442695, %v3955_v60 }
 0x3a7   :  { %4109 = vrcp.f32 %v1460_v10 }
 0x3a8   :  { %v4100_v57 = vpop.eup %4099  ;;  %4111 = vpow2.f32 %v2801_v23  ;;  %v2797_v50 = vmul.f32 -1.442695, %v3957_v49 }
 0x3a9   :  { %v1461_v31 = vadd.f32 1.0, %v4100_v57  ;;  %v1311_v34 = vpop.f32.mrb[28].mxu0  ;;  %v4102_v44 = vpop.eup %4101  ;;  %v3959_v57 = vadd.f32 %v5160_v55, %v1307_v2  ;;  %v1399_v2 = vadd.f32 %v5166_v40, %v5184_v51 }
 0x3aa   :  { %4113 = vpow2.f32 %v2797_v50  ;;  %v3961_v62 = vadd.f32 %v5153_v45, %v1311_v34  ;;  %v1313_v39 = vpop.f32.mrb[29].mxu0  ;;  %v1515_v0 = vadd.f32 1.0, %v4102_v44 }
 0x3ab   :  { %4115 = vrcp.f32 %v1461_v31 }
 0x3ac   :  { %v4104_v10 = vpop.eup %4103  ;;  %4117 = vpow2.f32 %v2802_v29  ;;  %v2798_v42 = vmul.f32 -1.442695, %v3961_v62  ;;  %v1394_v29 = vadd.f32 %v5158_v53, %v5184_v51 }
 0x3ad   :  { %v4106_v23 = vpop.eup %4105  ;;  %v1462_v30 = vadd.f32 1.0, %v4104_v10  ;;  %4119 = vpow2.f32 %v2803_v6  ;;  %v1317_v49 = vpop.f32.mrb[30].mxu0  ;;  %v2805_v10 = vmul.f32 -1.442695, %v3959_v57 }
 0x3ae   :  { %4121 = vpow2.f32 %v2798_v42  ;;  %v1539_v50 = vmul.f32 %v4106_v23, %v1389_v33  ;;  %v3965_v34 = vadd.f32 %v5153_v45, %v1317_v49  ;;  %v1319_v56 = vpop.f32.mrb[31].mxu0  ;;  %v3963_v23 = vadd.f32 %v5160_v55, %v1313_v39 }
 0x3af   :  { %4123 = vrcp.f32 %v1462_v30  ;;  %v1404_v39 = vadd.f32 %v5163_v18, %v5184_v51 }
 0x3b0   :  { %v4108_v31 = vpop.eup %4107  ;;  %v1547_v44 = vadd.f32 %v1539_v50, %v1171_v38  ;;  %4125 = vrcp.f32 %v1515_v0  ;;  %v2799_v60 = vmul.f32 -1.442695, %v3965_v34  ;;  %v1177_v50 = vadd.f32 %v5186_v54, %v5135_v20 }
 0x3b1   :  { %v4110_v62 = vpop.eup %4109  ;;  %v1463_v6 = vadd.f32 1.0, %v4108_v31  ;;  %4127 = vpow2.f32 %v2804_v17  ;;  %v2806_v40 = vmul.f32 -1.442695, %v3963_v23  ;;  %v1180_v20 = vadd.f32 %v5133_v15, %v5186_v54 }
 0x3b2   :  { %v4112_v33 = vpop.eup %4111  ;;  %v1540_v42 = vmul.f32 %v4110_v62, %v1394_v29  ;;  %v3967_v62 = vadd.f32 %v5160_v55, %v1319_v56  ;;  %v1183_v56 = vadd.f32 %v5186_v54, %v5139_v26  ;;  %v1186_v26 = vadd.f32 %v5137_v21, %v5186_v54 }
 0x3b3   :  { %4129 = vrcp.f32 %v1463_v6  ;;  %v1516_v53 = vadd.f32 1.0, %v4112_v33 }
 0x3b4   :  { %v4114_v30 = vpop.eup %4113  ;;  %v1548_v9 = vadd.f32 %v1540_v42, %v1174_v14  ;;  %4131 = vtanh.f32 %v1547_v44  ;;  %v2807_v23 = vmul.f32 -1.442695, %v3967_v62 }
 0x3b5   :  { %v4116_v49 = vpop.eup %4115  ;;  %v1464_v38 = vadd.f32 1.0, %v4114_v30  ;;  %4133 = vpow2.f32 %v2799_v60  ;;  %v1409_v60 = vadd.f32 %v5171_v13, %v5184_v51 }
 0x3b6   :  { %v4118_v0 = vpop.eup %4117  ;;  %4135 = vpow2.f32 %v2805_v10  ;;  %v1541_v34 = vmul.f32 %v4116_v49, %v1399_v2  ;;  %v4257_v49 = vld [vmem:[#allocation7] sm:$0xff] }
 0x3b7   :  { %v4120_v17 = vpop.eup %4119  ;;  %4137 = vrcp.f32 %v1464_v38  ;;  %v1517_v29 = vadd.f32 1.0, %v4118_v0  ;;  %v1414_v0 = vadd.f32 %v5169_v35, %v5184_v51 }
 0x3b8   :  { %v4122_v57 = vpop.eup %4121  ;;  %4139 = vtanh.f32 %v1548_v9  ;;  %v1549_v31 = vadd.f32 %v1541_v34, %v1177_v50  ;;  %v1518_v10 = vadd.f32 1.0, %v4120_v17 }
 0x3b9   :  { %v4124_v14 = vpop.eup %4123  ;;  %4141 = vrcp.f32 %v1516_v53  ;;  %v1465_v44 = vadd.f32 1.0, %v4122_v57 }
 0x3ba   :  { %4143 = vpow2.f32 %v2806_v40  ;;  %v1542_v6 = vmul.f32 %v4124_v14, %v1404_v39  ;;  %v4126_v2 = vpop.eup %4125 }
 0x3bb   :  { %4145 = vrcp.f32 %v1465_v44  ;;  %v4128_v33 = vpop.eup %4127  ;;  %v4258_v44 = vld [vmem:[#allocation7 + $0x8] sm:$0xff] }
 0x3bc   :  { %v1550_v18 = vadd.f32 %v1542_v6, %v1180_v20  ;;  %4147 = vtanh.f32 %v1549_v31  ;;  %v1519_v34 = vadd.f32 1.0, %v4128_v33  ;;  %v1419_v31 = vadd.f32 %v5177_v52, %v5184_v51 }
 0x3bd   :  { %v4130_v42 = vpop.eup %4129  ;;  %4149 = vrcp.f32 %v1517_v29  ;;  %v1189_v33 = vadd.f32 %v5186_v54, %v5143_v32 }
 0x3be   :  { %v4132_v30 = vpop.eup %4131  ;;  %4151 = vtanh.f32 %v1550_v18  ;;  %v1543_v15 = vmul.f32 %v4130_v42, %v1409_v60  ;;  %v4259_v42 = vld [vmem:[#allocation7 + $0x10] sm:$0xff] }
 0x3bf   :  { %v4134_v9 = vpop.eup %4133  ;;  %v1563_v53 = vsub.f32 %v4257_v49, %v4132_v30  ;;  %4153 = vrcp.f32 %v1518_v10 }
 0x3c0   :  { %v4136_v38 = vpop.eup %4135  ;;  %v1466_v13 = vadd.f32 1.0, %v4134_v9  ;;  %v1551_v50 = vadd.f32 %v1543_v15, %v1183_v56  ;;  %4155 = vpow2.f32 %v2807_v23  ;;  %v4260_v9 = vld [vmem:[#allocation7 + $0x18] sm:$0xff] }
 0x3c1   :  { %v4138_v40 = vpop.eup %4137  ;;  %v1571_v17 = vmul.f32 %v4126_v2, %v1563_v53  ;;  %v1520_v60 = vadd.f32 1.0, %v4136_v38  ;;  %v1424_v38 = vadd.f32 %v5174_v48, %v5184_v51 }
 0x3c2   :  { %v4140_v57 = vpop.eup %4139  ;;  %4157 = vrcp.f32 %v1466_v13  ;;  %v1544_v39 = vmul.f32 %v4138_v40, %v1414_v0  ;;  %v1192_v40 = vadd.f32 %v5141_v27, %v5186_v54 }
 0x3c3   :  { %v4142_v14 = vpop.eup %4141  ;;  %4159 = vtanh.f32 %v1551_v50  ;;  %v5219_v29 = vadd.f32 %v4132_v30, %v1571_v17  ;;  %v1564_v35 = vsub.f32 %v4258_v44, %v4140_v57  ;;  %v4262_v44 = vld [vmem:[#allocation7 + $0x28] sm:$0xff] }
 0x3c4   :  { %v4144_v62 = vpop.eup %4143  ;;  %v1552_v20 = vadd.f32 %v1544_v39, %v1186_v26  ;;  %4161 = vrcp.f32 %v1519_v34  ;;  %v5691_v39 = vld [vmem:[#allocation20_spill] sm:$0xff] }
 0x3c5   :  { %v4146_v6 = vpop.eup %4145  ;;  %1652 = vmatmul.mubr.f32.vlgmr.msra.gmra.mrb[32].mxu0 %v5219_v29  ;;  %v1572_v2 = vmul.f32 %v4142_v14, %v1564_v35  ;;  %v1521_v56 = vadd.f32 1.0, %v4144_v62  ;;  %v5692_v62 = vld [vmem:[#allocation21_spill] sm:$0xff] }
 0x3c6   :  { %v4148_v21 = vpop.eup %4147  ;;  %v1545_v10 = vmul.f32 %v4146_v6, %v1419_v31  ;;  %1657 = vmatprep.mubr.f32.mxu0 %v5664_v28  ;;  %3747 = vmatpush1.bf16.msra.mxu0 %v4744_v63  ;;  %4163 = vtanh.f32 %v1552_v20 }
 0x3c7   :  { %v4150_v52 = vpop.eup %4149  ;;  %v5226_v18 = vadd.f32 %v4140_v57, %v1572_v2  ;;  %v1565_v23 = vsub.f32 %v4259_v42, %v4148_v21  ;;  %3749 = vmatprep.subr.bf16.mxu0 %v4747_v3  ;;  %4165 = vrcp.f32 %v1520_v60  ;;  %v5695_v42 = vld [vmem:[#allocation31_spill] sm:$0xff] }
 0x3c8   :  { %v4152_v30 = vpop.eup %4151  ;;  %v1553_v15 = vadd.f32 %v1545_v10, %v1189_v33  ;;  %v5694_v10 = vld [vmem:[#allocation30_spill] sm:$0xff] }
 0x3c9   :  { %1658 = vmatmul.mubr.f32.gmra.mrb[34].mxu0 %v5226_v18  ;;  %v1573_v32 = vmul.f32 %v4150_v52, %v1565_v23  ;;  %v1566_v49 = vsub.f32 %v4260_v9, %v4152_v30  ;;  %v4154_v53 = vpop.eup %4153 }
 0x3ca   :  { %4167 = vtanh.f32 %v1553_v15  ;;  %1663 = vmatprep.mubr.f32.mxu0 %v5664_v28  ;;  %3751 = vmatpush1.bf16.msra.mxu0 %v4750_v7  ;;  %v4156_v63 = vpop.eup %4155  ;;  %v4261_v7 = vld [vmem:[#allocation7 + $0x20] sm:$0xff] }
 0x3cb   :  { %v5234_v3 = vadd.f32 %v4148_v21, %v1573_v32  ;;  %v1574_v13 = vmul.f32 %v4154_v53, %v1566_v49  ;;  %3753 = vmatprep.subr.bf16.mxu0 %v4753_v12  ;;  %4169 = vrcp.f32 %v1521_v56  ;;  %v1522_v26 = vadd.f32 1.0, %v4156_v63  ;;  %v5698_v49 = vld [vmem:[#allocation36_spill] sm:$0xff]  ;;  %v5699_v53 = vld [vmem:[#allocation37_spill] sm:$0xff] }
 0x3cc   :  { %v4158_v0 = vpop.eup %4157 }
 0x3cd   :  { %v4160_v50 = vpop.eup %4159  ;;  %v1546_v34 = vmul.f32 %v4158_v0, %v1424_v38  ;;  %1664 = vmatmul.mubr.f32.gmra.mrb[36].mxu0 %v5234_v3  ;;  %v5240_v17 = vadd.f32 %v4152_v30, %v1574_v13  ;;  %v5696_v30 = vld [vmem:[#allocation33_spill] sm:$0xff]  ;;  %v5700_v38 = vld [vmem:[#allocation39_spill] sm:$0xff]  ;;  %v5701_v13 = vld [vmem:[#allocation40_spill] sm:$0xff] }
 0x3ce   :  { %1669 = vmatprep.mubr.f32.mxu0 %v5664_v28  ;;  %v1567_v48 = vsub.f32 %v4261_v7, %v4160_v50  ;;  %3755 = vmatpush1.bf16.msra.mxu0 %v4756_v19  ;;  %v4162_v57 = vpop.eup %4161  ;;  %v5693_v19 = vld [vmem:[#allocation28_spill] sm:$0xff] }
 0x3cf   :  { %v1554_v12 = vadd.f32 %v1546_v34, %v1192_v40  ;;  %3757 = vmatprep.subr.bf16.mxu0 %v5691_v39  ;;  %v5702_v40 = vld [vmem:[#allocation22_spill] sm:$0xff] }
 0x3d0   :  { %v1575_v31 = vmul.f32 %v4162_v57, %v1567_v48  ;;  %v4164_v14 = vpop.eup %4163  ;;  %v5703_v57 = vld [vmem:[#allocation23_spill] sm:$0xff] }
 0x3d1   :  { %4171 = vtanh.f32 %v1554_v12  ;;  %1670 = vmatmul.mubr.f32.gmra.mrb[38].mxu0 %v5240_v17  ;;  %v1568_v35 = vsub.f32 %v4262_v44, %v4164_v14  ;;  %v4166_v20 = vpop.eup %4165 }
 0x3d2   :  { %1675 = vmatprep.mubr.f32.mxu0 %v5664_v28  ;;  %v5247_v27 = vadd.f32 %v4160_v50, %v1575_v31  ;;  %3759 = vmatpush1.bf16.msra.mxu0 %v5692_v62  ;;  %4173 = vrcp.f32 %v1522_v26 }
 0x3d3   :  { %3761 = vmatprep.subr.bf16.mxu0 %v5693_v19  ;;  %v1576_v60 = vmul.f32 %v4166_v20, %v1568_v35 }
 0x3d4   :  { %v4168_v6 = vpop.eup %4167 }
 0x3d5   :  { %1676 = vmatmul.mubr.f32.gmra.mrb[40].mxu0 %v5247_v27  ;;  %v1569_v2 = vsub.f32 %v5117_v4, %v4168_v6  ;;  %v4170_v21 = vpop.eup %4169  ;;  %v5254_v33 = vadd.f32 %v4164_v14, %v1576_v60  ;;  %v5697_v4 = vld [vmem:[#allocation34_spill] sm:$0xff] }
 0x3d6   :  { %1681 = vmatprep.mubr.f32.mxu0 %v5664_v28  ;;  %3763 = vmatpush1.bf16.msra.mxu0 %v5694_v10 }
 0x3d7   :  { %v1577_v52 = vmul.f32 %v4170_v21, %v1569_v2  ;;  %3765 = vmatprep.subr.bf16.mxu0 %v5695_v42 }
 0x3d9   :  { %1682 = vmatmul.mubr.f32.gmra.mrb[42].mxu0 %v5254_v33  ;;  %v5259_v23 = vadd.f32 %v4168_v6, %v1577_v52 }
 0x3da   :  { %1687 = vmatprep.mubr.f32.mxu0 %v5664_v28  ;;  %3767 = vmatpush1.bf16.msra.mxu0 %v5696_v30 }
 0x3db   :  { %v4172_v56 = vpop.eup %4171  ;;  %3769 = vmatprep.subr.bf16.mxu0 %v5697_v4 }
 0x3dc   :  { %v1570_v15 = vsub.f32 %v5123_v8, %v4172_v56  ;;  %v4174_v32 = vpop.eup %4173 }
 0x3dd   :  { %1688 = vmatmul.mubr.f32.gmra.mrb[44].mxu0 %v5259_v23 }
 0x3de   :  { %1693 = vmatprep.mubr.f32.mxu0 %v5664_v28  ;;  %v1578_v9 = vmul.f32 %v4174_v32, %v1570_v15  ;;  %3771 = vmatpush1.bf16.msra.mxu0 %v5698_v49 }
 0x3df   :  { %3773 = vmatprep.subr.bf16.mxu0 %v5699_v53 }
 0x3e0   :  { %v5269_v63 = vadd.f32 %v4172_v56, %v1578_v9 }
 0x3e2   :  { %1694 = vmatmul.mubr.f32.gmra.mrb[46].mxu0 %v5269_v63 }
 0x3e3   :  { %3775 = vmatpush1.bf16.msra.mxu0 %v5700_v38  ;;  %1974 = vmatprep.mubr.f32.mxu0 %v5664_v28 }
 0x3e4   :  { %3809 = vmatprep.subr.bf16.mxu0 %v5701_v13 }
 0x498   :  { %v1653_v8 = vpop.f32.mrb[32].mxu0 }
 0x499   :  { %v1655_v0 = vpop.f32.mrb[33].mxu0  ;;  %v1654_v34 = vadd.f32 %v1653_v8, %v5702_v40 }
 0x49a   :  { %v1656_v26 = vadd.f32 %v1655_v0, %v5703_v57 }
 0x49c   :  { %v1659_v50 = vpop.f32.mrb[34].mxu0 }
 0x49d   :  { %v1660_v7 = vadd.f32 %v1659_v50, %v5702_v40  ;;  %v1661_v48 = vpop.f32.mrb[35].mxu0 }
 0x49e   :  { %v1662_v12 = vadd.f32 %v1661_v48, %v5703_v57 }
 0x49f   :  { %v3712_v39 = vpack.c.bf16 %v1660_v7, %v1654_v34 }
 0x4a0   :  { %v3728_v31 = vpack.c.bf16 %v1662_v12, %v1656_v26  ;;  %v1665_v14 = vpop.f32.mrb[36].mxu0  ;;  %v4263_v12 = vld [vmem:[#allocation2 + $0x8] sm:$0xff] }
 0x4a1   :  { %v1667_v44 = vpop.f32.mrb[37].mxu0  ;;  %3713 = vmatprep.subr.bf16.mxu1 %v3712_v39  ;;  %v1666_v62 = vadd.f32 %v1665_v14, %v5702_v40  ;;  %v4265_v14 = vld [vmem:[#allocation2 + $0x18] sm:$0xff] }
 0x4a2   :  { %3715 = vmatpush3.bf16.msra.mxu1 %v3712_v39  ;;  %v1668_v6 = vadd.f32 %v1667_v44, %v5703_v57  ;;  %v4264_v39 = vld [vmem:[#allocation2 + $0x10] sm:$0xff] }
 0x4a3   :  { %v4268_v44 = vld [vmem:[#allocation2 + $0x30] sm:$0xff] }
 0x4a4   :  { %v1671_v35 = vpop.f32.mrb[38].mxu0 }
 0x4a5   :  { %v1672_v20 = vadd.f32 %v1671_v35, %v5702_v40  ;;  %v1673_v19 = vpop.f32.mrb[39].mxu0  ;;  %v4270_v35 = vld [vmem:[#allocation5] sm:$0xff] }
 0x4a6   :  { %v1674_v60 = vadd.f32 %v1673_v19, %v5703_v57  ;;  %v4272_v19 = vld [vmem:[#allocation5 + $0x10] sm:$0xff] }
 0x4a7   :  { %v3716_v2 = vpack.c.bf16 %v1672_v20, %v1666_v62  ;;  %v5704_v62 = vld [vmem:[#allocation24_spill] sm:$0xff]  ;;  %v4271_v20 = vld [vmem:[#allocation5 + $0x8] sm:$0xff] }
 0x4a8   :  { %v3732_v21 = vpack.c.bf16 %v1674_v60, %v1668_v6  ;;  %v1677_v10 = vpop.f32.mrb[40].mxu0  ;;  %v5705_v6 = vld [vmem:[#allocation25_spill] sm:$0xff]  ;;  %v4273_v60 = vld [vmem:[#allocation5 + $0x18] sm:$0xff] }
 0x4a9   :  { %v1679_v52 = vpop.f32.mrb[41].mxu0  ;;  %3717 = vmatprep.subr.bf16.mxu1 %v3716_v2  ;;  %v1678_v30 = vadd.f32 %v1677_v10, %v5702_v40  ;;  %v4275_v10 = vld [vmem:[#allocation5 + $0x28] sm:$0xff] }
 0x4aa   :  { %3719 = vmatpush3.bf16.msra.mxu1 %v3716_v2  ;;  %v1680_v15 = vadd.f32 %v1679_v52, %v5703_v57  ;;  %v4274_v2 = vld [vmem:[#allocation5 + $0x20] sm:$0xff]  ;;  %v4276_v52 = vld [vmem:[#allocation5 + $0x30] sm:$0xff] }
 0x4ac   :  { %v1683_v42 = vpop.f32.mrb[42].mxu0 }
 0x4ad   :  { %v1684_v56 = vadd.f32 %v1683_v42, %v5702_v40  ;;  %v1685_v4 = vpop.f32.mrb[43].mxu0  ;;  %v5707_v42 = vld [vmem:[#allocation27_spill] sm:$0xff] }
 0x4ae   :  { %v1686_v32 = vadd.f32 %v1685_v4, %v5703_v57  ;;  %v5709_v4 = vld [vmem:[#allocation32_spill] sm:$0xff] }
 0x4af   :  { %v3720_v9 = vpack.c.bf16 %v1684_v56, %v1678_v30  ;;  %v4277_v30 = vld [vmem:[#allocation5 + $0x38] sm:$0xff]  ;;  %v5708_v56 = vld [vmem:[#allocation29_spill] sm:$0xff] }
 0x4b0   :  { %v3736_v49 = vpack.c.bf16 %v1686_v32, %v1680_v15  ;;  %v1689_v53 = vpop.f32.mrb[44].mxu0  ;;  %v5710_v15 = vld [vmem:[#allocation35_spill] sm:$0xff]  ;;  %v5711_v32 = vld [vmem:[#allocation38_spill] sm:$0xff] }
 0x4b1   :  { %v1691_v38 = vpop.f32.mrb[45].mxu0  ;;  %3721 = vmatprep.subr.bf16.mxu1 %v3720_v9  ;;  %v1690_v8 = vadd.f32 %v1689_v53, %v5702_v40 }
 0x4b2   :  { %3723 = vmatpush3.bf16.msra.mxu1 %v3720_v9  ;;  %v1692_v34 = vadd.f32 %v1691_v38, %v5703_v57  ;;  %v5712_v9 = vld [vmem:[#allocation41_spill] sm:$0xff] }
 0x4b5   :  { %v1695_v13 = vpop.f32.mrb[46].mxu0 }
 0x4b6   :  { %v1696_v0 = vadd.f32 %v1695_v13, %v5702_v40  ;;  %v1697_v50 = vpop.f32.mrb[47].mxu0  ;;  %v4266_v40 = vld [vmem:[#allocation2 + $0x20] sm:$0xff] }
 0x4b7   :  { %v1698_v7 = vadd.f32 %v1697_v50, %v5703_v57  ;;  %v4267_v57 = vld [vmem:[#allocation2 + $0x28] sm:$0xff] }
 0x4b8   :  { %v3724_v48 = vpack.c.bf16 %v1696_v0, %v1690_v8 }
 0x4b9   :  { %v3740_v26 = vpack.c.bf16 %v1698_v7, %v1692_v34 }
 0x4ba   :  { %3725 = vmatprep.subr.bf16.mxu1 %v3724_v48 }
 0x4bb   :  { %3727 = vmatpush3.bf16.msra.mxu1 %v3724_v48 }
 0x4bc   :  { %3729 = vmatprep.subr.bf16.mxu1 %v3728_v31 }
 0x4be   :  { %3253 = vmatmul.mubr.msk.f32.vlgmr.msra.gmra.mrb[32].mxu1 %vm458_vm0, %v4263_v12 }
 0x4bf   :  { %3731 = vmatpush3.bf16.msra.mxu1 %v3728_v31  ;;  %3255 = vmatprep.mubr.msk.f32.mxu1 %vm458_vm0, %v4264_v39  ;;  %v4269_v31 = vld [vmem:[#allocation2 + $0x38] sm:$0xff] }
 0x4c0   :  { %3733 = vmatprep.subr.bf16.mxu1 %v3732_v21 }
 0x4c2   :  { %3256 = vmatmul.mubr.msk.f32.gmra.mrb[34].mxu1 %vm458_vm0, %v4265_v14  ;;  %v5714_v14 = vld [vmem:[#allocation43_spill] sm:$0xff] }
 0x4c3   :  { %3735 = vmatpush3.bf16.msra.mxu1 %v3732_v21  ;;  %3258 = vmatprep.mubr.msk.f32.mxu1 %vm458_vm0, %v4266_v40  ;;  %v5706_v21 = vld [vmem:[#allocation26_spill] sm:$0xff]  ;;  %v5715_v40 = vld [vmem:[#allocation44_spill] sm:$0xff] }
 0x4c4   :  { %3737 = vmatprep.subr.bf16.mxu1 %v3736_v49 }
 0x4c6   :  { %3259 = vmatmul.mubr.msk.f32.gmra.mrb[36].mxu1 %vm458_vm0, %v4267_v57  ;;  %v5716_v57 = vld [vmem:[#allocation45_spill] sm:$0xff] }
 0x4c7   :  { %3739 = vmatpush3.bf16.msra.mxu1 %v3736_v49  ;;  %3261 = vmatprep.mubr.msk.f32.mxu1 %vm458_vm0, %v4268_v44 }
 0x4c8   :  { %3741 = vmatprep.subr.bf16.mxu1 %v3740_v26 }
 0x4ca   :  { %3262 = vmatmul.mubr.msk.f32.gmra.mrb[38].mxu1 %vm458_vm0, %v4269_v31 }
 0x4cb   :  { %3743 = vmatpush3.bf16.msra.mxu1 %v3740_v26  ;;  %3280 = vmatprep.mubr.msk.f32.mxu1 %vm458_vm0, %v4270_v35  ;;  %v5713_v26 = vld [vmem:[#allocation42_spill] sm:$0xff] }
 0x4cc   :  { %3777 = vmatprep.subr.bf16.mxu1 %v5704_v62  ;;  %v5717_v35 = vld [vmem:[#allocation46_spill] sm:$0xff] }
 0x4ce   :  { %3281 = vmatmul.mubr.msk.f32.vlgmr.msra.gmra.mrb[40].mxu1 %vm458_vm0, %v4271_v20  ;;  %v5719_v20 = vld [vmem:[#allocation48_spill] sm:$0xff] }
 0x4cf   :  { %3283 = vmatprep.mubr.msk.f32.mxu1 %vm458_vm0, %v4272_v19  ;;  %3779 = vmatpush3.bf16.msra.mxu1 %v5704_v62  ;;  %v5718_v62 = vld [vmem:[#allocation47_spill] sm:$0xff] }
 0x4d0   :  { %3781 = vmatprep.subr.bf16.mxu1 %v5705_v6 }
 0x4d2   :  { %3284 = vmatmul.mubr.msk.f32.gmra.mrb[42].mxu1 %vm458_vm0, %v4273_v60  ;;  %v5720_v60 = vld [vmem:[#allocation49_spill] sm:$0xff] }
 0x4d3   :  { %3286 = vmatprep.mubr.msk.f32.mxu1 %vm458_vm0, %v4274_v2  ;;  %3783 = vmatpush3.bf16.msra.mxu1 %v5705_v6  ;;  %v5721_v2 = vld [vmem:[#allocation50_spill] sm:$0xff] }
 0x4d4   :  { %3785 = vmatprep.subr.bf16.mxu1 %v5706_v21 }
 0x4d6   :  { %3287 = vmatmul.mubr.msk.f32.gmra.mrb[44].mxu1 %vm458_vm0, %v4275_v10  ;;  %v5723_v10 = vld [vmem:[#allocation52_spill] sm:$0xff] }
 0x4d7   :  { %3289 = vmatprep.mubr.msk.f32.mxu1 %vm458_vm0, %v4276_v52  ;;  %3787 = vmatpush3.bf16.msra.mxu1 %v5706_v21  ;;  %v5722_v21 = vld [vmem:[#allocation51_spill] sm:$0xff]  ;;  %v5724_v52 = vld [vmem:[#allocation53_spill] sm:$0xff] }
 0x4d8   :  { %3789 = vmatprep.subr.bf16.mxu1 %v5707_v42 }
 0x4da   :  { %3290 = vmatmul.mubr.msk.f32.gmra.mrb[46].mxu1 %vm458_vm0, %v4277_v30  ;;  %v5726_v30 = vld [vmem:[#allocation55_spill] sm:$0xff] }
 0x4db   :  { %3791 = vmatpush3.bf16.msra.mxu1 %v5707_v42  ;;  %v5725_v42 = vld [vmem:[#allocation54_spill] sm:$0xff] }
 0x4dc   :  { %3793 = vmatprep.subr.bf16.mxu1 %v5708_v56 }
 0x4df   :  { %3795 = vmatpush3.bf16.msra.mxu1 %v5708_v56  ;;  %v5728_v56 = vld [vmem:[#allocation57_spill] sm:$0xff] }
 0x4e0   :  { %3797 = vmatprep.subr.bf16.mxu1 %v5709_v4 }
 0x4e3   :  { %3799 = vmatpush3.bf16.msra.mxu1 %v5709_v4  ;;  %v5734_v4 = vld [vmem:[#allocation63_spill] sm:$0xff] }
 0x4e4   :  { %3801 = vmatprep.subr.bf16.mxu1 %v5710_v15 }
 0x4e7   :  { %3803 = vmatpush3.bf16.msra.mxu1 %v5710_v15  ;;  %v5736_v15 = vld [vmem:[#allocation65_spill] sm:$0xff] }
 0x4e8   :  { %3805 = vmatprep.subr.bf16.mxu1 %v5711_v32 }
 0x4eb   :  { %3807 = vmatpush3.bf16.msra.mxu1 %v5711_v32  ;;  %v5737_v32 = vld [vmem:[#allocation66_spill] sm:$0xff] }
 0x4ec   :  { %3841 = vmatprep.subr.bf16.mxu1 %v5712_v9 }
 0x591   :  { %v5323_v49 = vpop.f32.mrb[32].mxu1 }
 0x592   :  { %v5325_v53 = vpop.f32.mrb[33].mxu1 }
 0x595   :  { %v5327_v38 = vpop.f32.mrb[34].mxu1 }
 0x596   :  { %v5329_v13 = vpop.f32.mrb[35].mxu1 }
 0x599   :  { %v5331_v8 = vpop.f32.mrb[36].mxu1 }
 0x59a   :  { %v5333_v0 = vpop.f32.mrb[37].mxu1 }
 0x59d   :  { %v5335_v50 = vpop.f32.mrb[38].mxu1 }
 0x59e   :  { %v5337_v34 = vpop.f32.mrb[39].mxu1 }
 0x5a1   :  { %v3282_v7 = vpop.f32.mrb[40].mxu1 }
 0x5a2   :  { %v1871_v48 = vpop.f32.mrb[41].mxu1 }
 0x5a3   :  { %1975 = vmatmul.mubr.f32.vlgmr.msra.gmra.mrb[48].mxu0 %v1871_v48  ;;  %3324 = vmatprep.mubr.f32.mxu1 %v1871_v48 }
 0x5a4   :  { %3325 = vmatmul.mubr.f32.vlgmr.msra.gmra.mrb[48].mxu1 %v3282_v7  ;;  %3811 = vmatpush1.bf16.msra.mxu0 %v5713_v26 }
 0x5a5   :  { %3843 = vmatpush3.bf16.msra.mxu1 %v5712_v9  ;;  %v3285_v12 = vpop.f32.mrb[42].mxu1  ;;  %1980 = vmatprep.mubr.f32.mxu0 %v5664_v28  ;;  %v5738_v9 = vld [vmem:[#allocation67_spill] sm:$0xff] }
 0x5a6   :  { %v1881_v39 = vpop.f32.mrb[43].mxu1  ;;  %3813 = vmatprep.subr.bf16.mxu0 %v5714_v14  ;;  %3845 = vmatprep.subr.bf16.mxu1 %v5715_v40 }
 0x5a7   :  { %1981 = vmatmul.mubr.f32.gmra.mrb[50].mxu0 %v3282_v7  ;;  %3327 = vmatprep.mubr.f32.mxu1 %v1881_v39 }
 0x5a8   :  { %3328 = vmatmul.mubr.f32.gmra.mrb[50].mxu1 %v3285_v12  ;;  %3815 = vmatpush1.bf16.msra.mxu0 %v5716_v57 }
 0x5a9   :  { %3847 = vmatpush3.bf16.msra.mxu1 %v5715_v40  ;;  %v3288_v44 = vpop.f32.mrb[44].mxu1  ;;  %1986 = vmatprep.mubr.f32.mxu0 %v5664_v28 }
 0x5aa   :  { %v1891_v31 = vpop.f32.mrb[45].mxu1  ;;  %3817 = vmatprep.subr.bf16.mxu0 %v5717_v35  ;;  %3849 = vmatprep.subr.bf16.mxu1 %v5718_v62 }
 0x5ab   :  { %1987 = vmatmul.mubr.f32.gmra.mrb[52].mxu0 %v1881_v39  ;;  %3330 = vmatprep.mubr.f32.mxu1 %v1891_v31 }
 0x5ac   :  { %3331 = vmatmul.mubr.f32.gmra.mrb[52].mxu1 %v3288_v44  ;;  %3819 = vmatpush1.bf16.msra.mxu0 %v5719_v20 }
 0x5ad   :  { %3851 = vmatpush3.bf16.msra.mxu1 %v5718_v62  ;;  %v3291_v19 = vpop.f32.mrb[46].mxu1  ;;  %1992 = vmatprep.mubr.f32.mxu0 %v5664_v28 }
 0x5ae   :  { %v1901_v6 = vpop.f32.mrb[47].mxu1  ;;  %3821 = vmatprep.subr.bf16.mxu0 %v5720_v60  ;;  %3853 = vmatprep.subr.bf16.mxu1 %v5721_v2 }
 0x5af   :  { %1993 = vmatmul.mubr.f32.gmra.mrb[54].mxu0 %v3285_v12  ;;  %3333 = vmatprep.mubr.f32.mxu1 %v1901_v6 }
 0x5b0   :  { %3334 = vmatmul.mubr.f32.gmra.mrb[54].mxu1 %v3291_v19  ;;  %3823 = vmatpush1.bf16.msra.mxu0 %v5722_v21 }
 0x5b1   :  { %3855 = vmatpush3.bf16.msra.mxu1 %v5721_v2  ;;  %3368 = vmatprep.mubr.f32.mxu1 %v5325_v53 }
 0x5b2   :  { %1998 = vmatprep.mubr.f32.mxu0 %v5664_v28  ;;  %3825 = vmatprep.subr.bf16.mxu0 %v5723_v10 }
 0x5b3   :  { %1999 = vmatmul.mubr.f32.gmra.mrb[56].mxu0 %v1891_v31  ;;  %3857 = vmatprep.subr.bf16.mxu1 %v4931_v61 }
 0x5b4   :  { %3827 = vmatpush1.bf16.msra.mxu0 %v5724_v52  ;;  %2004 = vmatprep.mubr.f32.mxu0 %v5664_v28 }
 0x5b5   :  { %3859 = vmatpush3.bf16.msra.mxu1 %v4931_v61  ;;  %3829 = vmatprep.subr.bf16.mxu0 %v5725_v42  ;;  %v5727_v61 = vld [vmem:[#allocation56_spill] sm:$0xff] }
 0x5b6   :  { %3861 = vmatprep.subr.bf16.mxu1 %v4943_v25 }
 0x5b7   :  { %2005 = vmatmul.mubr.f32.gmra.mrb[58].mxu0 %v3288_v44 }
 0x5b8   :  { %3831 = vmatpush1.bf16.msra.mxu0 %v5726_v30  ;;  %2010 = vmatprep.mubr.f32.mxu0 %v5664_v28 }
 0x5b9   :  { %3863 = vmatpush3.bf16.msra.mxu1 %v4943_v25  ;;  %3833 = vmatprep.subr.bf16.mxu0 %v4952_v16  ;;  %v5729_v25 = vld [vmem:[#allocation58_spill] sm:$0xff]  ;;  %v5730_v16 = vld [vmem:[#allocation59_spill] sm:$0xff] }
 0x5ba   :  { %3865 = vmatprep.subr.bf16.mxu1 %v4955_v43 }
 0x5bb   :  { %2011 = vmatmul.mubr.f32.gmra.mrb[60].mxu0 %v1901_v6 }
 0x5bc   :  { %3835 = vmatpush1.bf16.msra.mxu0 %v4959_v37  ;;  %2016 = vmatprep.mubr.f32.mxu0 %v5664_v28  ;;  %v5732_v37 = vld [vmem:[#allocation61_spill] sm:$0xff] }
 0x5bd   :  { %3867 = vmatpush3.bf16.msra.mxu1 %v4955_v43  ;;  %3837 = vmatprep.subr.bf16.mxu0 %v5727_v61  ;;  %v5731_v43 = vld [vmem:[#allocation60_spill] sm:$0xff] }
 0x5be   :  { %3869 = vmatprep.subr.bf16.mxu1 %v4966_v24 }
 0x5bf   :  { %2017 = vmatmul.mubr.f32.gmra.mrb[62].mxu0 %v3291_v19 }
 0x5c0   :  { %3839 = vmatpush1.bf16.msra.mxu0 %v5728_v56  ;;  %2192 = vmatprep.mubr.f32.mxu0 %v5664_v28 }
 0x5c1   :  { %3871 = vmatpush3.bf16.msra.mxu1 %v4966_v24  ;;  %3873 = vmatprep.subr.bf16.mxu0 %v5729_v25  ;;  %v5733_v24 = vld [vmem:[#allocation62_spill] sm:$0xff] }
 0x5c2   :  { %3905 = vmatprep.subr.bf16.mxu1 %v4977_v5 }
 0x5c3   :  { %2193 = vmatmul.mubr.f32.vlgmr.msra.gmra.mrb[48].mxu0 %v5325_v53  ;;  %v5740_v53 = vld [vmem:[#allocation69_spill] sm:$0xff] }
 0x5c4   :  { %3369 = vmatmul.mubr.f32.vlgmr.msra.gmra.mrb[48].mxu1 %v5323_v49  ;;  %3875 = vmatpush1.bf16.msra.mxu0 %v5730_v16 }
 0x5c5   :  { %3371 = vmatprep.mubr.f32.mxu1 %v5329_v13  ;;  %3907 = vmatpush3.bf16.msra.mxu1 %v4977_v5  ;;  %v5735_v5 = vld [vmem:[#allocation64_spill] sm:$0xff] }
 0x5c6   :  { %2198 = vmatprep.mubr.f32.mxu0 %v5664_v28  ;;  %3877 = vmatprep.subr.bf16.mxu0 %v5731_v43 }
 0x5c7   :  { %2199 = vmatmul.mubr.f32.gmra.mrb[50].mxu0 %v5323_v49  ;;  %3909 = vmatprep.subr.bf16.mxu1 %v5732_v37  ;;  %v5739_v49 = vld [vmem:[#allocation68_spill] sm:$0xff] }
 0x5c8   :  { %3372 = vmatmul.mubr.f32.gmra.mrb[50].mxu1 %v5327_v38  ;;  %3879 = vmatpush1.bf16.msra.mxu0 %v5733_v24 }
 0x5c9   :  { %3374 = vmatprep.mubr.f32.mxu1 %v5333_v0  ;;  %3911 = vmatpush3.bf16.msra.mxu1 %v5732_v37 }
 0x5ca   :  { %2204 = vmatprep.mubr.f32.mxu0 %v5664_v28  ;;  %3881 = vmatprep.subr.bf16.mxu0 %v5734_v4 }
 0x5cb   :  { %2205 = vmatmul.mubr.f32.gmra.mrb[52].mxu0 %v5329_v13  ;;  %3913 = vmatprep.subr.bf16.mxu1 %v5735_v5 }
 0x5cc   :  { %3375 = vmatmul.mubr.f32.gmra.mrb[52].mxu1 %v5331_v8  ;;  %3883 = vmatpush1.bf16.msra.mxu0 %v5736_v15 }
 0x5cd   :  { %3377 = vmatprep.mubr.f32.mxu1 %v5337_v34  ;;  %3915 = vmatpush3.bf16.msra.mxu1 %v5735_v5 }
 0x5ce   :  { %2210 = vmatprep.mubr.f32.mxu0 %v5664_v28  ;;  %3885 = vmatprep.subr.bf16.mxu0 %v5737_v32 }
 0x5cf   :  { %2211 = vmatmul.mubr.f32.gmra.mrb[54].mxu0 %v5327_v38  ;;  %3917 = vmatprep.subr.bf16.mxu1 %v5018_v36 }
 0x5d0   :  { %3378 = vmatmul.mubr.f32.gmra.mrb[54].mxu1 %v5335_v50  ;;  %3887 = vmatpush1.bf16.msra.mxu0 %v5738_v9 }
 0x5d1   :  { %3919 = vmatpush3.bf16.msra.mxu1 %v5018_v36  ;;  %3412 = vmatprep.mubr.f32.mxu1 %v5219_v29  ;;  %v5741_v36 = vld [vmem:[#allocation70_spill] sm:$0xff] }
 0x5d2   :  { %2216 = vmatprep.mubr.f32.mxu0 %v5664_v28  ;;  %3889 = vmatprep.subr.bf16.mxu0 %v5739_v49 }
 0x5d3   :  { %2217 = vmatmul.mubr.f32.gmra.mrb[56].mxu0 %v5333_v0  ;;  %3921 = vmatprep.subr.bf16.mxu1 %v5032_v11 }
 0x5d4   :  { %3891 = vmatpush1.bf16.msra.mxu0 %v5036_v46  ;;  %2222 = vmatprep.mubr.f32.mxu0 %v5664_v28 }
 0x5d5   :  { %3923 = vmatpush3.bf16.msra.mxu1 %v5032_v11  ;;  %3893 = vmatprep.subr.bf16.mxu0 %v5740_v53  ;;  %v5742_v11 = vld [vmem:[#allocation71_spill] sm:$0xff] }
 0x5d6   :  { %3925 = vmatprep.subr.bf16.mxu1 %v5046_v1 }
 0x5d7   :  { %2223 = vmatmul.mubr.f32.gmra.mrb[58].mxu0 %v5331_v8 }
 0x5d8   :  { %3895 = vmatpush1.bf16.msra.mxu0 %v5050_v59  ;;  %2228 = vmatprep.mubr.f32.mxu0 %v5664_v28 }
 0x5d9   :  { %3927 = vmatpush3.bf16.msra.mxu1 %v5046_v1  ;;  %3897 = vmatprep.subr.bf16.mxu0 %v5053_v58 }
 0x5da   :  { %3929 = vmatprep.subr.bf16.mxu1 %v5058_v41 }
 0x5db   :  { %2229 = vmatmul.mubr.f32.gmra.mrb[60].mxu0 %v5337_v34 }
 0x5dc   :  { %3899 = vmatpush1.bf16.msra.mxu0 %v5062_v47  ;;  %2234 = vmatprep.mubr.f32.mxu0 %v5664_v28 }
 0x5dd   :  { %3931 = vmatpush3.bf16.msra.mxu1 %v5058_v41  ;;  %3901 = vmatprep.subr.bf16.mxu0 %v5065_v22 }
 0x5de   :  { %3933 = vmatprep.subr.bf16.mxu1 %v5741_v36 }
 0x5df   :  { %2235 = vmatmul.mubr.f32.gmra.mrb[62].mxu0 %v5335_v50 }
 0x5e0   :  { %3903 = vmatpush1.bf16.msra.mxu0 %v5742_v11  ;;  %2434 = vmatprep.mubr.f32.mxu0 %v5664_v28 }
 0x5e1   :  { %3935 = vmatpush3.bf16.msra.mxu1 %v5741_v36 }
 0x5e3   :  { %2435 = vmatmul.mubr.f32.vlgmr.msra.gmra.mrb[48].mxu0 %v5219_v29 }
 0x5e4   :  { %3413 = vmatmul.mubr.f32.vlgmr.msra.gmra.mrb[56].mxu1 %v5226_v18  ;;  %2440 = vmatprep.mubr.f32.mxu0 %v5664_v28 }
 0x5e5   :  { %3415 = vmatprep.mubr.f32.mxu1 %v5234_v3 }
 0x5e7   :  { %2441 = vmatmul.mubr.f32.gmra.mrb[50].mxu0 %v5226_v18 }
 0x5e8   :  { %3416 = vmatmul.mubr.f32.gmra.mrb[58].mxu1 %v5240_v17  ;;  %2446 = vmatprep.mubr.f32.mxu0 %v5664_v28 }
 0x5e9   :  { %3418 = vmatprep.mubr.f32.mxu1 %v5247_v27 }
 0x5eb   :  { %2447 = vmatmul.mubr.f32.gmra.mrb[52].mxu0 %v5234_v3 }
 0x5ec   :  { %3419 = vmatmul.mubr.f32.gmra.mrb[60].mxu1 %v5254_v33  ;;  %2452 = vmatprep.mubr.f32.mxu0 %v5664_v28 }
 0x5ed   :  { %3421 = vmatprep.mubr.f32.mxu1 %v5259_v23 }
 0x5ef   :  { %2453 = vmatmul.mubr.f32.gmra.mrb[54].mxu0 %v5240_v17 }
 0x5f0   :  { %3422 = vmatmul.mubr.f32.gmra.mrb[62].mxu1 %v5269_v63  ;;  %2458 = vmatprep.mubr.f32.mxu0 %v5664_v28 }
 0x5f3   :  { %2459 = vmatmul.mubr.f32.gmra.mrb[56].mxu0 %v5247_v27 }
 0x5f4   :  { %2464 = vmatprep.mubr.f32.mxu0 %v5664_v28 }
 0x5f7   :  { %2465 = vmatmul.mubr.f32.gmra.mrb[58].mxu0 %v5254_v33 }
 0x5f8   :  { %2470 = vmatprep.mubr.f32.mxu0 %v5664_v28 }
 0x5fb   :  { %2471 = vmatmul.mubr.f32.gmra.mrb[60].mxu0 %v5259_v23 }
 0x5fc   :  { %2476 = vmatprep.mubr.f32.mxu0 %v5664_v28 }
 0x5ff   :  { %2477 = vmatmul.mubr.f32.gmra.mrb[62].mxu0 %v5269_v63 }
 0x697   :  { %v5456_v46 = vpop.f32.mrb[48].mxu1 }
 0x698   :  { %v5458_v1 = vpop.f32.mrb[49].mxu1 }
 0x69b   :  { %v5460_v59 = vpop.f32.mrb[50].mxu1 }
 0x69c   :  { %v5462_v58 = vpop.f32.mrb[51].mxu1 }
 0x69f   :  { %v5464_v41 = vpop.f32.mrb[52].mxu1 }
 0x6a0   :  { %v5466_v47 = vpop.f32.mrb[53].mxu1 }
 0x6a3   :  { %v5468_v22 = vpop.f32.mrb[54].mxu1 }
 0x6a4   :  { %v5470_v38 = vpop.f32.mrb[55].mxu1 }
 0x6b6   :  { %v2436_v13 = vpop.f32.mrb[48].mxu0 }
 0x6b7   :  { %v3969_v28 = vadd.f32 %v5153_v45, %v2436_v13  ;;  %v5473_v8 = vpop.f32.mrb[56].mxu1  ;;  %v2438_v0 = vpop.f32.mrb[49].mxu0 }
 0x6b8   :  { %v2549_v50 = vpop.f32.mrb[57].mxu1  ;;  %v3971_v39 = vadd.f32 %v5160_v55, %v2438_v0 }
 0x6b9   :  { %v2824_v34 = vmul.f32 -1.442695, %v3969_v28 }
 0x6ba   :  { %v2442_v7 = vpop.f32.mrb[50].mxu0  ;;  %v2832_v20 = vmul.f32 -1.442695, %v3971_v39 }
 0x6bb   :  { %4175 = vpow2.f32 %v2824_v34  ;;  %v3973_v48 = vadd.f32 %v5153_v45, %v2442_v7  ;;  %v5476_v26 = vpop.f32.mrb[58].mxu1  ;;  %v2444_v12 = vpop.f32.mrb[51].mxu0 }
 0x6bc   :  { %v5479_v14 = vpop.f32.mrb[59].mxu1  ;;  %v3975_v57 = vadd.f32 %v5160_v55, %v2444_v12 }
 0x6bd   :  { %v2825_v40 = vmul.f32 -1.442695, %v3973_v48 }
 0x6be   :  { %v2448_v44 = vpop.f32.mrb[52].mxu0  ;;  %v2833_v6 = vmul.f32 -1.442695, %v3975_v57 }
 0x6bf   :  { %4177 = vpow2.f32 %v2825_v40  ;;  %v3977_v31 = vadd.f32 %v5153_v45, %v2448_v44  ;;  %v5483_v35 = vpop.f32.mrb[60].mxu1  ;;  %v2450_v62 = vpop.f32.mrb[53].mxu0  ;;  %v2550_v44 = vadd.f32 %v2549_v50, %v5184_v51  ;;  %v2555_v50 = vadd.f32 %v5473_v8, %v5184_v51 }
 0x6c0   :  { %v5485_v19 = vpop.f32.mrb[61].mxu1  ;;  %v3979_v61 = vadd.f32 %v5160_v55, %v2450_v62  ;;  %v2560_v8 = vadd.f32 %v5479_v14, %v5184_v51 }
 0x6c1   :  { %v2826_v60 = vmul.f32 -1.442695, %v3977_v31 }
 0x6c2   :  { %v2454_v2 = vpop.f32.mrb[54].mxu0  ;;  %v2834_v4 = vmul.f32 -1.442695, %v3979_v61 }
 0x6c3   :  { %4179 = vpow2.f32 %v2826_v60  ;;  %v3981_v21 = vadd.f32 %v5153_v45, %v2454_v2  ;;  %v5488_v10 = vpop.f32.mrb[62].mxu1  ;;  %v2456_v52 = vpop.f32.mrb[55].mxu0  ;;  %v2348_v2 = vadd.f32 %v5458_v1, %v5186_v54 }
 0x6c4   :  { %4181 = vpow2.f32 %v2832_v20  ;;  %v5490_v42 = vpop.f32.mrb[63].mxu1  ;;  %v3983_v32 = vadd.f32 %v5160_v55, %v2456_v52 }
 0x6c5   :  { %v4176_v30 = vpop.eup %4175  ;;  %4183 = vpow2.f32 %v2833_v6  ;;  %v2827_v56 = vmul.f32 -1.442695, %v3981_v21 }
 0x6c6   :  { %v2620_v25 = vadd.f32 1.0, %v4176_v30  ;;  %v2460_v16 = vpop.f32.mrb[56].mxu0  ;;  %v2835_v0 = vmul.f32 -1.442695, %v3983_v32 }
 0x6c7   :  { %4185 = vpow2.f32 %v2827_v56  ;;  %v3985_v43 = vadd.f32 %v5153_v45, %v2460_v16  ;;  %v2462_v37 = vpop.f32.mrb[57].mxu0 }
 0x6c8   :  { %4187 = vrcp.f32 %v2620_v25  ;;  %v3987_v39 = vadd.f32 %v5160_v55, %v2462_v37 }
 0x6c9   :  { %v4178_v24 = vpop.eup %4177  ;;  %v2828_v5 = vmul.f32 -1.442695, %v3985_v43 }
 0x6ca   :  { %v2621_v15 = vadd.f32 1.0, %v4178_v24  ;;  %v2466_v9 = vpop.f32.mrb[58].mxu0  ;;  %v2836_v61 = vmul.f32 -1.442695, %v3987_v39 }
 0x6cb   :  { %4189 = vpow2.f32 %v2828_v5  ;;  %v3989_v49 = vadd.f32 %v5153_v45, %v2466_v9  ;;  %v2468_v53 = vpop.f32.mrb[59].mxu0 }
 0x6cc   :  { %4191 = vrcp.f32 %v2621_v15  ;;  %v3991_v56 = vadd.f32 %v5160_v55, %v2468_v53 }
 0x6cd   :  { %v4180_v36 = vpop.eup %4179  ;;  %4193 = vpow2.f32 %v2834_v4  ;;  %v2829_v11 = vmul.f32 -1.442695, %v3989_v49  ;;  %v2351_v4 = vadd.f32 %v5456_v46, %v5186_v54 }
 0x6ce   :  { %v4182_v13 = vpop.eup %4181  ;;  %v2622_v28 = vadd.f32 1.0, %v4180_v36  ;;  %v2472_v34 = vpop.f32.mrb[60].mxu0  ;;  %v2837_v5 = vmul.f32 -1.442695, %v3991_v56 }
 0x6cf   :  { %v4184_v7 = vpop.eup %4183  ;;  %4195 = vpow2.f32 %v2829_v11  ;;  %v3993_v48 = vadd.f32 %v5153_v45, %v2472_v34  ;;  %v2474_v12 = vpop.f32.mrb[61].mxu0  ;;  %v2676_v57 = vadd.f32 1.0, %v4182_v13  ;;  %v2354_v11 = vadd.f32 %v5462_v58, %v5186_v54 }
 0x6d0   :  { %4197 = vrcp.f32 %v2622_v28  ;;  %v2677_v20 = vadd.f32 1.0, %v4184_v7  ;;  %v3995_v15 = vadd.f32 %v5160_v55, %v2474_v12  ;;  %v2565_v34 = vadd.f32 %v5476_v26, %v5184_v51 }
 0x6d1   :  { %v4186_v40 = vpop.eup %4185  ;;  %v2830_v31 = vmul.f32 -1.442695, %v3993_v48  ;;  %4199 = vpow2.f32 %v2835_v0  ;;  %v2357_v58 = vadd.f32 %v5460_v59, %v5186_v54  ;;  %v2360_v59 = vadd.f32 %v5466_v47, %v5186_v54 }
 0x6d2   :  { %v4188_v62 = vpop.eup %4187  ;;  %v2623_v6 = vadd.f32 1.0, %v4186_v40  ;;  %v2478_v60 = vpop.f32.mrb[62].mxu0  ;;  %v2838_v28 = vmul.f32 -1.442695, %v3995_v15  ;;  %v2363_v47 = vadd.f32 %v5464_v41, %v5186_v54 }
 0x6d3   :  { %v2700_v21 = vmul.f32 %v4188_v62, %v2550_v44  ;;  %4201 = vpow2.f32 %v2830_v31  ;;  %v3997_v52 = vadd.f32 %v5153_v45, %v2478_v60  ;;  %v2480_v30 = vpop.f32.mrb[63].mxu0 }
 0x6d4   :  { %4203 = vrcp.f32 %v2623_v6  ;;  %v3999_v12 = vadd.f32 %v5160_v55, %v2480_v30  ;;  %v2570_v6 = vadd.f32 %v5485_v19, %v5184_v51 }
 0x6d5   :  { %v4190_v25 = vpop.eup %4189  ;;  %4205 = vrcp.f32 %v2676_v57  ;;  %v2708_v16 = vadd.f32 %v2700_v21, %v2348_v2  ;;  %v2831_v24 = vmul.f32 -1.442695, %v3997_v52 }
 0x6d6   :  { %v4192_v43 = vpop.eup %4191  ;;  %4207 = vrcp.f32 %v2677_v20  ;;  %v2624_v37 = vadd.f32 1.0, %v4190_v25  ;;  %v2839_v60 = vmul.f32 -1.442695, %v3999_v12 }
 0x6d7   :  { %v4194_v1 = vpop.eup %4193  ;;  %4209 = vtanh.f32 %v2708_v16  ;;  %v2701_v45 = vmul.f32 %v4192_v43, %v2555_v50 }
 0x6d8   :  { %4211 = vpow2.f32 %v2836_v61  ;;  %v2678_v53 = vadd.f32 1.0, %v4194_v1  ;;  %v2575_v61 = vadd.f32 %v5483_v35, %v5184_v51 }
 0x6d9   :  { %v4196_v32 = vpop.eup %4195  ;;  %v2709_v9 = vadd.f32 %v2701_v45, %v2351_v4  ;;  %4213 = vrcp.f32 %v2624_v37  ;;  %v2580_v4 = vadd.f32 %v5490_v42, %v5184_v51 }
 0x6da   :  { %v4198_v49 = vpop.eup %4197  ;;  %v2625_v36 = vadd.f32 1.0, %v4196_v32  ;;  %4215 = vpow2.f32 %v2831_v24 }
 0x6db   :  { %4217 = vtanh.f32 %v2709_v9  ;;  %v2702_v46 = vmul.f32 %v4198_v49, %v2560_v8  ;;  %v4200_v13 = vpop.eup %4199  ;;  %v2366_v8 = vadd.f32 %v5470_v38, %v5186_v54 }
 0x6dc   :  { %4219 = vpow2.f32 %v2837_v5  ;;  %v2679_v62 = vadd.f32 1.0, %v4200_v13 }
 0x6dd   :  { %v4202_v0 = vpop.eup %4201  ;;  %v2710_v7 = vadd.f32 %v2702_v46, %v2354_v11  ;;  %4221 = vrcp.f32 %v2625_v36 }
 0x6de   :  { %v4204_v14 = vpop.eup %4203  ;;  %4223 = vrcp.f32 %v2678_v53  ;;  %v2626_v48 = vadd.f32 1.0, %v4202_v0 }
 0x6df   :  { %v4206_v39 = vpop.eup %4205  ;;  %4225 = vtanh.f32 %v2710_v7  ;;  %v2703_v40 = vmul.f32 %v4204_v14, %v2565_v34  ;;  %v2369_v7 = vadd.f32 %v5468_v22, %v5186_v54 }
 0x6e0   :  { %v4208_v57 = vpop.eup %4207  ;;  %4227 = vpow2.f32 %v2838_v28 }
 0x6e1   :  { %v4210_v44 = vpop.eup %4209  ;;  %v2711_v31 = vadd.f32 %v2703_v40, %v2357_v58  ;;  %4229 = vrcp.f32 %v2626_v48 }
 0x6e2   :  { %v4212_v26 = vpop.eup %4211  ;;  %v2724_v20 = vsub.f32 %v5219_v29, %v4210_v44 }
 0x6e3   :  { %v4214_v55 = vpop.eup %4213  ;;  %4231 = vtanh.f32 %v2711_v31  ;;  %v2680_v56 = vadd.f32 1.0, %v4212_v26 }
 0x6e4   :  { %v4216_v2 = vpop.eup %4215  ;;  %v2732_v21 = vmul.f32 %v4206_v39, %v2724_v20  ;;  %v2704_v52 = vmul.f32 %v4214_v55, %v2570_v6  ;;  %4233 = vrcp.f32 %v2679_v62 }
 0x6e5   :  { %v4218_v30 = vpop.eup %4217  ;;  %v2627_v25 = vadd.f32 1.0, %v4216_v2  ;;  %4235 = vpow2.f32 %v2839_v60 }
 0x6e6   :  { %v4220_v29 = vpop.eup %4219  ;;  %v2740_v50 = vadd.f32 %v4210_v44, %v2732_v21  ;;  %v2725_v19 = vsub.f32 %v5226_v18, %v4218_v30  ;;  %v2712_v16 = vadd.f32 %v2704_v52, %v2360_v59 }
 0x6e7   :  { %v4222_v43 = vpop.eup %4221  ;;  %4237 = vrcp.f32 %v2627_v25  ;;  %v2681_v45 = vadd.f32 1.0, %v4220_v29 }
 0x6e8   :  { %v4224_v37 = vpop.eup %4223  ;;  %2748 = vst [vmem:[#allocation14] sm:$0xff] %v2740_v50  ;;  %v2733_v24 = vmul.f32 %v4208_v57, %v2725_v19  ;;  %4239 = vtanh.f32 %v2712_v16  ;;  %v2705_v1 = vmul.f32 %v4222_v43, %v2575_v61 }
 0x6e9   :  { %v4226_v35 = vpop.eup %4225  ;;  %4241 = vrcp.f32 %v2680_v56 }
 0x6ea   :  { %v4228_v5 = vpop.eup %4227  ;;  %v2741_v15 = vadd.f32 %v4218_v30, %v2733_v24  ;;  %v2726_v18 = vsub.f32 %v5234_v3, %v4226_v35  ;;  %v2713_v32 = vadd.f32 %v2705_v1, %v2363_v47  ;;  %v2585_v3 = vadd.f32 %v5488_v10, %v5184_v51 }
 0x6eb   :  { %v4230_v9 = vpop.eup %4229  ;;  %v2682_v46 = vadd.f32 1.0, %v4228_v5 }
 0x6ec   :  { %2749 = vst [vmem:[#allocation14 + $0x8] sm:$0xff] %v2741_v15  ;;  %v2734_v41 = vmul.f32 %v4224_v37, %v2726_v18  ;;  %4243 = vtanh.f32 %v2713_v32  ;;  %v2706_v49 = vmul.f32 %v4230_v9, %v2580_v4 }
 0x6ed   :  { %v4232_v53 = vpop.eup %4231  ;;  %4245 = vrcp.f32 %v2681_v45 }
 0x6ee   :  { %v2742_v36 = vadd.f32 %v4226_v35, %v2734_v41  ;;  %v2727_v42 = vsub.f32 %v5240_v17, %v4232_v53  ;;  %v2714_v11 = vadd.f32 %v2706_v49, %v2366_v8  ;;  %v4234_v13 = vpop.eup %4233 }
 0x6ef   :  { %v4236_v28 = vpop.eup %4235 }
 0x6f0   :  { %2750 = vst [vmem:[#allocation14 + $0x10] sm:$0xff] %v2742_v36  ;;  %v2735_v0 = vmul.f32 %v4234_v13, %v2727_v42  ;;  %4247 = vtanh.f32 %v2714_v11  ;;  %v2683_v58 = vadd.f32 1.0, %v4236_v28 }
 0x6f1   :  { %v4238_v38 = vpop.eup %4237  ;;  %4249 = vrcp.f32 %v2682_v46 }
 0x6f2   :  { %v4240_v34 = vpop.eup %4239  ;;  %v2743_v14 = vadd.f32 %v4232_v53, %v2735_v0  ;;  %v2707_v48 = vmul.f32 %v4238_v38, %v2585_v3 }
 0x6f3   :  { %v2728_v17 = vsub.f32 %v5247_v27, %v4240_v34  ;;  %v4242_v12 = vpop.eup %4241 }
 0x6f4   :  { %2751 = vst [vmem:[#allocation14 + $0x18] sm:$0xff] %v2743_v14  ;;  %v2715_v39 = vadd.f32 %v2707_v48, %v2369_v7 }
 0x6f5   :  { %v2736_v40 = vmul.f32 %v4242_v12, %v2728_v17 }
 0x6f6   :  { %v4244_v57 = vpop.eup %4243  ;;  %4251 = vtanh.f32 %v2715_v39 }
 0x6f7   :  { %v4246_v51 = vpop.eup %4245  ;;  %v2744_v10 = vadd.f32 %v4240_v34, %v2736_v40  ;;  %v2729_v44 = vsub.f32 %v5254_v33, %v4244_v57  ;;  %4253 = vrcp.f32 %v2683_v58 }
 0x6f9   :  { %2752 = vst [vmem:[#allocation14 + $0x20] sm:$0xff] %v2744_v10  ;;  %v2737_v31 = vmul.f32 %v4246_v51, %v2729_v44 }
 0x6fa   :  { %v4248_v54 = vpop.eup %4247 }
 0x6fb   :  { %v2745_v22 = vadd.f32 %v4244_v57, %v2737_v31  ;;  %v2730_v62 = vsub.f32 %v5259_v23, %v4248_v54  ;;  %v4250_v26 = vpop.eup %4249 }
 0x6fd   :  { %2753 = vst [vmem:[#allocation14 + $0x28] sm:$0xff] %v2745_v22  ;;  %v2738_v27 = vmul.f32 %v4250_v26, %v2730_v62 }
 0x6ff   :  { %v2746_v20 = vadd.f32 %v4248_v54, %v2738_v27 }
 0x700   :  { %v4252_v6 = vpop.eup %4251 }
 0x701   :  { %2754 = vst [vmem:[#allocation14 + $0x30] sm:$0xff] %v2746_v20  ;;  %v2731_v60 = vsub.f32 %v5269_v63, %v4252_v6  ;;  %v4254_v55 = vpop.eup %4253 }
 0x703   :  { %v2739_v2 = vmul.f32 %v4254_v55, %v2731_v60 }
 0x705   :  { %v2747_v33 = vadd.f32 %v4252_v6, %v2739_v2 }
 0x707   :  { %2755 = vst [vmem:[#allocation14 + $0x38] sm:$0xff] %v2747_v33 }
 0x708   :  { %4443 = shalt.err (!%p4440_p4)
}
 0x709   :  { %s4444_s22 = scalar_lea.hbm %s5566_s10, 1024 }
 0x70a   :  { %p4445_p5 = scmp.ne.s32.totalorder %s5566_s10, %s4444_s22  ;;  %p4448_p6 = scmp.lt.u32.totalorder %s4444_s22, %s5566_s10 }
 0x70c   :  { %p4450_p7 = pnand %p4448_p6, %p4445_p5 }
 0x70e   :  { %4453 = shalt.err (!%p4450_p7)
}
 0x70f   :  { %2767 = dma.vmem_to_hbm [thread:$0]  %s2762_s9, 1024, %s5566_s10, [#allocation4], %s4466_s25, %s4466_s25, %s4467_s26  }
 0x710   :  { %4462 = dma.done.wait [#allocation4], 1024  }
 0x711   :  { %4463 = vsyncadd [#allocation4], 4294966272 }
 0x712   :  { %2771 = vsyncpa [#allocation3], 1 }
 0x713   :  { %2772 = vsyncpa [#allocation6], 1 }
 0x714   :  { %2773 = vsyncpa [#allocation9], 1 }
 0x715   :  { %2774 = vsyncpa [#allocation12], 1 }
 0x716   :  { %2775 = vsyncpa [#allocation4], 1 }

// kernel: tpu_custom_call.1
= control target key start
LH: loop header
LB: loop body
LE: loop exit
PB: predicated region body
PF: predicated region fallthrough
CT: control target
= control target key end

     0   :  { %15 = vsyncpa [#allocation3], 0  ;;  %s5556_s0 = inlined_call_operand.hbm [shape: f32[1,64,64], index: 0, kind: input, shape index: {}]   ;;  %s5557_s1 = inlined_call_operand.hbm [shape: f32[1,64,64], index: 1, kind: input, shape index: {}]   ;;  %s5558_s2 = inlined_call_operand.hbm [shape: f32[1,64,128], index: 2, kind: input, shape index: {}]   ;;  %s5559_s3 = inlined_call_operand.hbm [shape: f32[128,256], index: 3, kind: input, shape index: {}]   ;;  %s5560_s4 = inlined_call_operand.vmem [shape: f32[1,256], index: 4, kind: input, shape index: {}]   ;;  %s5561_s5 = inlined_call_operand.hbm [shape: f32[128,384], index: 5, kind: input, shape index: {}]   ;;  %s5562_s6 = inlined_call_operand.hbm [shape: f32[128,384], index: 6, kind: input, shape index: {}]   ;;  %s5563_s7 = inlined_call_operand.hbm [shape: f32[128,384], index: 7, kind: input, shape index: {}]   ;;  %s5564_s8 = inlined_call_operand.vmem [shape: f32[1,384], index: 8, kind: input, shape index: {}]   ;;  %s5565_s9 = inlined_call_operand.vmem [shape: f32[1,384], index: 9, kind: input, shape index: {}]   ;;  %s5566_s10 = inlined_call_operand.hbm [shape: f32[1,64,128], index: 10, kind: output, shape index: {}]  }
   0x1   :  { %16 = vsyncpa [#allocation6], 0 }
   0x2   :  { %17 = vsyncpa [#allocation9], 0 }
   0x3   :  { %18 = vsyncpa [#allocation12], 0 }
   0x4   :  { %19 = vsyncpa [#allocation4], 0  ;;  %s4464_s13 = smov [#allocation5]   ;;  %s4465_s15 = smov [#allocation8]  }
   0x5   :  { %s37_s14 = sshll.u32 %s4464_s13, 4  ;;  %s61_s16 = sshll.u32 %s4465_s15, 4  ;;  %s38_s14 = int_to_ptr.vmem [resolvable:$true] %s37_s14  ;;  %s4534_s16 = int_to_ptr.vmem [resolvable:$true] %s61_s16 }
   0x6   :  { %s4278_s19 = scalar_lea.hbm %s5557_s1, 1024 }
   0x7   :  { %p4279_p0 = scmp.ne.s32.totalorder %s5557_s1, %s4278_s19  ;;  %p4282_p1 = scmp.lt.u32.totalorder %s4278_s19, %s5557_s1 }
   0x9   :  { %p4284_p2 = pnand %p4282_p1, %p4279_p0 }
   0xb   :  { %4287 = shalt.err (!%p4284_p2)
}
   0xc   :  { %s4288_s24 = scalar_lea.vmem %s38_s14, 1024  ;;  %p4293_p4 = scmp.lt.s32.totalorder %s38_s14, %s38_s14 }
   0xd   :  { %p4289_p3 = scmp.ne.s32.totalorder %s38_s14, %s4288_s24  ;;  %p4294_p5 = scmp.lt.s32.totalorder %s4288_s24, %s4288_s24 }
   0xf   :  { %p4295_p6 = por %p4294_p5, %p4293_p4 }
  0x11   :  { %p4296_p7 = pnand %p4295_p6, %p4289_p3 }
  0x13   :  { %4299 = shalt.err (!%p4296_p7)
}
  0x14   :  { %s4466_s25 = smov 128   ;;  %s4467_s26 = smov 8  }
  0x15   :  { %43 = dma.hbm_to_vmem [thread:$0]  %s5557_s1, 1024, %s38_s14, [#allocation6], %s4466_s25, %s4466_s25, %s4467_s26  }
  0x16   :  { %s4300_s11 = scalar_lea.hbm %s5559_s3, 4096 }
  0x17   :  { %p4301_p8 = scmp.ne.s32.totalorder %s5559_s3, %s4300_s11  ;;  %p4304_p9 = scmp.lt.u32.totalorder %s4300_s11, %s5559_s3 }
  0x19   :  { %p4306_p10 = pnand %p4304_p9, %p4301_p8 }
  0x1b   :  { %4309 = shalt.err (!%p4306_p10)
}
  0x1c   :  { %s4310_s18 = scalar_lea.vmem %s4534_s16, 4096  ;;  %p4315_p12 = scmp.lt.s32.totalorder %s4534_s16, %s4534_s16 }
  0x1d   :  { %p4311_p11 = scmp.ne.s32.totalorder %s4534_s16, %s4310_s18  ;;  %p4316_p13 = scmp.lt.s32.totalorder %s4310_s18, %s4310_s18 }
  0x1f   :  { %p4317_p0 = por %p4316_p13, %p4315_p12 }
  0x21   :  { %p4318_p1 = pnand %p4317_p0, %p4311_p11 }
  0x23   :  { %4321 = shalt.err (!%p4318_p1)
}
  0x24   :  { %s4468_s1 = smov 256   ;;  %s4469_s14 = smov 16  }
  0x25   :  { %67 = dma.hbm_to_vmem [thread:$0]  %s5559_s3, 4096, %s4534_s16, [#allocation9], %s4468_s1, %s4468_s1, %s4469_s14  }
  0x26   :  { %s4470_s21 = smov [#allocation11]   ;;  %s4471_s23 = smov [#allocation2]  }
  0x27   :  { %s87_s22 = sshll.u32 %s4470_s21, 4  ;;  %s25_s24 = sshll.u32 %s4471_s23, 4  ;;  %s88_s22 = int_to_ptr.vmem [resolvable:$true] %s87_s22  ;;  %s4568_s24 = int_to_ptr.vmem [resolvable:$true] %s25_s24 }
  0x28   :  { %s4322_s29 = scalar_lea.hbm %s5562_s6, 6144 }
  0x29   :  { %p4323_p2 = scmp.ne.s32.totalorder %s5562_s6, %s4322_s29  ;;  %p4326_p3 = scmp.lt.u32.totalorder %s4322_s29, %s5562_s6 }
  0x2b   :  { %p4328_p4 = pnand %p4326_p3, %p4323_p2 }
  0x2d   :  { %4331 = shalt.err (!%p4328_p4)
}
  0x2e   :  { %s4332_s3 = scalar_lea.vmem %s88_s22, 6144  ;;  %p4337_p6 = scmp.lt.s32.totalorder %s88_s22, %s88_s22 }
  0x2f   :  { %p4333_p5 = scmp.ne.s32.totalorder %s88_s22, %s4332_s3  ;;  %p4338_p7 = scmp.lt.s32.totalorder %s4332_s3, %s4332_s3 }
  0x31   :  { %p4339_p8 = por %p4338_p7, %p4337_p6 }
  0x33   :  { %p4340_p9 = pnand %p4339_p8, %p4333_p5 }
  0x35   :  { %4343 = shalt.err (!%p4340_p9)
}
  0x36   :  { %s4472_s16 = smov 384   ;;  %s4473_s15 = smov 24  }
  0x37   :  { %93 = dma.hbm_to_vmem [thread:$0]  %s5562_s6, 6144, %s88_s22, [#allocation12], %s4472_s16, %s4472_s16, %s4473_s15  }
  0x38   :  { %s4344_s19 = scalar_lea.hbm %s5556_s0, 1024 }
  0x39   :  { %p4345_p10 = scmp.ne.s32.totalorder %s5556_s0, %s4344_s19  ;;  %p4348_p11 = scmp.lt.u32.totalorder %s4344_s19, %s5556_s0 }
  0x3b   :  { %p4350_p12 = pnand %p4348_p11, %p4345_p10 }
  0x3d   :  { %4353 = shalt.err (!%p4350_p12)
}
  0x3e   :  { %s4354_s28 = scalar_lea.vmem %s4568_s24, 1024  ;;  %p4359_p0 = scmp.lt.s32.totalorder %s4568_s24, %s4568_s24 }
  0x3f   :  { %p4355_p13 = scmp.ne.s32.totalorder %s4568_s24, %s4354_s28  ;;  %p4360_p1 = scmp.lt.s32.totalorder %s4354_s28, %s4354_s28 }
  0x41   :  { %p4361_p2 = por %p4360_p1, %p4359_p0 }
  0x43   :  { %p4362_p3 = pnand %p4361_p2, %p4355_p13 }
  0x45   :  { %4365 = shalt.err (!%p4362_p3)
}
  0x46   :  { %31 = dma.hbm_to_vmem [thread:$0]  %s5556_s0, 1024, %s4568_s24, [#allocation3], %s4466_s25, %s4466_s25, %s4467_s26  }
  0x47   :  { %s4474_s29 = smov [#allocation7]   ;;  %s4475_s11 = smov [#allocation10]  }
  0x48   :  { %s49_s30 = sshll.u32 %s4474_s29, 4  ;;  %s75_s12 = sshll.u32 %s4475_s11, 4  ;;  %s50_s30 = int_to_ptr.vmem [resolvable:$true] %s49_s30  ;;  %s4605_s12 = int_to_ptr.vmem [resolvable:$true] %s75_s12 }
  0x49   :  { %s4366_s17 = scalar_lea.hbm %s5558_s2, 1024 }
  0x4a   :  { %p4367_p4 = scmp.ne.s32.totalorder %s5558_s2, %s4366_s17  ;;  %p4370_p5 = scmp.lt.u32.totalorder %s4366_s17, %s5558_s2 }
  0x4c   :  { %p4372_p6 = pnand %p4370_p5, %p4367_p4 }
  0x4e   :  { %4375 = shalt.err (!%p4372_p6)
}
  0x4f   :  { %s4376_s0 = scalar_lea.vmem %s50_s30, 1024  ;;  %p4381_p8 = scmp.lt.s32.totalorder %s50_s30, %s50_s30 }
  0x50   :  { %p4377_p7 = scmp.ne.s32.totalorder %s50_s30, %s4376_s0  ;;  %p4382_p9 = scmp.lt.s32.totalorder %s4376_s0, %s4376_s0 }
  0x52   :  { %p4383_p10 = por %p4382_p9, %p4381_p8 }
  0x54   :  { %p4384_p11 = pnand %p4383_p10, %p4377_p7 }
  0x56   :  { %4387 = shalt.err (!%p4384_p11)
}
  0x57   :  { %55 = dma.hbm_to_vmem [thread:$0]  %s5558_s2, 1024, %s50_s30, [#allocation6], %s4466_s25, %s4466_s25, %s4467_s26  }
  0x58   :  { %s4388_s27 = scalar_lea.hbm %s5561_s5, 6144 }
  0x59   :  { %p4389_p12 = scmp.ne.s32.totalorder %s5561_s5, %s4388_s27  ;;  %p4392_p13 = scmp.lt.u32.totalorder %s4388_s27, %s5561_s5 }
  0x5b   :  { %p4394_p0 = pnand %p4392_p13, %p4389_p12 }
  0x5d   :  { %4397 = shalt.err (!%p4394_p0)
}
  0x5e   :  { %s4398_s11 = scalar_lea.vmem %s4605_s12, 6144  ;;  %p4403_p2 = scmp.lt.s32.totalorder %s4605_s12, %s4605_s12 }
  0x5f   :  { %p4399_p1 = scmp.ne.s32.totalorder %s4605_s12, %s4398_s11  ;;  %p4404_p3 = scmp.lt.s32.totalorder %s4398_s11, %s4398_s11 }
  0x61   :  { %p4405_p4 = por %p4404_p3, %p4403_p2 }
  0x63   :  { %p4406_p5 = pnand %p4405_p4, %p4399_p1 }
  0x65   :  { %4409 = shalt.err (!%p4406_p5)
}
  0x66   :  { %81 = dma.hbm_to_vmem [thread:$0]  %s5561_s5, 6144, %s4605_s12, [#allocation9], %s4472_s16, %s4472_s16, %s4473_s15  }
  0x67   :  { %s4476_s13 = smov [#allocation13]   ;;  %s4410_s1 = scalar_lea.hbm %s5563_s7, 6144 }
  0x68   :  { %s99_s3 = sshll.u32 %s4476_s13, 4  ;;  %p4411_p6 = scmp.ne.s32.totalorder %s5563_s7, %s4410_s1  ;;  %s100_s3 = int_to_ptr.vmem [resolvable:$true] %s99_s3 }
  0x69   :  { %p4414_p7 = scmp.lt.u32.totalorder %s4410_s1, %s5563_s7 }
  0x6b   :  { %p4416_p8 = pnand %p4414_p7, %p4411_p6 }
  0x6d   :  { %4419 = shalt.err (!%p4416_p8)
}
  0x6e   :  { %s4420_s20 = scalar_lea.vmem %s100_s3, 6144  ;;  %p4425_p10 = scmp.lt.s32.totalorder %s100_s3, %s100_s3 }
  0x6f   :  { %p4421_p9 = scmp.ne.s32.totalorder %s100_s3, %s4420_s20  ;;  %p4426_p11 = scmp.lt.s32.totalorder %s4420_s20, %s4420_s20 }
  0x71   :  { %p4427_p12 = por %p4426_p11, %p4425_p10 }
  0x73   :  { %p4428_p13 = pnand %p4427_p12, %p4421_p9 }
  0x75   :  { %4431 = shalt.err (!%p4428_p13)
}
  0x76   :  { %105 = dma.hbm_to_vmem [thread:$0]  %s5563_s7, 6144, %s100_s3, [#allocation12], %s4472_s16, %s4472_s16, %s4473_s15  }
  0x77   :  { %4454 = dma.done.wait [#allocation3], 1024  }
  0x78   :  { %4455 = vsyncadd [#allocation3], 4294966272 }
  0x79   :  { %4456 = dma.done.wait [#allocation6], 2048  }
  0x7a   :  { %4457 = vsyncadd [#allocation6], 4294965248 }
  0x7b   :  { %4458 = dma.done.wait [#allocation9], 10240  }
  0x7c   :  { %4459 = vsyncadd [#allocation9], 4294957056 }
  0x7d   :  { %4460 = dma.done.wait [#allocation12], 12288  }
  0x7e   :  { %4461 = vsyncadd [#allocation12], 4294955008  ;;  %v5567_v0 = vmov 0.0   ;;  %v148_v1 = vld [vmem:[#allocation8 + $0x8] sm:$0xff]  ;;  %v150_v2 = vld [vmem:[#allocation8 + $0x18] sm:$0xff]  ;;  %vm458_vm0 = vcmask 523264  }
  0x7f   :  { %409 = vmatprep.mubr.f32.mxu0 %v5567_v0  ;;  %v147_v3 = vld [vmem:[#allocation8] sm:$0xff]  ;;  %v4658_v4 = vpack.c.bf16 %v150_v2, %v148_v1  ;;  %v149_v5 = vld [vmem:[#allocation8 + $0x10] sm:$0xff]  ;;  %v152_v6 = vld [vmem:[#allocation8 + $0x28] sm:$0xff] }
  0x80   :  { %v154_v7 = vld [vmem:[#allocation8 + $0x38] sm:$0xff]  ;;  %v4660_v8 = vpack.c.bf16 %v149_v5, %v147_v3  ;;  %v151_v10 = vld [vmem:[#allocation8 + $0x20] sm:$0xff]  ;;  %v153_v11 = vld [vmem:[#allocation8 + $0x30] sm:$0xff] }
  0x81   :  { %v4662_v9 = vpack.c.bf16 %v154_v7, %v152_v6  ;;  %v156_v12 = vld [vmem:[#allocation8 + $0x48] sm:$0xff]  ;;  %3425 = vmatprep.subr.bf16.mxu0 %v4658_v4  ;;  %v158_v13 = vld [vmem:[#allocation8 + $0x58] sm:$0xff]  ;;  %v4666_v14 = vpack.c.bf16 %v153_v11, %v151_v10  ;;  %v155_v16 = vld [vmem:[#allocation8 + $0x40] sm:$0xff] }
  0x82   :  { %3427 = vmatpush1.bf16.msra.mxu0 %v4660_v8  ;;  %v4669_v15 = vpack.c.bf16 %v158_v13, %v156_v12  ;;  %v157_v17 = vld [vmem:[#allocation8 + $0x50] sm:$0xff]  ;;  %v160_v18 = vld [vmem:[#allocation8 + $0x68] sm:$0xff]  ;;  %v162_v19 = vld [vmem:[#allocation8 + $0x78] sm:$0xff] }
  0x83   :  { %3429 = vmatprep.subr.bf16.mxu0 %v4662_v9  ;;  %v4672_v20 = vpack.c.bf16 %v157_v17, %v155_v16  ;;  %v4675_v21 = vpack.c.bf16 %v162_v19, %v160_v18  ;;  %v159_v22 = vld [vmem:[#allocation8 + $0x60] sm:$0xff]  ;;  %v161_v23 = vld [vmem:[#allocation8 + $0x70] sm:$0xff]  ;;  %v164_v24 = vld [vmem:[#allocation8 + $0x88] sm:$0xff] }
  0x84   :  { %v166_v25 = vld [vmem:[#allocation8 + $0x98] sm:$0xff]  ;;  %v4678_v26 = vpack.c.bf16 %v161_v23, %v159_v22  ;;  %v163_v28 = vld [vmem:[#allocation8 + $0x80] sm:$0xff]  ;;  %v165_v29 = vld [vmem:[#allocation8 + $0x90] sm:$0xff] }
  0x85   :  { %v4681_v27 = vpack.c.bf16 %v166_v25, %v164_v24  ;;  %v168_v30 = vld [vmem:[#allocation8 + $0xa8] sm:$0xff]  ;;  %v170_v31 = vld [vmem:[#allocation8 + $0xb8] sm:$0xff]  ;;  %v4684_v32 = vpack.c.bf16 %v165_v29, %v163_v28  ;;  %v167_v34 = vld [vmem:[#allocation8 + $0xa0] sm:$0xff]  ;;  %v335_v28 = vlaneseq }
  0x86   :  { %3431 = vmatpush1.bf16.msra.mxu0 %v4666_v14  ;;  %v4687_v33 = vpack.c.bf16 %v170_v31, %v168_v30  ;;  %v169_v35 = vld [vmem:[#allocation8 + $0xb0] sm:$0xff]  ;;  %v172_v36 = vld [vmem:[#allocation8 + $0xc8] sm:$0xff]  ;;  %v174_v37 = vld [vmem:[#allocation8 + $0xd8] sm:$0xff] }
  0x87   :  { %3433 = vmatprep.subr.bf16.mxu0 %v4669_v15  ;;  %v4690_v38 = vpack.c.bf16 %v169_v35, %v167_v34  ;;  %v4693_v39 = vpack.c.bf16 %v174_v37, %v172_v36  ;;  %v171_v40 = vld [vmem:[#allocation8 + $0xc0] sm:$0xff]  ;;  %v173_v41 = vld [vmem:[#allocation8 + $0xd0] sm:$0xff]  ;;  %v176_v42 = vld [vmem:[#allocation8 + $0xe8] sm:$0xff]  ;;  %v4766_v29 = vshrl.u32 %v335_v28, 7 }
  0x88   :  { %v178_v43 = vld [vmem:[#allocation8 + $0xf8] sm:$0xff]  ;;  %v4696_v44 = vpack.c.bf16 %v173_v41, %v171_v40  ;;  %v175_v46 = vld [vmem:[#allocation8 + $0xe0] sm:$0xff]  ;;  %v177_v47 = vld [vmem:[#allocation8 + $0xf0] sm:$0xff] }
  0x89   :  { %v4699_v45 = vpack.c.bf16 %v178_v43, %v176_v42  ;;  %v4702_v48 = vpack.c.bf16 %v177_v47, %v175_v46  ;;  %v4706_v49 = vld [vmem:[#allocation7] sm:$0xff]  ;;  %v4710_v50 = vld [vmem:[#allocation7 + $0x8] sm:$0xff]  ;;  %v4714_v51 = vld [vmem:[#allocation7 + $0x10] sm:$0xff]  ;;  %v4769_v30 = vsub.s32 0, %v4766_v29  ;;  %v4775_v34 = vsub.s32 1, %v4766_v29 }
  0x8a   :  { %3435 = vmatpush1.bf16.msra.mxu0 %v4672_v20  ;;  %v4718_v52 = vld [vmem:[#allocation7 + $0x18] sm:$0xff]  ;;  %v4722_v53 = vld [vmem:[#allocation7 + $0x20] sm:$0xff]  ;;  %v4726_v54 = vld [vmem:[#allocation7 + $0x28] sm:$0xff] }
  0x8b   :  { %3437 = vmatprep.subr.bf16.mxu0 %v4675_v21  ;;  %v4730_v55 = vld [vmem:[#allocation7 + $0x30] sm:$0xff]  ;;  %v4734_v56 = vld [vmem:[#allocation7 + $0x38] sm:$0xff]  ;;  %v4738_v57 = vld [vmem:[#allocation2] sm:$0xff] }
  0x8c   :  { %3064 = vmatprep.mubr.msk.f32.mxu1 %vm458_vm0, %v4738_v57  ;;  %v228_v58 = vld [vmem:[#allocation11 + $0x8] sm:$0xff]  ;;  %v231_v59 = vld [vmem:[#allocation11 + $0x20] sm:$0xff]  ;;  %v230_v62 = vld [vmem:[#allocation11 + $0x18] sm:$0xff] }
  0x8d   :  { %v4742_v60 = vpack.c.bf16 %v231_v59, %v228_v58  ;;  %v227_v61 = vld [vmem:[#allocation11] sm:$0xff]  ;;  %v234_v1 = vld [vmem:[#allocation11 + $0x38] sm:$0xff]  ;;  %v237_v2 = vld [vmem:[#allocation11 + $0x50] sm:$0xff] }
  0x8e   :  { %3439 = vmatpush1.bf16.msra.mxu0 %v4678_v26  ;;  %v4744_v63 = vpack.c.bf16 %v230_v62, %v227_v61  ;;  %v4747_v3 = vpack.c.bf16 %v237_v2, %v234_v1  ;;  %v233_v5 = vld [vmem:[#allocation11 + $0x30] sm:$0xff]  ;;  %v236_v6 = vld [vmem:[#allocation11 + $0x48] sm:$0xff]  ;;  %v243_v11 = vld [vmem:[#allocation11 + $0x80] sm:$0xff] }
  0x8f   :  { %3441 = vmatprep.subr.bf16.mxu0 %v4681_v27  ;;  %v4750_v7 = vpack.c.bf16 %v236_v6, %v233_v5  ;;  %v240_v10 = vld [vmem:[#allocation11 + $0x68] sm:$0xff]  ;;  %v239_v13 = vld [vmem:[#allocation11 + $0x60] sm:$0xff]  ;;  %v242_v16 = vld [vmem:[#allocation11 + $0x78] sm:$0xff] }
  0x90   :  { %v4753_v12 = vpack.c.bf16 %v243_v11, %v240_v10  ;;  %v246_v17 = vld [vmem:[#allocation11 + $0x98] sm:$0xff]  ;;  %v249_v18 = vld [vmem:[#allocation11 + $0xb0] sm:$0xff]  ;;  %v4756_v19 = vpack.c.bf16 %v242_v16, %v239_v13  ;;  %v248_v24 = vld [vmem:[#allocation11 + $0xa8] sm:$0xff] }
  0x91   :  { %v4759_v22 = vpack.c.bf16 %v249_v18, %v246_v17  ;;  %v245_v23 = vld [vmem:[#allocation11 + $0x90] sm:$0xff]  ;;  %v323_v31 = vld [vmem:[%s5560_s4] sm:$0x3] }
  0x92   :  { %3443 = vmatpush1.bf16.msra.mxu0 %v4684_v32  ;;  %v4762_v25 = vpack.c.bf16 %v248_v24, %v245_v23  ;;  %v4778_v36 = vrot.slane %v323_v31, %v4769_v30  ;;  %v4781_v40 = vrot.slane %v323_v31, %v4775_v34 }
  0x93   :  { %3445 = vmatprep.subr.bf16.mxu0 %v4687_v33  ;;  %5638 = vst [vmem:[#allocation20_spill] sm:$0xff] %v4759_v22 }
  0x94   :  { %5639 = vst [vmem:[#allocation21_spill] sm:$0xff] %v4762_v25  ;;  %5640 = vst [vmem:[#allocation22_spill] sm:$0xff] %v4778_v36 }
  0x95   :  { %5641 = vst [vmem:[#allocation23_spill] sm:$0xff] %v4781_v40 }
  0x96   :  { %3447 = vmatpush1.bf16.msra.mxu0 %v4690_v38 }
  0x97   :  { %3449 = vmatprep.subr.bf16.mxu0 %v4693_v39 }
  0x9a   :  { %3451 = vmatpush1.bf16.msra.mxu0 %v4696_v44 }
  0x9b   :  { %3453 = vmatprep.subr.bf16.mxu0 %v4699_v45 }
  0x9e   :  { %3455 = vmatpush1.bf16.msra.mxu0 %v4702_v48 }
  0x9f   :  { %3489 = vmatprep.subr.bf16.mxu0 %v4742_v60 }
  0xa1   :  { %410 = vmatmul.mubr.f32.vlgmr.msra.gmra.mrb[0].mxu0 %v4706_v49 }
  0xa2   :  { %415 = vmatprep.mubr.f32.mxu0 %v5567_v0  ;;  %3491 = vmatpush1.bf16.msra.mxu0 %v4744_v63 }
  0xa3   :  { %3493 = vmatprep.subr.bf16.mxu0 %v4747_v3 }
  0xa5   :  { %416 = vmatmul.mubr.f32.gmra.mrb[2].mxu0 %v4710_v50 }
  0xa6   :  { %421 = vmatprep.mubr.f32.mxu0 %v5567_v0  ;;  %3495 = vmatpush1.bf16.msra.mxu0 %v4750_v7 }
  0xa7   :  { %3497 = vmatprep.subr.bf16.mxu0 %v4753_v12 }
  0xa9   :  { %422 = vmatmul.mubr.f32.gmra.mrb[4].mxu0 %v4714_v51 }
  0xaa   :  { %427 = vmatprep.mubr.f32.mxu0 %v5567_v0  ;;  %3499 = vmatpush1.bf16.msra.mxu0 %v4756_v19 }
  0xab   :  { %3501 = vmatprep.subr.bf16.mxu0 %v4759_v22 }
  0xad   :  { %428 = vmatmul.mubr.f32.gmra.mrb[6].mxu0 %v4718_v52 }
  0xae   :  { %433 = vmatprep.mubr.f32.mxu0 %v5567_v0  ;;  %3503 = vmatpush1.bf16.msra.mxu0 %v4762_v25  ;;  %v208_v25 = vld [vmem:[#allocation10 + $0xe8] sm:$0xff] }
  0xb1   :  { %434 = vmatmul.mubr.f32.gmra.mrb[8].mxu0 %v4722_v53 }
  0xb2   :  { %439 = vmatprep.mubr.f32.mxu0 %v5567_v0 }
  0xb5   :  { %440 = vmatmul.mubr.f32.gmra.mrb[10].mxu0 %v4726_v54 }
  0xb6   :  { %445 = vmatprep.mubr.f32.mxu0 %v5567_v0 }
  0xb9   :  { %446 = vmatmul.mubr.f32.gmra.mrb[12].mxu0 %v4730_v55 }
  0xba   :  { %451 = vmatprep.mubr.f32.mxu0 %v5567_v0 }
  0xbd   :  { %452 = vmatmul.mubr.f32.gmra.mrb[14].mxu0 %v4734_v56 }
  0xbe   :  { %781 = vmatprep.mubr.f32.mxu0 %v5567_v0 }
 0x174   :  { %v411_v35 = vpop.f32.mrb[0].mxu0 }
 0x175   :  { %v413_v37 = vpop.f32.mrb[1].mxu0  ;;  %v412_v42 = vadd.f32 %v411_v35, %v4778_v36 }
 0x176   :  { %v414_v47 = vadd.f32 %v413_v37, %v4781_v40 }
 0x178   :  { %v417_v41 = vpop.f32.mrb[2].mxu0 }
 0x179   :  { %v418_v43 = vadd.f32 %v417_v41, %v4778_v36  ;;  %v419_v46 = vpop.f32.mrb[3].mxu0 }
 0x17a   :  { %v420_v58 = vadd.f32 %v419_v46, %v4781_v40 }
 0x17b   :  { %v3456_v59 = vpack.c.bf16 %v418_v43, %v412_v42 }
 0x17c   :  { %v3472_v61 = vpack.c.bf16 %v420_v58, %v414_v47  ;;  %v423_v62 = vpop.f32.mrb[4].mxu0 }
 0x17d   :  { %v425_v1 = vpop.f32.mrb[5].mxu0  ;;  %3457 = vmatprep.subr.bf16.mxu1 %v3456_v59  ;;  %v424_v5 = vadd.f32 %v423_v62, %v4778_v36 }
 0x17e   :  { %3459 = vmatpush3.bf16.msra.mxu1 %v3456_v59  ;;  %v426_v11 = vadd.f32 %v425_v1, %v4781_v40 }
 0x180   :  { %v429_v2 = vpop.f32.mrb[6].mxu0 }
 0x181   :  { %v430_v6 = vadd.f32 %v429_v2, %v4778_v36  ;;  %v431_v10 = vpop.f32.mrb[7].mxu0 }
 0x182   :  { %v432_v13 = vadd.f32 %v431_v10, %v4781_v40 }
 0x183   :  { %v3460_v16 = vpack.c.bf16 %v430_v6, %v424_v5 }
 0x184   :  { %v3476_v17 = vpack.c.bf16 %v432_v13, %v426_v11  ;;  %v435_v18 = vpop.f32.mrb[8].mxu0  ;;  %v132_v11 = vld [vmem:[#allocation2 + $0x8] sm:$0xff]  ;;  %v133_v13 = vld [vmem:[#allocation2 + $0x10] sm:$0xff] }
 0x185   :  { %v437_v23 = vpop.f32.mrb[9].mxu0  ;;  %3461 = vmatprep.subr.bf16.mxu1 %v3460_v16  ;;  %v436_v28 = vadd.f32 %v435_v18, %v4778_v36  ;;  %v135_v18 = vld [vmem:[#allocation2 + $0x20] sm:$0xff] }
 0x186   :  { %3463 = vmatpush3.bf16.msra.mxu1 %v3460_v16  ;;  %v438_v37 = vadd.f32 %v437_v23, %v4781_v40  ;;  %v134_v16 = vld [vmem:[#allocation2 + $0x18] sm:$0xff]  ;;  %v136_v23 = vld [vmem:[#allocation2 + $0x28] sm:$0xff] }
 0x188   :  { %v441_v24 = vpop.f32.mrb[10].mxu0 }
 0x189   :  { %v442_v31 = vadd.f32 %v441_v24, %v4778_v36  ;;  %v443_v35 = vpop.f32.mrb[11].mxu0  ;;  %v137_v24 = vld [vmem:[#allocation2 + $0x30] sm:$0xff] }
 0x18a   :  { %v444_v41 = vadd.f32 %v443_v35, %v4781_v40  ;;  %v139_v35 = vld [vmem:[#allocation5] sm:$0xff] }
 0x18b   :  { %v3464_v42 = vpack.c.bf16 %v442_v31, %v436_v28  ;;  %v229_v28 = vld [vmem:[#allocation11 + $0x10] sm:$0xff]  ;;  %v232_v31 = vld [vmem:[#allocation11 + $0x28] sm:$0xff] }
 0x18c   :  { %v3480_v43 = vpack.c.bf16 %v444_v41, %v438_v37  ;;  %v447_v46 = vpop.f32.mrb[12].mxu0  ;;  %v4805_v37 = vpack.c.bf16 %v232_v31, %v229_v28  ;;  %v235_v41 = vld [vmem:[#allocation11 + $0x40] sm:$0xff]  ;;  %v256_v28 = vld [vmem:[#allocation11 + $0xe8] sm:$0xff] }
 0x18d   :  { %v449_v47 = vpop.f32.mrb[13].mxu0  ;;  %3465 = vmatprep.subr.bf16.mxu1 %v3464_v42  ;;  %v448_v59 = vadd.f32 %v447_v46, %v4778_v36  ;;  %v141_v46 = vld [vmem:[#allocation5 + $0x10] sm:$0xff]  ;;  %v251_v31 = vld [vmem:[#allocation11 + $0xc0] sm:$0xff] }
 0x18e   :  { %3467 = vmatpush3.bf16.msra.mxu1 %v3464_v42  ;;  %v450_v2 = vadd.f32 %v449_v47, %v4781_v40  ;;  %5642 = vst [vmem:[#allocation24_spill] sm:$0xff] %v4805_v37  ;;  %v238_v42 = vld [vmem:[#allocation11 + $0x58] sm:$0xff] }
 0x18f   :  { %v4810_v47 = vpack.c.bf16 %v238_v42, %v235_v41  ;;  %v258_v42 = vld [vmem:[#allocation11 + $0xf8] sm:$0xff] }
 0x190   :  { %v453_v58 = vpop.f32.mrb[14].mxu0 }
 0x191   :  { %v454_v62 = vadd.f32 %v453_v58, %v4778_v36  ;;  %v455_v1 = vpop.f32.mrb[15].mxu0  ;;  %5643 = vst [vmem:[#allocation25_spill] sm:$0xff] %v4810_v47  ;;  %v244_v58 = vld [vmem:[#allocation11 + $0x88] sm:$0xff] }
 0x192   :  { %v456_v5 = vadd.f32 %v455_v1, %v4781_v40  ;;  %v185_v40 = vld [vmem:[#allocation10 + $0x30] sm:$0xff]  ;;  %v188_v36 = vld [vmem:[#allocation10 + $0x48] sm:$0xff] }
 0x193   :  { %v3468_v6 = vpack.c.bf16 %v454_v62, %v448_v59  ;;  %v142_v59 = vld [vmem:[#allocation5 + $0x18] sm:$0xff]  ;;  %v143_v62 = vld [vmem:[#allocation5 + $0x20] sm:$0xff] }
 0x194   :  { %v3484_v10 = vpack.c.bf16 %v456_v5, %v450_v2  ;;  %v247_v2 = vld [vmem:[#allocation11 + $0xa0] sm:$0xff]  ;;  %v250_v5 = vld [vmem:[#allocation11 + $0xb8] sm:$0xff] }
 0x195   :  { %3469 = vmatprep.subr.bf16.mxu1 %v3468_v6 }
 0x196   :  { %3471 = vmatpush3.bf16.msra.mxu1 %v3468_v6  ;;  %v144_v6 = vld [vmem:[#allocation5 + $0x28] sm:$0xff] }
 0x197   :  { %3473 = vmatprep.subr.bf16.mxu1 %v3472_v61 }
 0x199   :  { %3065 = vmatmul.mubr.msk.f32.vlgmr.msra.gmra.mrb[0].mxu1 %vm458_vm0, %v132_v11  ;;  %v4822_v11 = vpack.c.bf16 %v250_v5, %v247_v2 }
 0x19a   :  { %3475 = vmatpush3.bf16.msra.mxu1 %v3472_v61  ;;  %3067 = vmatprep.mubr.msk.f32.mxu1 %vm458_vm0, %v133_v13  ;;  %v138_v61 = vld [vmem:[#allocation2 + $0x38] sm:$0xff] }
 0x19b   :  { %3477 = vmatprep.subr.bf16.mxu1 %v3476_v17  ;;  %5645 = vst [vmem:[#allocation27_spill] sm:$0xff] %v4822_v11  ;;  %v146_v13 = vld [vmem:[#allocation5 + $0x38] sm:$0xff] }
 0x19d   :  { %3068 = vmatmul.mubr.msk.f32.gmra.mrb[2].mxu1 %vm458_vm0, %v134_v16  ;;  %v252_v16 = vld [vmem:[#allocation11 + $0xc8] sm:$0xff] }
 0x19e   :  { %3479 = vmatpush3.bf16.msra.mxu1 %v3476_v17  ;;  %3070 = vmatprep.mubr.msk.f32.mxu1 %vm458_vm0, %v135_v18  ;;  %v140_v17 = vld [vmem:[#allocation5 + $0x8] sm:$0xff]  ;;  %v255_v18 = vld [vmem:[#allocation11 + $0xe0] sm:$0xff] }
 0x19f   :  { %3481 = vmatprep.subr.bf16.mxu1 %v3480_v43 }
 0x1a1   :  { %3071 = vmatmul.mubr.msk.f32.gmra.mrb[4].mxu1 %vm458_vm0, %v136_v23  ;;  %v253_v23 = vld [vmem:[#allocation11 + $0xd0] sm:$0xff] }
 0x1a2   :  { %3483 = vmatpush3.bf16.msra.mxu1 %v3480_v43  ;;  %3073 = vmatprep.mubr.msk.f32.mxu1 %vm458_vm0, %v137_v24  ;;  %v241_v43 = vld [vmem:[#allocation11 + $0x70] sm:$0xff]  ;;  %v4830_v24 = vpack.c.bf16 %v255_v18, %v252_v16  ;;  %v268_v18 = vld [vmem:[#allocation11 + $0x148] sm:$0xff] }
 0x1a3   :  { %3485 = vmatprep.subr.bf16.mxu1 %v3484_v10  ;;  %v4816_v1 = vpack.c.bf16 %v244_v58, %v241_v43  ;;  %v262_v58 = vld [vmem:[#allocation11 + $0x118] sm:$0xff] }
 0x1a4   :  { %5646 = vst [vmem:[#allocation28_spill] sm:$0xff] %v4830_v24  ;;  %3505 = vmatprep.subr.bf16.mxu0 %v4830_v24  ;;  %v198_v24 = vld [vmem:[#allocation10 + $0x98] sm:$0xff] }
 0x1a5   :  { %3074 = vmatmul.mubr.msk.f32.gmra.mrb[6].mxu1 %vm458_vm0, %v138_v61  ;;  %5644 = vst [vmem:[#allocation26_spill] sm:$0xff] %v4816_v1  ;;  %v254_v61 = vld [vmem:[#allocation11 + $0xd8] sm:$0xff] }
 0x1a6   :  { %3487 = vmatpush3.bf16.msra.mxu1 %v3484_v10  ;;  %3092 = vmatprep.mubr.msk.f32.mxu1 %vm458_vm0, %v139_v35  ;;  %v145_v10 = vld [vmem:[#allocation5 + $0x30] sm:$0xff]  ;;  %v4832_v35 = vpack.c.bf16 %v256_v28, %v253_v23  ;;  %v4834_v41 = vpack.c.bf16 %v254_v61, %v251_v31  ;;  %v263_v23 = vld [vmem:[#allocation11 + $0x120] sm:$0xff]  ;;  %v266_v28 = vld [vmem:[#allocation11 + $0x138] sm:$0xff] }
 0x1a7   :  { %3521 = vmatprep.subr.bf16.mxu1 %v4805_v37  ;;  %v4854_v61 = vpack.c.bf16 %v266_v28, %v263_v23  ;;  %v183_v23 = vld [vmem:[#allocation10 + $0x20] sm:$0xff]  ;;  %v181_v28 = vld [vmem:[#allocation10 + $0x10] sm:$0xff] }
 0x1a8   :  { %5647 = vst [vmem:[#allocation29_spill] sm:$0xff] %v4832_v35  ;;  %5648 = vst [vmem:[#allocation30_spill] sm:$0xff] %v4834_v41  ;;  %3507 = vmatpush1.bf16.msra.mxu0 %v4834_v41  ;;  %v4899_v41 = vpack.c.bf16 %v188_v36, %v185_v40  ;;  %v201_v36 = vld [vmem:[#allocation10 + $0xb0] sm:$0xff]  ;;  %v199_v40 = vld [vmem:[#allocation10 + $0xa0] sm:$0xff] }
 0x1a9   :  { %3093 = vmatmul.mubr.msk.f32.vlgmr.msra.gmra.mrb[8].mxu1 %vm458_vm0, %v140_v17  ;;  %v261_v17 = vld [vmem:[#allocation11 + $0x110] sm:$0xff]  ;;  %5654 = vst [vmem:[#allocation36_spill] sm:$0xff] %v4854_v61 }
 0x1aa   :  { %3095 = vmatprep.mubr.msk.f32.mxu1 %vm458_vm0, %v141_v46  ;;  %3523 = vmatpush3.bf16.msra.mxu1 %v4805_v37  ;;  %v259_v46 = vld [vmem:[#allocation11 + $0x100] sm:$0xff]  ;;  %v4840_v43 = vpack.c.bf16 %v261_v17, %v258_v42  ;;  %v270_v42 = vld [vmem:[#allocation11 + $0x158] sm:$0xff]  ;;  %v273_v17 = vld [vmem:[#allocation11 + $0x170] sm:$0xff]  ;;  %5663 = vst [vmem:[#allocation45_spill] sm:$0xff] %v4899_v41 }
 0x1ab   :  { %3525 = vmatprep.subr.bf16.mxu1 %v4810_v47  ;;  %v4842_v2 = vpack.c.bf16 %v262_v58, %v259_v46  ;;  %v271_v46 = vld [vmem:[#allocation11 + $0x160] sm:$0xff]  ;;  %v4860_v58 = vpack.c.bf16 %v273_v17, %v270_v42  ;;  %v184_v17 = vld [vmem:[#allocation10 + $0x28] sm:$0xff] }
 0x1ac   :  { %5649 = vst [vmem:[#allocation31_spill] sm:$0xff] %v4840_v43  ;;  %3509 = vmatprep.subr.bf16.mxu0 %v4840_v43  ;;  %v4872_v0 = vpack.c.bf16 %v184_v17, %v181_v28  ;;  %v182_v28 = vld [vmem:[#allocation10 + $0x18] sm:$0xff]  ;;  %v196_v43 = vld [vmem:[#allocation10 + $0x88] sm:$0xff] }
 0x1ad   :  { %3096 = vmatmul.mubr.msk.f32.gmra.mrb[10].mxu1 %vm458_vm0, %v142_v59  ;;  %v257_v59 = vld [vmem:[#allocation11 + $0xf0] sm:$0xff]  ;;  %5650 = vst [vmem:[#allocation32_spill] sm:$0xff] %v4842_v2  ;;  %5655 = vst [vmem:[#allocation37_spill] sm:$0xff] %v4860_v58 }
 0x1ae   :  { %3098 = vmatprep.mubr.msk.f32.mxu1 %vm458_vm0, %v143_v62  ;;  %3527 = vmatpush3.bf16.msra.mxu1 %v4810_v47  ;;  %v260_v62 = vld [vmem:[#allocation11 + $0x108] sm:$0xff]  ;;  %5659 = vst [vmem:[#allocation41_spill] sm:$0xff] %v4872_v0 }
 0x1af   :  { %3529 = vmatprep.subr.bf16.mxu1 %v4816_v1  ;;  %v4844_v5 = vpack.c.bf16 %v260_v62, %v257_v59  ;;  %v274_v59 = vld [vmem:[#allocation11 + $0x178] sm:$0xff]  ;;  %v269_v62 = vld [vmem:[#allocation11 + $0x150] sm:$0xff] }
 0x1b1   :  { %3099 = vmatmul.mubr.msk.f32.gmra.mrb[12].mxu1 %vm458_vm0, %v144_v6  ;;  %5651 = vst [vmem:[#allocation33_spill] sm:$0xff] %v4844_v5  ;;  %3511 = vmatpush1.bf16.msra.mxu0 %v4844_v5  ;;  %v264_v6 = vld [vmem:[#allocation11 + $0x128] sm:$0xff]  ;;  %v193_v5 = vld [vmem:[#allocation10 + $0x70] sm:$0xff] }
 0x1b2   :  { %3101 = vmatprep.mubr.msk.f32.mxu1 %vm458_vm0, %v145_v10  ;;  %3531 = vmatpush3.bf16.msra.mxu1 %v4816_v1  ;;  %v267_v10 = vld [vmem:[#allocation11 + $0x140] sm:$0xff]  ;;  %v190_v1 = vld [vmem:[#allocation10 + $0x58] sm:$0xff] }
 0x1b3   :  { %3533 = vmatprep.subr.bf16.mxu1 %v4822_v11  ;;  %v4850_v16 = vpack.c.bf16 %v267_v10, %v264_v6  ;;  %v272_v6 = vld [vmem:[#allocation11 + $0x168] sm:$0xff]  ;;  %v4862_v10 = vpack.c.bf16 %v274_v59, %v271_v46 }
 0x1b5   :  { %3102 = vmatmul.mubr.msk.f32.gmra.mrb[14].mxu1 %vm458_vm0, %v146_v13  ;;  %v265_v13 = vld [vmem:[#allocation11 + $0x130] sm:$0xff]  ;;  %5652 = vst [vmem:[#allocation34_spill] sm:$0xff] %v4850_v16  ;;  %3513 = vmatprep.subr.bf16.mxu0 %v4850_v16  ;;  %5656 = vst [vmem:[#allocation38_spill] sm:$0xff] %v4862_v10  ;;  %v195_v16 = vld [vmem:[#allocation10 + $0x80] sm:$0xff] }
 0x1b6   :  { %3535 = vmatpush3.bf16.msra.mxu1 %v4822_v11  ;;  %v4852_v31 = vpack.c.bf16 %v268_v18, %v265_v13  ;;  %3515 = vmatpush1.bf16.msra.mxu0 %v4854_v61  ;;  %v4864_v13 = vpack.c.bf16 %v272_v6, %v269_v62  ;;  %v180_v18 = vld [vmem:[#allocation10 + $0x8] sm:$0xff]  ;;  %v187_v11 = vld [vmem:[#allocation10 + $0x40] sm:$0xff] }
 0x1b7   :  { %3537 = vmatprep.subr.bf16.mxu1 %v4832_v35  ;;  %3517 = vmatprep.subr.bf16.mxu0 %v4860_v58  ;;  %v4870_v42 = vpack.c.bf16 %v183_v23, %v180_v18  ;;  %v179_v23 = vld [vmem:[#allocation10] sm:$0xff]  ;;  %v4896_v58 = vpack.c.bf16 %v190_v1, %v187_v11  ;;  %v192_v61 = vld [vmem:[#allocation10 + $0x68] sm:$0xff] }
 0x1b8   :  { %5653 = vst [vmem:[#allocation35_spill] sm:$0xff] %v4852_v31  ;;  %5657 = vst [vmem:[#allocation39_spill] sm:$0xff] %v4864_v13  ;;  %v4892_v47 = vpack.c.bf16 %v182_v28, %v179_v23  ;;  %v5664_v28 = vmov 0.0   ;;  %v4905_v11 = vpack.c.bf16 %v195_v16, %v192_v61  ;;  %v197_v16 = vld [vmem:[#allocation10 + $0x90] sm:$0xff]  ;;  %v200_v61 = vld [vmem:[#allocation10 + $0xa8] sm:$0xff] }
 0x1b9   :  { %5658 = vst [vmem:[#allocation40_spill] sm:$0xff] %v4870_v42  ;;  %5662 = vst [vmem:[#allocation44_spill] sm:$0xff] %v4896_v58 }
 0x1ba   :  { %3539 = vmatpush3.bf16.msra.mxu1 %v4832_v35  ;;  %3519 = vmatpush1.bf16.msra.mxu0 %v4864_v13  ;;  %v189_v35 = vld [vmem:[#allocation10 + $0x50] sm:$0xff]  ;;  %5660 = vst [vmem:[#allocation42_spill] sm:$0xff] %v4892_v47  ;;  %5665 = vst [vmem:[#allocation46_spill] sm:$0xff] %v4905_v11 }
 0x1bb   :  { %3541 = vmatprep.subr.bf16.mxu1 %v4842_v2  ;;  %3553 = vmatprep.subr.bf16.mxu0 %v4870_v42 }
 0x1be   :  { %3543 = vmatpush3.bf16.msra.mxu1 %v4842_v2  ;;  %v186_v2 = vld [vmem:[#allocation10 + $0x38] sm:$0xff] }
 0x1bf   :  { %3545 = vmatprep.subr.bf16.mxu1 %v4852_v31  ;;  %v4894_v13 = vpack.c.bf16 %v189_v35, %v186_v2  ;;  %v191_v35 = vld [vmem:[#allocation10 + $0x60] sm:$0xff]  ;;  %v194_v2 = vld [vmem:[#allocation10 + $0x78] sm:$0xff] }
 0x1c1   :  { %5661 = vst [vmem:[#allocation43_spill] sm:$0xff] %v4894_v13 }
 0x1c2   :  { %3547 = vmatpush3.bf16.msra.mxu1 %v4852_v31 }
 0x1c3   :  { %3549 = vmatprep.subr.bf16.mxu1 %v4862_v10 }
 0x1c6   :  { %3551 = vmatpush3.bf16.msra.mxu1 %v4862_v10 }
 0x1c7   :  { %3585 = vmatprep.subr.bf16.mxu1 %v4872_v0 }
 0x26c   :  { %v4876_v46 = vpop.f32.mrb[0].mxu1 }
 0x26d   :  { %v4878_v59 = vpop.f32.mrb[1].mxu1 }
 0x270   :  { %v4880_v62 = vpop.f32.mrb[2].mxu1 }
 0x271   :  { %v4882_v6 = vpop.f32.mrb[3].mxu1 }
 0x274   :  { %v4884_v31 = vpop.f32.mrb[4].mxu1 }
 0x275   :  { %v4886_v10 = vpop.f32.mrb[5].mxu1 }
 0x278   :  { %v4888_v18 = vpop.f32.mrb[6].mxu1 }
 0x279   :  { %v4890_v17 = vpop.f32.mrb[7].mxu1 }
 0x27c   :  { %v3094_v37 = vpop.f32.mrb[8].mxu1 }
 0x27d   :  { %v678_v42 = vpop.f32.mrb[9].mxu1 }
 0x27e   :  { %782 = vmatmul.mubr.f32.vlgmr.msra.gmra.mrb[16].mxu0 %v678_v42  ;;  %3136 = vmatprep.mubr.f32.mxu1 %v678_v42  ;;  %v4907_v42 = vpack.c.bf16 %v196_v43, %v193_v5 }
 0x27f   :  { %3137 = vmatmul.mubr.f32.vlgmr.msra.gmra.mrb[16].mxu1 %v3094_v37  ;;  %3555 = vmatpush1.bf16.msra.mxu0 %v4892_v47  ;;  %v202_v47 = vld [vmem:[#allocation10 + $0xb8] sm:$0xff] }
 0x280   :  { %3587 = vmatpush3.bf16.msra.mxu1 %v4872_v0  ;;  %v3097_v23 = vpop.f32.mrb[10].mxu1  ;;  %787 = vmatprep.mubr.f32.mxu0 %v5664_v28  ;;  %5666 = vst [vmem:[#allocation47_spill] sm:$0xff] %v4907_v42  ;;  %v4910_v0 = vpack.c.bf16 %v194_v2, %v191_v35  ;;  %v4918_v5 = vpack.c.bf16 %v202_v47, %v199_v40  ;;  %v204_v35 = vld [vmem:[#allocation10 + $0xc8] sm:$0xff]  ;;  %v207_v2 = vld [vmem:[#allocation10 + $0xe0] sm:$0xff]  ;;  %v206_v47 = vld [vmem:[#allocation10 + $0xd8] sm:$0xff] }
 0x281   :  { %v688_v1 = vpop.f32.mrb[11].mxu1  ;;  %3557 = vmatprep.subr.bf16.mxu0 %v4894_v13  ;;  %3589 = vmatprep.subr.bf16.mxu1 %v4896_v58  ;;  %v210_v40 = vld [vmem:[#allocation10 + $0xf8] sm:$0xff] }
 0x282   :  { %788 = vmatmul.mubr.f32.gmra.mrb[18].mxu0 %v3094_v37  ;;  %3139 = vmatprep.mubr.f32.mxu1 %v688_v1  ;;  %5667 = vst [vmem:[#allocation48_spill] sm:$0xff] %v4910_v0  ;;  %v4916_v37 = vpack.c.bf16 %v201_v36, %v198_v24  ;;  %5669 = vst [vmem:[#allocation50_spill] sm:$0xff] %v4918_v5  ;;  %v203_v24 = vld [vmem:[#allocation10 + $0xc0] sm:$0xff] }
 0x283   :  { %3140 = vmatmul.mubr.f32.gmra.mrb[18].mxu1 %v3097_v23  ;;  %3559 = vmatpush1.bf16.msra.mxu0 %v4899_v41  ;;  %v4921_v41 = vpack.c.bf16 %v200_v61, %v197_v16  ;;  %v213_v16 = vld [vmem:[#allocation10 + $0x110] sm:$0xff]  ;;  %v4935_v22 = vpack.c.bf16 %v206_v47, %v203_v24  ;;  %v220_v47 = vld [vmem:[#allocation10 + $0x148] sm:$0xff] }
 0x284   :  { %3591 = vmatpush3.bf16.msra.mxu1 %v4896_v58  ;;  %v3100_v13 = vpop.f32.mrb[12].mxu1  ;;  %793 = vmatprep.mubr.f32.mxu0 %v5664_v28  ;;  %5668 = vst [vmem:[#allocation49_spill] sm:$0xff] %v4916_v37  ;;  %v205_v58 = vld [vmem:[#allocation10 + $0xd0] sm:$0xff] }
 0x285   :  { %v698_v43 = vpop.f32.mrb[13].mxu1  ;;  %3561 = vmatprep.subr.bf16.mxu0 %v4905_v11  ;;  %3593 = vmatprep.subr.bf16.mxu1 %v4907_v42  ;;  %5670 = vst [vmem:[#allocation51_spill] sm:$0xff] %v4921_v41  ;;  %v4931_v61 = vpack.c.bf16 %v208_v25, %v205_v58  ;;  %5672 = vst [vmem:[#allocation53_spill] sm:$0xff] %v4935_v22  ;;  %v216_v58 = vld [vmem:[#allocation10 + $0x128] sm:$0xff]  ;;  %v217_v24 = vld [vmem:[#allocation10 + $0x130] sm:$0xff] }
 0x286   :  { %794 = vmatmul.mubr.f32.gmra.mrb[20].mxu0 %v688_v1  ;;  %3142 = vmatprep.mubr.f32.mxu1 %v698_v43  ;;  %v4929_v1 = vpack.c.bf16 %v207_v2, %v204_v35  ;;  %v4939_v35 = vpack.c.bf16 %v213_v16, %v210_v40  ;;  %v209_v2 = vld [vmem:[#allocation10 + $0xf0] sm:$0xff] }
 0x287   :  { %3143 = vmatmul.mubr.f32.gmra.mrb[20].mxu1 %v3100_v13  ;;  %3563 = vmatpush1.bf16.msra.mxu0 %v4910_v0  ;;  %v211_v0 = vld [vmem:[#allocation10 + $0x100] sm:$0xff] }
 0x288   :  { %3595 = vmatpush3.bf16.msra.mxu1 %v4907_v42  ;;  %v4924_v11 = vpop.f32.mrb[14].mxu1  ;;  %799 = vmatprep.mubr.f32.mxu0 %v5664_v28  ;;  %5671 = vst [vmem:[#allocation52_spill] sm:$0xff] %v4929_v1  ;;  %v214_v42 = vld [vmem:[#allocation10 + $0x118] sm:$0xff]  ;;  %5673 = vst [vmem:[#allocation54_spill] sm:$0xff] %v4939_v35 }
 0x289   :  { %v708_v36 = vpop.f32.mrb[15].mxu1  ;;  %3565 = vmatprep.subr.bf16.mxu0 %v4916_v37  ;;  %3597 = vmatprep.subr.bf16.mxu1 %v4918_v5  ;;  %v212_v37 = vld [vmem:[#allocation10 + $0x108] sm:$0xff]  ;;  %v4943_v25 = vpack.c.bf16 %v214_v42, %v211_v0  ;;  %v215_v0 = vld [vmem:[#allocation10 + $0x120] sm:$0xff]  ;;  %v218_v42 = vld [vmem:[#allocation10 + $0x138] sm:$0xff] }
 0x28a   :  { %800 = vmatmul.mubr.f32.gmra.mrb[22].mxu0 %v3097_v23  ;;  %3145 = vmatprep.mubr.f32.mxu1 %v708_v36  ;;  %v219_v23 = vld [vmem:[#allocation10 + $0x140] sm:$0xff]  ;;  %v4948_v40 = vpack.c.bf16 %v212_v37, %v209_v2  ;;  %v4959_v37 = vpack.c.bf16 %v218_v42, %v215_v0  ;;  %v285_v42 = vld [vmem:[#allocation13 + $0x50] sm:$0xff] }
 0x28b   :  { %3146 = vmatmul.mubr.f32.gmra.mrb[22].mxu1 %v4924_v11  ;;  %3567 = vmatpush1.bf16.msra.mxu0 %v4921_v41  ;;  %v4952_v16 = vpack.c.bf16 %v219_v23, %v216_v58  ;;  %v225_v41 = vld [vmem:[#allocation10 + $0x170] sm:$0xff]  ;;  %v224_v23 = vld [vmem:[#allocation10 + $0x168] sm:$0xff] }
 0x28c   :  { %3599 = vmatpush3.bf16.msra.mxu1 %v4918_v5  ;;  %3180 = vmatprep.mubr.f32.mxu1 %v4878_v59  ;;  %5674 = vst [vmem:[#allocation55_spill] sm:$0xff] %v4948_v40  ;;  %v226_v5 = vld [vmem:[#allocation10 + $0x178] sm:$0xff]  ;;  %v221_v58 = vld [vmem:[#allocation10 + $0x150] sm:$0xff] }
 0x28d   :  { %805 = vmatprep.mubr.f32.mxu0 %v5664_v28  ;;  %3569 = vmatprep.subr.bf16.mxu0 %v4929_v1  ;;  %v222_v1 = vld [vmem:[#allocation10 + $0x158] sm:$0xff]  ;;  %v4970_v0 = vpack.c.bf16 %v224_v23, %v221_v58  ;;  %v283_v23 = vld [vmem:[#allocation13 + $0x40] sm:$0xff] }
 0x28e   :  { %806 = vmatmul.mubr.f32.gmra.mrb[24].mxu0 %v698_v43  ;;  %3601 = vmatprep.subr.bf16.mxu1 %v4931_v61  ;;  %v4955_v43 = vpack.c.bf16 %v220_v47, %v217_v24  ;;  %v4963_v2 = vpack.c.bf16 %v225_v41, %v222_v1  ;;  %v279_v47 = vld [vmem:[#allocation13 + $0x20] sm:$0xff] }
 0x28f   :  { %3571 = vmatpush1.bf16.msra.mxu0 %v4935_v22  ;;  %811 = vmatprep.mubr.f32.mxu0 %v5664_v28  ;;  %v223_v22 = vld [vmem:[#allocation10 + $0x160] sm:$0xff]  ;;  %5676 = vst [vmem:[#allocation57_spill] sm:$0xff] %v4970_v0 }
 0x290   :  { %3603 = vmatpush3.bf16.msra.mxu1 %v4931_v61  ;;  %3573 = vmatprep.subr.bf16.mxu0 %v4939_v35  ;;  %5675 = vst [vmem:[#allocation56_spill] sm:$0xff] %v4963_v2  ;;  %v4966_v24 = vpack.c.bf16 %v226_v5, %v223_v22  ;;  %v280_v35 = vld [vmem:[#allocation13 + $0x28] sm:$0xff]  ;;  %v275_v1 = vld [vmem:[#allocation13] sm:$0xff]  ;;  %v278_v22 = vld [vmem:[#allocation13 + $0x18] sm:$0xff] }
 0x291   :  { %3605 = vmatprep.subr.bf16.mxu1 %v4943_v25  ;;  %v4982_v58 = vpack.c.bf16 %v278_v22, %v275_v1  ;;  %v289_v22 = vld [vmem:[#allocation13 + $0x70] sm:$0xff] }
 0x292   :  { %812 = vmatmul.mubr.f32.gmra.mrb[26].mxu0 %v3100_v13  ;;  %v276_v13 = vld [vmem:[#allocation13 + $0x8] sm:$0xff] }
 0x293   :  { %3575 = vmatpush1.bf16.msra.mxu0 %v4948_v40  ;;  %817 = vmatprep.mubr.f32.mxu0 %v5664_v28  ;;  %v277_v40 = vld [vmem:[#allocation13 + $0x10] sm:$0xff]  ;;  %v4974_v41 = vpack.c.bf16 %v279_v47, %v276_v13  ;;  %5678 = vst [vmem:[#allocation59_spill] sm:$0xff] %v4982_v58  ;;  %v284_v47 = vld [vmem:[#allocation13 + $0x48] sm:$0xff] }
 0x294   :  { %3607 = vmatpush3.bf16.msra.mxu1 %v4943_v25  ;;  %3577 = vmatprep.subr.bf16.mxu0 %v4952_v16  ;;  %v4977_v5 = vpack.c.bf16 %v280_v35, %v277_v40  ;;  %v281_v13 = vld [vmem:[#allocation13 + $0x30] sm:$0xff]  ;;  %v291_v40 = vld [vmem:[#allocation13 + $0x80] sm:$0xff] }
 0x295   :  { %3609 = vmatprep.subr.bf16.mxu1 %v4955_v43  ;;  %5677 = vst [vmem:[#allocation58_spill] sm:$0xff] %v4974_v41  ;;  %v4994_v1 = vpack.c.bf16 %v284_v47, %v281_v13 }
 0x296   :  { %818 = vmatmul.mubr.f32.gmra.mrb[28].mxu0 %v708_v36  ;;  %v282_v36 = vld [vmem:[#allocation13 + $0x38] sm:$0xff] }
 0x297   :  { %3579 = vmatpush1.bf16.msra.mxu0 %v4959_v37  ;;  %823 = vmatprep.mubr.f32.mxu0 %v5664_v28  ;;  %v4986_v35 = vpack.c.bf16 %v285_v42, %v282_v36  ;;  %5681 = vst [vmem:[#allocation62_spill] sm:$0xff] %v4994_v1  ;;  %v287_v36 = vld [vmem:[#allocation13 + $0x60] sm:$0xff]  ;;  %v290_v42 = vld [vmem:[#allocation13 + $0x78] sm:$0xff] }
 0x298   :  { %3611 = vmatpush3.bf16.msra.mxu1 %v4955_v43  ;;  %3581 = vmatprep.subr.bf16.mxu0 %v4963_v2  ;;  %v286_v2 = vld [vmem:[#allocation13 + $0x58] sm:$0xff]  ;;  %v5008_v47 = vpack.c.bf16 %v290_v42, %v287_v36 }
 0x299   :  { %3613 = vmatprep.subr.bf16.mxu1 %v4966_v24  ;;  %5679 = vst [vmem:[#allocation60_spill] sm:$0xff] %v4986_v35 }
 0x29a   :  { %824 = vmatmul.mubr.f32.gmra.mrb[30].mxu0 %v4924_v11  ;;  %v288_v11 = vld [vmem:[#allocation13 + $0x68] sm:$0xff]  ;;  %5684 = vst [vmem:[#allocation65_spill] sm:$0xff] %v5008_v47 }
 0x29b   :  { %3583 = vmatpush1.bf16.msra.mxu0 %v4970_v0  ;;  %999 = vmatprep.mubr.f32.mxu0 %v5664_v28  ;;  %v4990_v0 = vpack.c.bf16 %v286_v2, %v283_v23  ;;  %v294_v2 = vld [vmem:[#allocation13 + $0x98] sm:$0xff]  ;;  %v297_v23 = vld [vmem:[#allocation13 + $0xb0] sm:$0xff] }
 0x29c   :  { %3615 = vmatpush3.bf16.msra.mxu1 %v4966_v24  ;;  %3617 = vmatprep.subr.bf16.mxu0 %v4974_v41  ;;  %v292_v41 = vld [vmem:[#allocation13 + $0x88] sm:$0xff] }
 0x29d   :  { %3649 = vmatprep.subr.bf16.mxu1 %v4977_v5  ;;  %5680 = vst [vmem:[#allocation61_spill] sm:$0xff] %v4990_v0  ;;  %v5004_v13 = vpack.c.bf16 %v292_v41, %v289_v22  ;;  %v300_v41 = vld [vmem:[#allocation13 + $0xc8] sm:$0xff]  ;;  %v303_v22 = vld [vmem:[#allocation13 + $0xe0] sm:$0xff] }
 0x29e   :  { %1000 = vmatmul.mubr.f32.vlgmr.msra.gmra.mrb[16].mxu0 %v4878_v59  ;;  %v4999_v59 = vpack.c.bf16 %v291_v40, %v288_v11  ;;  %v293_v11 = vld [vmem:[#allocation13 + $0x90] sm:$0xff]  ;;  %v5013_v40 = vpack.c.bf16 %v297_v23, %v294_v2  ;;  %v5026_v2 = vpack.c.bf16 %v303_v22, %v300_v41  ;;  %v299_v23 = vld [vmem:[#allocation13 + $0xc0] sm:$0xff]  ;;  %v310_v22 = vld [vmem:[#allocation13 + $0x118] sm:$0xff] }
 0x29f   :  { %3181 = vmatmul.mubr.f32.vlgmr.msra.gmra.mrb[16].mxu1 %v4876_v46  ;;  %3619 = vmatpush1.bf16.msra.mxu0 %v4982_v58  ;;  %5683 = vst [vmem:[#allocation64_spill] sm:$0xff] %v5004_v13  ;;  %v295_v58 = vld [vmem:[#allocation13 + $0xa0] sm:$0xff] }
 0x2a0   :  { %3183 = vmatprep.mubr.f32.mxu1 %v4882_v6  ;;  %1005 = vmatprep.mubr.f32.mxu0 %v5664_v28  ;;  %5682 = vst [vmem:[#allocation63_spill] sm:$0xff] %v4999_v59  ;;  %5685 = vst [vmem:[#allocation66_spill] sm:$0xff] %v5013_v40  ;;  %v307_v41 = vld [vmem:[#allocation13 + $0x100] sm:$0xff] }
 0x2a1   :  { %3621 = vmatprep.subr.bf16.mxu0 %v4986_v35  ;;  %3651 = vmatpush3.bf16.msra.mxu1 %v4977_v5  ;;  %v298_v35 = vld [vmem:[#allocation13 + $0xb8] sm:$0xff]  ;;  %5687 = vst [vmem:[#allocation68_spill] sm:$0xff] %v5026_v2 }
 0x2a2   :  { %1006 = vmatmul.mubr.f32.gmra.mrb[18].mxu0 %v4876_v46  ;;  %3653 = vmatprep.subr.bf16.mxu1 %v4990_v0  ;;  %v296_v46 = vld [vmem:[#allocation13 + $0xa8] sm:$0xff]  ;;  %v5018_v36 = vpack.c.bf16 %v298_v35, %v295_v58  ;;  %v306_v58 = vld [vmem:[#allocation13 + $0xf8] sm:$0xff]  ;;  %v309_v35 = vld [vmem:[#allocation13 + $0x110] sm:$0xff] }
 0x2a3   :  { %3184 = vmatmul.mubr.f32.gmra.mrb[18].mxu1 %v4880_v62  ;;  %3623 = vmatpush1.bf16.msra.mxu0 %v4994_v1  ;;  %v5022_v42 = vpack.c.bf16 %v296_v46, %v293_v11  ;;  %v301_v1 = vld [vmem:[#allocation13 + $0xd0] sm:$0xff] }
 0x2a4   :  { %3186 = vmatprep.mubr.f32.mxu1 %v4886_v10  ;;  %1011 = vmatprep.mubr.f32.mxu0 %v5664_v28 }
 0x2a5   :  { %3625 = vmatprep.subr.bf16.mxu0 %v4999_v59  ;;  %3655 = vmatpush3.bf16.msra.mxu1 %v4990_v0  ;;  %5686 = vst [vmem:[#allocation67_spill] sm:$0xff] %v5022_v42  ;;  %v304_v59 = vld [vmem:[#allocation13 + $0xe8] sm:$0xff]  ;;  %v315_v0 = vld [vmem:[#allocation13 + $0x140] sm:$0xff] }
 0x2a6   :  { %1012 = vmatmul.mubr.f32.gmra.mrb[20].mxu0 %v4882_v6  ;;  %3657 = vmatprep.subr.bf16.mxu1 %v5004_v13  ;;  %v302_v6 = vld [vmem:[#allocation13 + $0xd8] sm:$0xff]  ;;  %v5032_v11 = vpack.c.bf16 %v304_v59, %v301_v1  ;;  %v5046_v1 = vpack.c.bf16 %v310_v22, %v307_v41 }
 0x2a7   :  { %3187 = vmatmul.mubr.f32.gmra.mrb[20].mxu1 %v4884_v31  ;;  %3627 = vmatpush1.bf16.msra.mxu0 %v5008_v47  ;;  %v5036_v46 = vpack.c.bf16 %v302_v6, %v299_v23  ;;  %v305_v47 = vld [vmem:[#allocation13 + $0xf0] sm:$0xff]  ;;  %v316_v6 = vld [vmem:[#allocation13 + $0x148] sm:$0xff] }
 0x2a8   :  { %3189 = vmatprep.mubr.f32.mxu1 %v4890_v17  ;;  %1017 = vmatprep.mubr.f32.mxu0 %v5664_v28  ;;  %v313_v23 = vld [vmem:[#allocation13 + $0x130] sm:$0xff] }
 0x2a9   :  { %3629 = vmatprep.subr.bf16.mxu0 %v5013_v40  ;;  %3659 = vmatpush3.bf16.msra.mxu1 %v5004_v13  ;;  %v5040_v40 = vpack.c.bf16 %v309_v35, %v306_v58  ;;  %v312_v13 = vld [vmem:[#allocation13 + $0x128] sm:$0xff]  ;;  %v311_v35 = vld [vmem:[#allocation13 + $0x120] sm:$0xff]  ;;  %v5058_v41 = vpack.c.bf16 %v316_v6, %v313_v23 }
 0x2aa   :  { %1018 = vmatmul.mubr.f32.gmra.mrb[22].mxu0 %v4880_v62  ;;  %3661 = vmatprep.subr.bf16.mxu1 %v5018_v36  ;;  %v308_v62 = vld [vmem:[#allocation13 + $0x108] sm:$0xff]  ;;  %v5053_v58 = vpack.c.bf16 %v315_v0, %v312_v13  ;;  %v319_v0 = vld [vmem:[#allocation13 + $0x160] sm:$0xff]  ;;  %v322_v13 = vld [vmem:[#allocation13 + $0x178] sm:$0xff] }
 0x2ab   :  { %3190 = vmatmul.mubr.f32.gmra.mrb[22].mxu1 %v4888_v18  ;;  %3631 = vmatpush1.bf16.msra.mxu0 %v5022_v42  ;;  %5688 = vst [vmem:[#allocation69_spill] sm:$0xff] %v5040_v40  ;;  %v5050_v59 = vpack.c.bf16 %v308_v62, %v305_v47  ;;  %v318_v42 = vld [vmem:[#allocation13 + $0x158] sm:$0xff]  ;;  %v317_v62 = vld [vmem:[#allocation13 + $0x150] sm:$0xff] }
 0x2ac   :  { %1023 = vmatprep.mubr.f32.mxu0 %v5664_v28  ;;  %3633 = vmatprep.subr.bf16.mxu0 %v5026_v2  ;;  %v314_v2 = vld [vmem:[#allocation13 + $0x138] sm:$0xff] }
 0x2ad   :  { %3663 = vmatpush3.bf16.msra.mxu1 %v5018_v36  ;;  %3224 = vmatprep.mubr.f32.mxu1 %v4706_v49  ;;  %v5062_v47 = vpack.c.bf16 %v314_v2, %v311_v35 }
 0x2ae   :  { %1024 = vmatmul.mubr.f32.gmra.mrb[24].mxu0 %v4886_v10  ;;  %3665 = vmatprep.subr.bf16.mxu1 %v5032_v11  ;;  %v321_v10 = vld [vmem:[#allocation13 + $0x170] sm:$0xff] }
 0x2af   :  { %3635 = vmatpush1.bf16.msra.mxu0 %v5036_v46  ;;  %1029 = vmatprep.mubr.f32.mxu0 %v5664_v28  ;;  %v5065_v22 = vpack.c.bf16 %v321_v10, %v318_v42 }
 0x2b0   :  { %3637 = vmatprep.subr.bf16.mxu0 %v5040_v40  ;;  %v320_v40 = vld [vmem:[#allocation13 + $0x168] sm:$0xff] }
 0x2b1   :  { %3667 = vmatpush3.bf16.msra.mxu1 %v5032_v11  ;;  %v5074_v2 = vpack.c.bf16 %v320_v40, %v317_v62 }
 0x2b2   :  { %1030 = vmatmul.mubr.f32.gmra.mrb[26].mxu0 %v4884_v31  ;;  %3669 = vmatprep.subr.bf16.mxu1 %v5046_v1  ;;  %v5070_v31 = vpack.c.bf16 %v322_v13, %v319_v0 }
 0x2b3   :  { %3639 = vmatpush1.bf16.msra.mxu0 %v5050_v59  ;;  %1035 = vmatprep.mubr.f32.mxu0 %v5664_v28  ;;  %5690 = vst [vmem:[#allocation71_spill] sm:$0xff] %v5074_v2 }
 0x2b4   :  { %3641 = vmatprep.subr.bf16.mxu0 %v5053_v58  ;;  %5689 = vst [vmem:[#allocation70_spill] sm:$0xff] %v5070_v31 }
 0x2b5   :  { %3671 = vmatpush3.bf16.msra.mxu1 %v5046_v1 }
 0x2b6   :  { %1036 = vmatmul.mubr.f32.gmra.mrb[28].mxu0 %v4890_v17  ;;  %3673 = vmatprep.subr.bf16.mxu1 %v5058_v41 }
 0x2b7   :  { %3643 = vmatpush1.bf16.msra.mxu0 %v5062_v47  ;;  %1041 = vmatprep.mubr.f32.mxu0 %v5664_v28 }
 0x2b8   :  { %3645 = vmatprep.subr.bf16.mxu0 %v5065_v22 }
 0x2b9   :  { %3675 = vmatpush3.bf16.msra.mxu1 %v5058_v41 }
 0x2ba   :  { %1042 = vmatmul.mubr.f32.gmra.mrb[30].mxu0 %v4888_v18  ;;  %3677 = vmatprep.subr.bf16.mxu1 %v5070_v31 }
 0x2bb   :  { %3647 = vmatpush1.bf16.msra.mxu0 %v5074_v2  ;;  %1273 = vmatprep.mubr.f32.mxu0 %v5664_v28 }
 0x2bc   :  { %3681 = vmatprep.subr.bf16.mxu0 %v4658_v4  ;;  %v5117_v4 = vld [vmem:[#allocation7 + $0x30] sm:$0xff] }
 0x2bd   :  { %3679 = vmatpush3.bf16.msra.mxu1 %v5070_v31 }
 0x2be   :  { %1274 = vmatmul.mubr.f32.vlgmr.msra.gmra.mrb[16].mxu0 %v4706_v49 }
 0x2bf   :  { %1279 = vmatprep.mubr.f32.mxu0 %v5664_v28  ;;  %3683 = vmatpush1.bf16.msra.mxu0 %v4660_v8  ;;  %v5123_v8 = vld [vmem:[#allocation7 + $0x38] sm:$0xff] }
 0x2c0   :  { %3225 = vmatmul.mubr.f32.vlgmr.msra.gmra.mrb[24].mxu1 %v4710_v50  ;;  %3685 = vmatprep.subr.bf16.mxu0 %v4662_v9 }
 0x2c1   :  { %3227 = vmatprep.mubr.f32.mxu1 %v4714_v51 }
 0x2c2   :  { %1280 = vmatmul.mubr.f32.gmra.mrb[18].mxu0 %v4710_v50 }
 0x2c3   :  { %1285 = vmatprep.mubr.f32.mxu0 %v5664_v28  ;;  %3687 = vmatpush1.bf16.msra.mxu0 %v4666_v14 }
 0x2c4   :  { %3228 = vmatmul.mubr.f32.gmra.mrb[26].mxu1 %v4718_v52  ;;  %3689 = vmatprep.subr.bf16.mxu0 %v4669_v15 }
 0x2c5   :  { %3230 = vmatprep.mubr.f32.mxu1 %v4722_v53 }
 0x2c6   :  { %1286 = vmatmul.mubr.f32.gmra.mrb[20].mxu0 %v4714_v51 }
 0x2c7   :  { %1291 = vmatprep.mubr.f32.mxu0 %v5664_v28  ;;  %3691 = vmatpush1.bf16.msra.mxu0 %v4672_v20 }
 0x2c8   :  { %3231 = vmatmul.mubr.f32.gmra.mrb[28].mxu1 %v4726_v54  ;;  %3693 = vmatprep.subr.bf16.mxu0 %v4675_v21 }
 0x2c9   :  { %3233 = vmatprep.mubr.f32.mxu1 %v4730_v55 }
 0x2ca   :  { %1292 = vmatmul.mubr.f32.gmra.mrb[22].mxu0 %v4718_v52 }
 0x2cb   :  { %1297 = vmatprep.mubr.f32.mxu0 %v5664_v28  ;;  %3695 = vmatpush1.bf16.msra.mxu0 %v4678_v26 }
 0x2cc   :  { %3234 = vmatmul.mubr.f32.gmra.mrb[30].mxu1 %v4734_v56  ;;  %3697 = vmatprep.subr.bf16.mxu0 %v4681_v27 }
 0x2cd   :  { %3252 = vmatprep.mubr.msk.f32.mxu1 %vm458_vm0, %v4738_v57 }
 0x2ce   :  { %1298 = vmatmul.mubr.f32.gmra.mrb[24].mxu0 %v4722_v53 }
 0x2cf   :  { %1303 = vmatprep.mubr.f32.mxu0 %v5664_v28  ;;  %3699 = vmatpush1.bf16.msra.mxu0 %v4684_v32 }
 0x2d0   :  { %3701 = vmatprep.subr.bf16.mxu0 %v4687_v33  ;;  %v325_v33 = vld [vmem:[%s5565_s9] sm:$0x7] }
 0x2d1   :  { %v1201_v49 = vrot.slane %v325_v33, %v4775_v34 }
 0x2d2   :  { %1304 = vmatmul.mubr.f32.gmra.mrb[26].mxu0 %v4726_v54 }
 0x2d3   :  { %1309 = vmatprep.mubr.f32.mxu0 %v5664_v28  ;;  %3703 = vmatpush1.bf16.msra.mxu0 %v4690_v38  ;;  %v324_v38 = vld [vmem:[%s5564_s8] sm:$0x7]  ;;  %s4478_s8 = smov [#allocation14]  }
 0x2d4   :  { %3705 = vmatprep.subr.bf16.mxu0 %v4693_v39  ;;  %v1157_v39 = vrot.slane %v324_v38, %v4769_v30  ;;  %s2761_s9 = sshll.u32 %s4478_s8, 4  ;;  %s2762_s9 = int_to_ptr.vmem [resolvable:$true] %s2761_s9 }
 0x2d5   :  { %s4432_s27 = scalar_lea.vmem %s2762_s9, 1024  ;;  %p4437_p1 = scmp.lt.s32.totalorder %s2762_s9, %s2762_s9 }
 0x2d6   :  { %1310 = vmatmul.mubr.f32.gmra.mrb[28].mxu0 %v5117_v4  ;;  %p4433_p0 = scmp.ne.s32.totalorder %s2762_s9, %s4432_s27  ;;  %p4438_p2 = scmp.lt.s32.totalorder %s4432_s27, %s4432_s27 }
 0x2d7   :  { %1315 = vmatprep.mubr.f32.mxu0 %v5664_v28  ;;  %3707 = vmatpush1.bf16.msra.mxu0 %v4696_v44  ;;  %v1197_v44 = vrot.slane %v325_v33, %v4769_v30 }
 0x2d8   :  { %3709 = vmatprep.subr.bf16.mxu0 %v4699_v45  ;;  %p4439_p3 = por %p4438_p2, %p4437_p1 }
 0x2d9   :  { %v5153_v45 = vadd.f32 %v1197_v44, %v1157_v39 }
 0x2da   :  { %1316 = vmatmul.mubr.f32.gmra.mrb[30].mxu0 %v5123_v8  ;;  %p4440_p4 = pnand %p4439_p3, %p4433_p0 }
 0x2db   :  { %3711 = vmatpush1.bf16.msra.mxu0 %v4702_v48  ;;  %1651 = vmatprep.mubr.f32.mxu0 %v5664_v28  ;;  %v1161_v48 = vrot.slane %v324_v38, %v4775_v34 }
 0x2dc   :  { %3745 = vmatprep.subr.bf16.mxu0 %v4742_v60 }
 0x2dd   :  { %v5160_v55 = vadd.f32 %v1201_v49, %v1161_v48 }
 0x372   :  { %v5129_v9 = vpop.f32.mrb[16].mxu1 }
 0x373   :  { %v5131_v14 = vpop.f32.mrb[17].mxu1 }
 0x376   :  { %v5133_v15 = vpop.f32.mrb[18].mxu1 }
 0x377   :  { %v5135_v20 = vpop.f32.mrb[19].mxu1 }
 0x37a   :  { %v5137_v21 = vpop.f32.mrb[20].mxu1 }
 0x37b   :  { %v5139_v26 = vpop.f32.mrb[21].mxu1 }
 0x37e   :  { %v5141_v27 = vpop.f32.mrb[22].mxu1 }
 0x37f   :  { %v5143_v32 = vpop.f32.mrb[23].mxu1 }
 0x391   :  { %v1275_v50 = vpop.f32.mrb[16].mxu0 }
 0x392   :  { %v3937_v51 = vadd.f32 %v5153_v45, %v1275_v50  ;;  %v1277_v52 = vpop.f32.mrb[17].mxu0 }
 0x393   :  { %v5158_v53 = vpop.f32.mrb[24].mxu1  ;;  %v3939_v17 = vadd.f32 %v5160_v55, %v1277_v52 }
 0x394   :  { %v2792_v54 = vmul.f32 -1.442695, %v3937_v51  ;;  %v1388_v56 = vpop.f32.mrb[25].mxu1 }
 0x395   :  { %v1281_v57 = vpop.f32.mrb[18].mxu0  ;;  %v2800_v10 = vmul.f32 -1.442695, %v3939_v17 }
 0x396   :  { %4095 = vpow2.f32 %v2792_v54  ;;  %v3941_v60 = vadd.f32 %v5153_v45, %v1281_v57  ;;  %v1283_v30 = vpop.f32.mrb[19].mxu0 }
 0x397   :  { %v5163_v18 = vpop.f32.mrb[26].mxu1  ;;  %v3943_v50 = vadd.f32 %v5160_v55, %v1283_v30 }
 0x398   :  { %v2793_v34 = vmul.f32 -1.442695, %v3941_v60  ;;  %v5166_v40 = vpop.f32.mrb[27].mxu1 }
 0x399   :  { %v1287_v42 = vpop.f32.mrb[20].mxu0 }
 0x39a   :  { %4097 = vpow2.f32 %v2793_v34  ;;  %v3945_v23 = vadd.f32 %v5153_v45, %v1287_v42  ;;  %v1289_v6 = vpop.f32.mrb[21].mxu0  ;;  %v1164_v42 = vsub.s32 2, %v4766_v29 }
 0x39b   :  { %v5169_v35 = vpop.f32.mrb[28].mxu1 }
 0x39c   :  { %v2794_v0 = vmul.f32 -1.442695, %v3945_v23  ;;  %v5171_v13 = vpop.f32.mrb[29].mxu1  ;;  %v2801_v23 = vmul.f32 -1.442695, %v3943_v50 }
 0x39d   :  { %v1293_v62 = vpop.f32.mrb[22].mxu0 }
 0x39e   :  { %4099 = vpow2.f32 %v2794_v0  ;;  %v3949_v39 = vadd.f32 %v5153_v45, %v1293_v62  ;;  %v1295_v44 = vpop.f32.mrb[23].mxu0  ;;  %v3947_v0 = vadd.f32 %v5160_v55, %v1289_v6 }
 0x39f   :  { %v5174_v48 = vpop.f32.mrb[30].mxu1  ;;  %4101 = vpow2.f32 %v2800_v10  ;;  %v3951_v30 = vadd.f32 %v5160_v55, %v1295_v44 }
 0x3a0   :  { %v4096_v49 = vpop.eup %4095  ;;  %v2795_v51 = vmul.f32 -1.442695, %v3949_v39  ;;  %v5177_v52 = vpop.f32.mrb[31].mxu1  ;;  %v2802_v29 = vmul.f32 -1.442695, %v3947_v0 }
 0x3a1   :  { %v1459_v54 = vadd.f32 1.0, %v4096_v49  ;;  %v1299_v57 = vpop.f32.mrb[24].mxu0  ;;  %v2803_v6 = vmul.f32 -1.442695, %v3951_v30 }
 0x3a2   :  { %4103 = vpow2.f32 %v2795_v51  ;;  %v3953_v60 = vadd.f32 %v5153_v45, %v1299_v57  ;;  %v1301_v17 = vpop.f32.mrb[25].mxu0  ;;  %v5184_v51 = vrot.slane %v325_v33, %v1164_v42 }
 0x3a3   :  { %4105 = vrcp.f32 %v1459_v54  ;;  %v5186_v54 = vrot.slane %v324_v38, %v1164_v42 }
 0x3a4   :  { %v4098_v34 = vpop.eup %4097  ;;  %v2796_v62 = vmul.f32 -1.442695, %v3953_v60  ;;  %v3955_v60 = vadd.f32 %v5160_v55, %v1301_v17  ;;  %v1389_v33 = vadd.f32 %v1388_v56, %v5184_v51 }
 0x3a5   :  { %v1460_v10 = vadd.f32 1.0, %v4098_v34  ;;  %v1305_v39 = vpop.f32.mrb[26].mxu0  ;;  %v1171_v38 = vadd.f32 %v5186_v54, %v5131_v14  ;;  %v1174_v14 = vadd.f32 %v5129_v9, %v5186_v54 }
 0x3a6   :  { %4107 = vpow2.f32 %v2796_v62  ;;  %v3957_v49 = vadd.f32 %v5153_v45, %v1305_v39  ;;  %v1307_v2 = vpop.f32.mrb[27].mxu0  ;;  %v2804_v17 = vmul.f32 -1.442695, %v3955_v60 }
 0x3a7   :  { %4109 = vrcp.f32 %v1460_v10 }
 0x3a8   :  { %v4100_v57 = vpop.eup %4099  ;;  %4111 = vpow2.f32 %v2801_v23  ;;  %v2797_v50 = vmul.f32 -1.442695, %v3957_v49 }
 0x3a9   :  { %v1461_v31 = vadd.f32 1.0, %v4100_v57  ;;  %v1311_v34 = vpop.f32.mrb[28].mxu0  ;;  %v4102_v44 = vpop.eup %4101  ;;  %v3959_v57 = vadd.f32 %v5160_v55, %v1307_v2  ;;  %v1399_v2 = vadd.f32 %v5166_v40, %v5184_v51 }
 0x3aa   :  { %4113 = vpow2.f32 %v2797_v50  ;;  %v3961_v62 = vadd.f32 %v5153_v45, %v1311_v34  ;;  %v1313_v39 = vpop.f32.mrb[29].mxu0  ;;  %v1515_v0 = vadd.f32 1.0, %v4102_v44 }
 0x3ab   :  { %4115 = vrcp.f32 %v1461_v31 }
 0x3ac   :  { %v4104_v10 = vpop.eup %4103  ;;  %4117 = vpow2.f32 %v2802_v29  ;;  %v2798_v42 = vmul.f32 -1.442695, %v3961_v62  ;;  %v1394_v29 = vadd.f32 %v5158_v53, %v5184_v51 }
 0x3ad   :  { %v4106_v23 = vpop.eup %4105  ;;  %v1462_v30 = vadd.f32 1.0, %v4104_v10  ;;  %4119 = vpow2.f32 %v2803_v6  ;;  %v1317_v49 = vpop.f32.mrb[30].mxu0  ;;  %v2805_v10 = vmul.f32 -1.442695, %v3959_v57 }
 0x3ae   :  { %4121 = vpow2.f32 %v2798_v42  ;;  %v1539_v50 = vmul.f32 %v4106_v23, %v1389_v33  ;;  %v3965_v34 = vadd.f32 %v5153_v45, %v1317_v49  ;;  %v1319_v56 = vpop.f32.mrb[31].mxu0  ;;  %v3963_v23 = vadd.f32 %v5160_v55, %v1313_v39 }
 0x3af   :  { %4123 = vrcp.f32 %v1462_v30  ;;  %v1404_v39 = vadd.f32 %v5163_v18, %v5184_v51 }
 0x3b0   :  { %v4108_v31 = vpop.eup %4107  ;;  %v1547_v44 = vadd.f32 %v1539_v50, %v1171_v38  ;;  %4125 = vrcp.f32 %v1515_v0  ;;  %v2799_v60 = vmul.f32 -1.442695, %v3965_v34  ;;  %v1177_v50 = vadd.f32 %v5186_v54, %v5135_v20 }
 0x3b1   :  { %v4110_v62 = vpop.eup %4109  ;;  %v1463_v6 = vadd.f32 1.0, %v4108_v31  ;;  %4127 = vpow2.f32 %v2804_v17  ;;  %v2806_v40 = vmul.f32 -1.442695, %v3963_v23  ;;  %v1180_v20 = vadd.f32 %v5133_v15, %v5186_v54 }
 0x3b2   :  { %v4112_v33 = vpop.eup %4111  ;;  %v1540_v42 = vmul.f32 %v4110_v62, %v1394_v29  ;;  %v3967_v62 = vadd.f32 %v5160_v55, %v1319_v56  ;;  %v1183_v56 = vadd.f32 %v5186_v54, %v5139_v26  ;;  %v1186_v26 = vadd.f32 %v5137_v21, %v5186_v54 }
 0x3b3   :  { %4129 = vrcp.f32 %v1463_v6  ;;  %v1516_v53 = vadd.f32 1.0, %v4112_v33 }
 0x3b4   :  { %v4114_v30 = vpop.eup %4113  ;;  %v1548_v9 = vadd.f32 %v1540_v42, %v1174_v14  ;;  %4131 = vtanh.f32 %v1547_v44  ;;  %v2807_v23 = vmul.f32 -1.442695, %v3967_v62 }
 0x3b5   :  { %v4116_v49 = vpop.eup %4115  ;;  %v1464_v38 = vadd.f32 1.0, %v4114_v30  ;;  %4133 = vpow2.f32 %v2799_v60  ;;  %v1409_v60 = vadd.f32 %v5171_v13, %v5184_v51 }
 0x3b6   :  { %v4118_v0 = vpop.eup %4117  ;;  %4135 = vpow2.f32 %v2805_v10  ;;  %v1541_v34 = vmul.f32 %v4116_v49, %v1399_v2  ;;  %v4257_v49 = vld [vmem:[#allocation7] sm:$0xff] }
 0x3b7   :  { %v4120_v17 = vpop.eup %4119  ;;  %4137 = vrcp.f32 %v1464_v38  ;;  %v1517_v29 = vadd.f32 1.0, %v4118_v0  ;;  %v1414_v0 = vadd.f32 %v5169_v35, %v5184_v51 }
 0x3b8   :  { %v4122_v57 = vpop.eup %4121  ;;  %4139 = vtanh.f32 %v1548_v9  ;;  %v1549_v31 = vadd.f32 %v1541_v34, %v1177_v50  ;;  %v1518_v10 = vadd.f32 1.0, %v4120_v17 }
 0x3b9   :  { %v4124_v14 = vpop.eup %4123  ;;  %4141 = vrcp.f32 %v1516_v53  ;;  %v1465_v44 = vadd.f32 1.0, %v4122_v57 }
 0x3ba   :  { %4143 = vpow2.f32 %v2806_v40  ;;  %v1542_v6 = vmul.f32 %v4124_v14, %v1404_v39  ;;  %v4126_v2 = vpop.eup %4125 }
 0x3bb   :  { %4145 = vrcp.f32 %v1465_v44  ;;  %v4128_v33 = vpop.eup %4127  ;;  %v4258_v44 = vld [vmem:[#allocation7 + $0x8] sm:$0xff] }
 0x3bc   :  { %v1550_v18 = vadd.f32 %v1542_v6, %v1180_v20  ;;  %4147 = vtanh.f32 %v1549_v31  ;;  %v1519_v34 = vadd.f32 1.0, %v4128_v33  ;;  %v1419_v31 = vadd.f32 %v5177_v52, %v5184_v51 }
 0x3bd   :  { %v4130_v42 = vpop.eup %4129  ;;  %4149 = vrcp.f32 %v1517_v29  ;;  %v1189_v33 = vadd.f32 %v5186_v54, %v5143_v32 }
 0x3be   :  { %v4132_v30 = vpop.eup %4131  ;;  %4151 = vtanh.f32 %v1550_v18  ;;  %v1543_v15 = vmul.f32 %v4130_v42, %v1409_v60  ;;  %v4259_v42 = vld [vmem:[#allocation7 + $0x10] sm:$0xff] }
 0x3bf   :  { %v4134_v9 = vpop.eup %4133  ;;  %v1563_v53 = vsub.f32 %v4257_v49, %v4132_v30  ;;  %4153 = vrcp.f32 %v1518_v10 }
 0x3c0   :  { %v4136_v38 = vpop.eup %4135  ;;  %v1466_v13 = vadd.f32 1.0, %v4134_v9  ;;  %v1551_v50 = vadd.f32 %v1543_v15, %v1183_v56  ;;  %4155 = vpow2.f32 %v2807_v23  ;;  %v4260_v9 = vld [vmem:[#allocation7 + $0x18] sm:$0xff] }
 0x3c1   :  { %v4138_v40 = vpop.eup %4137  ;;  %v1571_v17 = vmul.f32 %v4126_v2, %v1563_v53  ;;  %v1520_v60 = vadd.f32 1.0, %v4136_v38  ;;  %v1424_v38 = vadd.f32 %v5174_v48, %v5184_v51 }
 0x3c2   :  { %v4140_v57 = vpop.eup %4139  ;;  %4157 = vrcp.f32 %v1466_v13  ;;  %v1544_v39 = vmul.f32 %v4138_v40, %v1414_v0  ;;  %v1192_v40 = vadd.f32 %v5141_v27, %v5186_v54 }
 0x3c3   :  { %v4142_v14 = vpop.eup %4141  ;;  %4159 = vtanh.f32 %v1551_v50  ;;  %v5219_v29 = vadd.f32 %v4132_v30, %v1571_v17  ;;  %v1564_v35 = vsub.f32 %v4258_v44, %v4140_v57  ;;  %v4262_v44 = vld [vmem:[#allocation7 + $0x28] sm:$0xff] }
 0x3c4   :  { %v4144_v62 = vpop.eup %4143  ;;  %v1552_v20 = vadd.f32 %v1544_v39, %v1186_v26  ;;  %4161 = vrcp.f32 %v1519_v34  ;;  %v5691_v39 = vld [vmem:[#allocation20_spill] sm:$0xff] }
 0x3c5   :  { %v4146_v6 = vpop.eup %4145  ;;  %1652 = vmatmul.mubr.f32.vlgmr.msra.gmra.mrb[32].mxu0 %v5219_v29  ;;  %v1572_v2 = vmul.f32 %v4142_v14, %v1564_v35  ;;  %v1521_v56 = vadd.f32 1.0, %v4144_v62  ;;  %v5692_v62 = vld [vmem:[#allocation21_spill] sm:$0xff] }
 0x3c6   :  { %v4148_v21 = vpop.eup %4147  ;;  %v1545_v10 = vmul.f32 %v4146_v6, %v1419_v31  ;;  %1657 = vmatprep.mubr.f32.mxu0 %v5664_v28  ;;  %3747 = vmatpush1.bf16.msra.mxu0 %v4744_v63  ;;  %4163 = vtanh.f32 %v1552_v20 }
 0x3c7   :  { %v4150_v52 = vpop.eup %4149  ;;  %v5226_v18 = vadd.f32 %v4140_v57, %v1572_v2  ;;  %v1565_v23 = vsub.f32 %v4259_v42, %v4148_v21  ;;  %3749 = vmatprep.subr.bf16.mxu0 %v4747_v3  ;;  %4165 = vrcp.f32 %v1520_v60  ;;  %v5695_v42 = vld [vmem:[#allocation31_spill] sm:$0xff] }
 0x3c8   :  { %v4152_v30 = vpop.eup %4151  ;;  %v1553_v15 = vadd.f32 %v1545_v10, %v1189_v33  ;;  %v5694_v10 = vld [vmem:[#allocation30_spill] sm:$0xff] }
 0x3c9   :  { %1658 = vmatmul.mubr.f32.gmra.mrb[34].mxu0 %v5226_v18  ;;  %v1573_v32 = vmul.f32 %v4150_v52, %v1565_v23  ;;  %v1566_v49 = vsub.f32 %v4260_v9, %v4152_v30  ;;  %v4154_v53 = vpop.eup %4153 }
 0x3ca   :  { %4167 = vtanh.f32 %v1553_v15  ;;  %1663 = vmatprep.mubr.f32.mxu0 %v5664_v28  ;;  %3751 = vmatpush1.bf16.msra.mxu0 %v4750_v7  ;;  %v4156_v63 = vpop.eup %4155  ;;  %v4261_v7 = vld [vmem:[#allocation7 + $0x20] sm:$0xff] }
 0x3cb   :  { %v5234_v3 = vadd.f32 %v4148_v21, %v1573_v32  ;;  %v1574_v13 = vmul.f32 %v4154_v53, %v1566_v49  ;;  %3753 = vmatprep.subr.bf16.mxu0 %v4753_v12  ;;  %4169 = vrcp.f32 %v1521_v56  ;;  %v1522_v26 = vadd.f32 1.0, %v4156_v63  ;;  %v5698_v49 = vld [vmem:[#allocation36_spill] sm:$0xff]  ;;  %v5699_v53 = vld [vmem:[#allocation37_spill] sm:$0xff] }
 0x3cc   :  { %v4158_v0 = vpop.eup %4157 }
 0x3cd   :  { %v4160_v50 = vpop.eup %4159  ;;  %v1546_v34 = vmul.f32 %v4158_v0, %v1424_v38  ;;  %1664 = vmatmul.mubr.f32.gmra.mrb[36].mxu0 %v5234_v3  ;;  %v5240_v17 = vadd.f32 %v4152_v30, %v1574_v13  ;;  %v5696_v30 = vld [vmem:[#allocation33_spill] sm:$0xff]  ;;  %v5700_v38 = vld [vmem:[#allocation39_spill] sm:$0xff]  ;;  %v5701_v13 = vld [vmem:[#allocation40_spill] sm:$0xff] }
 0x3ce   :  { %1669 = vmatprep.mubr.f32.mxu0 %v5664_v28  ;;  %v1567_v48 = vsub.f32 %v4261_v7, %v4160_v50  ;;  %3755 = vmatpush1.bf16.msra.mxu0 %v4756_v19  ;;  %v4162_v57 = vpop.eup %4161  ;;  %v5693_v19 = vld [vmem:[#allocation28_spill] sm:$0xff] }
 0x3cf   :  { %v1554_v12 = vadd.f32 %v1546_v34, %v1192_v40  ;;  %3757 = vmatprep.subr.bf16.mxu0 %v5691_v39  ;;  %v5702_v40 = vld [vmem:[#allocation22_spill] sm:$0xff] }
 0x3d0   :  { %v1575_v31 = vmul.f32 %v4162_v57, %v1567_v48  ;;  %v4164_v14 = vpop.eup %4163  ;;  %v5703_v57 = vld [vmem:[#allocation23_spill] sm:$0xff] }
 0x3d1   :  { %4171 = vtanh.f32 %v1554_v12  ;;  %1670 = vmatmul.mubr.f32.gmra.mrb[38].mxu0 %v5240_v17  ;;  %v1568_v35 = vsub.f32 %v4262_v44, %v4164_v14  ;;  %v4166_v20 = vpop.eup %4165 }
 0x3d2   :  { %1675 = vmatprep.mubr.f32.mxu0 %v5664_v28  ;;  %v5247_v27 = vadd.f32 %v4160_v50, %v1575_v31  ;;  %3759 = vmatpush1.bf16.msra.mxu0 %v5692_v62  ;;  %4173 = vrcp.f32 %v1522_v26 }
 0x3d3   :  { %3761 = vmatprep.subr.bf16.mxu0 %v5693_v19  ;;  %v1576_v60 = vmul.f32 %v4166_v20, %v1568_v35 }
 0x3d4   :  { %v4168_v6 = vpop.eup %4167 }
 0x3d5   :  { %1676 = vmatmul.mubr.f32.gmra.mrb[40].mxu0 %v5247_v27  ;;  %v1569_v2 = vsub.f32 %v5117_v4, %v4168_v6  ;;  %v4170_v21 = vpop.eup %4169  ;;  %v5254_v33 = vadd.f32 %v4164_v14, %v1576_v60  ;;  %v5697_v4 = vld [vmem:[#allocation34_spill] sm:$0xff] }
 0x3d6   :  { %1681 = vmatprep.mubr.f32.mxu0 %v5664_v28  ;;  %3763 = vmatpush1.bf16.msra.mxu0 %v5694_v10 }
 0x3d7   :  { %v1577_v52 = vmul.f32 %v4170_v21, %v1569_v2  ;;  %3765 = vmatprep.subr.bf16.mxu0 %v5695_v42 }
 0x3d9   :  { %1682 = vmatmul.mubr.f32.gmra.mrb[42].mxu0 %v5254_v33  ;;  %v5259_v23 = vadd.f32 %v4168_v6, %v1577_v52 }
 0x3da   :  { %1687 = vmatprep.mubr.f32.mxu0 %v5664_v28  ;;  %3767 = vmatpush1.bf16.msra.mxu0 %v5696_v30 }
 0x3db   :  { %v4172_v56 = vpop.eup %4171  ;;  %3769 = vmatprep.subr.bf16.mxu0 %v5697_v4 }
 0x3dc   :  { %v1570_v15 = vsub.f32 %v5123_v8, %v4172_v56  ;;  %v4174_v32 = vpop.eup %4173 }
 0x3dd   :  { %1688 = vmatmul.mubr.f32.gmra.mrb[44].mxu0 %v5259_v23 }
 0x3de   :  { %1693 = vmatprep.mubr.f32.mxu0 %v5664_v28  ;;  %v1578_v9 = vmul.f32 %v4174_v32, %v1570_v15  ;;  %3771 = vmatpush1.bf16.msra.mxu0 %v5698_v49 }
 0x3df   :  { %3773 = vmatprep.subr.bf16.mxu0 %v5699_v53 }
 0x3e0   :  { %v5269_v63 = vadd.f32 %v4172_v56, %v1578_v9 }
 0x3e2   :  { %1694 = vmatmul.mubr.f32.gmra.mrb[46].mxu0 %v5269_v63 }
 0x3e3   :  { %3775 = vmatpush1.bf16.msra.mxu0 %v5700_v38  ;;  %1974 = vmatprep.mubr.f32.mxu0 %v5664_v28 }
 0x3e4   :  { %3809 = vmatprep.subr.bf16.mxu0 %v5701_v13 }
 0x498   :  { %v1653_v8 = vpop.f32.mrb[32].mxu0 }
 0x499   :  { %v1655_v0 = vpop.f32.mrb[33].mxu0  ;;  %v1654_v34 = vadd.f32 %v1653_v8, %v5702_v40 }
 0x49a   :  { %v1656_v26 = vadd.f32 %v1655_v0, %v5703_v57 }
 0x49c   :  { %v1659_v50 = vpop.f32.mrb[34].mxu0 }
 0x49d   :  { %v1660_v7 = vadd.f32 %v1659_v50, %v5702_v40  ;;  %v1661_v48 = vpop.f32.mrb[35].mxu0 }
 0x49e   :  { %v1662_v12 = vadd.f32 %v1661_v48, %v5703_v57 }
 0x49f   :  { %v3712_v39 = vpack.c.bf16 %v1660_v7, %v1654_v34 }
 0x4a0   :  { %v3728_v31 = vpack.c.bf16 %v1662_v12, %v1656_v26  ;;  %v1665_v14 = vpop.f32.mrb[36].mxu0  ;;  %v4263_v12 = vld [vmem:[#allocation2 + $0x8] sm:$0xff] }
 0x4a1   :  { %v1667_v44 = vpop.f32.mrb[37].mxu0  ;;  %3713 = vmatprep.subr.bf16.mxu1 %v3712_v39  ;;  %v1666_v62 = vadd.f32 %v1665_v14, %v5702_v40  ;;  %v4265_v14 = vld [vmem:[#allocation2 + $0x18] sm:$0xff] }
 0x4a2   :  { %3715 = vmatpush3.bf16.msra.mxu1 %v3712_v39  ;;  %v1668_v6 = vadd.f32 %v1667_v44, %v5703_v57  ;;  %v4264_v39 = vld [vmem:[#allocation2 + $0x10] sm:$0xff] }
 0x4a3   :  { %v4268_v44 = vld [vmem:[#allocation2 + $0x30] sm:$0xff] }
 0x4a4   :  { %v1671_v35 = vpop.f32.mrb[38].mxu0 }
 0x4a5   :  { %v1672_v20 = vadd.f32 %v1671_v35, %v5702_v40  ;;  %v1673_v19 = vpop.f32.mrb[39].mxu0  ;;  %v4270_v35 = vld [vmem:[#allocation5] sm:$0xff] }
 0x4a6   :  { %v1674_v60 = vadd.f32 %v1673_v19, %v5703_v57  ;;  %v4272_v19 = vld [vmem:[#allocation5 + $0x10] sm:$0xff] }
 0x4a7   :  { %v3716_v2 = vpack.c.bf16 %v1672_v20, %v1666_v62  ;;  %v5704_v62 = vld [vmem:[#allocation24_spill] sm:$0xff]  ;;  %v4271_v20 = vld [vmem:[#allocation5 + $0x8] sm:$0xff] }
 0x4a8   :  { %v3732_v21 = vpack.c.bf16 %v1674_v60, %v1668_v6  ;;  %v1677_v10 = vpop.f32.mrb[40].mxu0  ;;  %v5705_v6 = vld [vmem:[#allocation25_spill] sm:$0xff]  ;;  %v4273_v60 = vld [vmem:[#allocation5 + $0x18] sm:$0xff] }
 0x4a9   :  { %v1679_v52 = vpop.f32.mrb[41].mxu0  ;;  %3717 = vmatprep.subr.bf16.mxu1 %v3716_v2  ;;  %v1678_v30 = vadd.f32 %v1677_v10, %v5702_v40  ;;  %v4275_v10 = vld [vmem:[#allocation5 + $0x28] sm:$0xff] }
 0x4aa   :  { %3719 = vmatpush3.bf16.msra.mxu1 %v3716_v2  ;;  %v1680_v15 = vadd.f32 %v1679_v52, %v5703_v57  ;;  %v4274_v2 = vld [vmem:[#allocation5 + $0x20] sm:$0xff]  ;;  %v4276_v52 = vld [vmem:[#allocation5 + $0x30] sm:$0xff] }
 0x4ac   :  { %v1683_v42 = vpop.f32.mrb[42].mxu0 }
 0x4ad   :  { %v1684_v56 = vadd.f32 %v1683_v42, %v5702_v40  ;;  %v1685_v4 = vpop.f32.mrb[43].mxu0  ;;  %v5707_v42 = vld [vmem:[#allocation27_spill] sm:$0xff] }
 0x4ae   :  { %v1686_v32 = vadd.f32 %v1685_v4, %v5703_v57  ;;  %v5709_v4 = vld [vmem:[#allocation32_spill] sm:$0xff] }
 0x4af   :  { %v3720_v9 = vpack.c.bf16 %v1684_v56, %v1678_v30  ;;  %v4277_v30 = vld [vmem:[#allocation5 + $0x38] sm:$0xff]  ;;  %v5708_v56 = vld [vmem:[#allocation29_spill] sm:$0xff] }
 0x4b0   :  { %v3736_v49 = vpack.c.bf16 %v1686_v32, %v1680_v15  ;;  %v1689_v53 = vpop.f32.mrb[44].mxu0  ;;  %v5710_v15 = vld [vmem:[#allocation35_spill] sm:$0xff]  ;;  %v5711_v32 = vld [vmem:[#allocation38_spill] sm:$0xff] }
 0x4b1   :  { %v1691_v38 = vpop.f32.mrb[45].mxu0  ;;  %3721 = vmatprep.subr.bf16.mxu1 %v3720_v9  ;;  %v1690_v8 = vadd.f32 %v1689_v53, %v5702_v40 }
 0x4b2   :  { %3723 = vmatpush3.bf16.msra.mxu1 %v3720_v9  ;;  %v1692_v34 = vadd.f32 %v1691_v38, %v5703_v57  ;;  %v5712_v9 = vld [vmem:[#allocation41_spill] sm:$0xff] }
 0x4b5   :  { %v1695_v13 = vpop.f32.mrb[46].mxu0 }
 0x4b6   :  { %v1696_v0 = vadd.f32 %v1695_v13, %v5702_v40  ;;  %v1697_v50 = vpop.f32.mrb[47].mxu0  ;;  %v4266_v40 = vld [vmem:[#allocation2 + $0x20] sm:$0xff] }
 0x4b7   :  { %v1698_v7 = vadd.f32 %v1697_v50, %v5703_v57  ;;  %v4267_v57 = vld [vmem:[#allocation2 + $0x28] sm:$0xff] }
 0x4b8   :  { %v3724_v48 = vpack.c.bf16 %v1696_v0, %v1690_v8 }
 0x4b9   :  { %v3740_v26 = vpack.c.bf16 %v1698_v7, %v1692_v34 }
 0x4ba   :  { %3725 = vmatprep.subr.bf16.mxu1 %v3724_v48 }
 0x4bb   :  { %3727 = vmatpush3.bf16.msra.mxu1 %v3724_v48 }
 0x4bc   :  { %3729 = vmatprep.subr.bf16.mxu1 %v3728_v31 }
 0x4be   :  { %3253 = vmatmul.mubr.msk.f32.vlgmr.msra.gmra.mrb[32].mxu1 %vm458_vm0, %v4263_v12 }
 0x4bf   :  { %3731 = vmatpush3.bf16.msra.mxu1 %v3728_v31  ;;  %3255 = vmatprep.mubr.msk.f32.mxu1 %vm458_vm0, %v4264_v39  ;;  %v4269_v31 = vld [vmem:[#allocation2 + $0x38] sm:$0xff] }
 0x4c0   :  { %3733 = vmatprep.subr.bf16.mxu1 %v3732_v21 }
 0x4c2   :  { %3256 = vmatmul.mubr.msk.f32.gmra.mrb[34].mxu1 %vm458_vm0, %v4265_v14  ;;  %v5714_v14 = vld [vmem:[#allocation43_spill] sm:$0xff] }
 0x4c3   :  { %3735 = vmatpush3.bf16.msra.mxu1 %v3732_v21  ;;  %3258 = vmatprep.mubr.msk.f32.mxu1 %vm458_vm0, %v4266_v40  ;;  %v5706_v21 = vld [vmem:[#allocation26_spill] sm:$0xff]  ;;  %v5715_v40 = vld [vmem:[#allocation44_spill] sm:$0xff] }
 0x4c4   :  { %3737 = vmatprep.subr.bf16.mxu1 %v3736_v49 }
 0x4c6   :  { %3259 = vmatmul.mubr.msk.f32.gmra.mrb[36].mxu1 %vm458_vm0, %v4267_v57  ;;  %v5716_v57 = vld [vmem:[#allocation45_spill] sm:$0xff] }
 0x4c7   :  { %3739 = vmatpush3.bf16.msra.mxu1 %v3736_v49  ;;  %3261 = vmatprep.mubr.msk.f32.mxu1 %vm458_vm0, %v4268_v44 }
 0x4c8   :  { %3741 = vmatprep.subr.bf16.mxu1 %v3740_v26 }
 0x4ca   :  { %3262 = vmatmul.mubr.msk.f32.gmra.mrb[38].mxu1 %vm458_vm0, %v4269_v31 }
 0x4cb   :  { %3743 = vmatpush3.bf16.msra.mxu1 %v3740_v26  ;;  %3280 = vmatprep.mubr.msk.f32.mxu1 %vm458_vm0, %v4270_v35  ;;  %v5713_v26 = vld [vmem:[#allocation42_spill] sm:$0xff] }
 0x4cc   :  { %3777 = vmatprep.subr.bf16.mxu1 %v5704_v62  ;;  %v5717_v35 = vld [vmem:[#allocation46_spill] sm:$0xff] }
 0x4ce   :  { %3281 = vmatmul.mubr.msk.f32.vlgmr.msra.gmra.mrb[40].mxu1 %vm458_vm0, %v4271_v20  ;;  %v5719_v20 = vld [vmem:[#allocation48_spill] sm:$0xff] }
 0x4cf   :  { %3283 = vmatprep.mubr.msk.f32.mxu1 %vm458_vm0, %v4272_v19  ;;  %3779 = vmatpush3.bf16.msra.mxu1 %v5704_v62  ;;  %v5718_v62 = vld [vmem:[#allocation47_spill] sm:$0xff] }
 0x4d0   :  { %3781 = vmatprep.subr.bf16.mxu1 %v5705_v6 }
 0x4d2   :  { %3284 = vmatmul.mubr.msk.f32.gmra.mrb[42].mxu1 %vm458_vm0, %v4273_v60  ;;  %v5720_v60 = vld [vmem:[#allocation49_spill] sm:$0xff] }
 0x4d3   :  { %3286 = vmatprep.mubr.msk.f32.mxu1 %vm458_vm0, %v4274_v2  ;;  %3783 = vmatpush3.bf16.msra.mxu1 %v5705_v6  ;;  %v5721_v2 = vld [vmem:[#allocation50_spill] sm:$0xff] }
 0x4d4   :  { %3785 = vmatprep.subr.bf16.mxu1 %v5706_v21 }
 0x4d6   :  { %3287 = vmatmul.mubr.msk.f32.gmra.mrb[44].mxu1 %vm458_vm0, %v4275_v10  ;;  %v5723_v10 = vld [vmem:[#allocation52_spill] sm:$0xff] }
 0x4d7   :  { %3289 = vmatprep.mubr.msk.f32.mxu1 %vm458_vm0, %v4276_v52  ;;  %3787 = vmatpush3.bf16.msra.mxu1 %v5706_v21  ;;  %v5722_v21 = vld [vmem:[#allocation51_spill] sm:$0xff]  ;;  %v5724_v52 = vld [vmem:[#allocation53_spill] sm:$0xff] }
 0x4d8   :  { %3789 = vmatprep.subr.bf16.mxu1 %v5707_v42 }
 0x4da   :  { %3290 = vmatmul.mubr.msk.f32.gmra.mrb[46].mxu1 %vm458_vm0, %v4277_v30  ;;  %v5726_v30 = vld [vmem:[#allocation55_spill] sm:$0xff] }
 0x4db   :  { %3791 = vmatpush3.bf16.msra.mxu1 %v5707_v42  ;;  %v5725_v42 = vld [vmem:[#allocation54_spill] sm:$0xff] }
 0x4dc   :  { %3793 = vmatprep.subr.bf16.mxu1 %v5708_v56 }
 0x4df   :  { %3795 = vmatpush3.bf16.msra.mxu1 %v5708_v56  ;;  %v5728_v56 = vld [vmem:[#allocation57_spill] sm:$0xff] }
 0x4e0   :  { %3797 = vmatprep.subr.bf16.mxu1 %v5709_v4 }
 0x4e3   :  { %3799 = vmatpush3.bf16.msra.mxu1 %v5709_v4  ;;  %v5734_v4 = vld [vmem:[#allocation63_spill] sm:$0xff] }
 0x4e4   :  { %3801 = vmatprep.subr.bf16.mxu1 %v5710_v15 }
 0x4e7   :  { %3803 = vmatpush3.bf16.msra.mxu1 %v5710_v15  ;;  %v5736_v15 = vld [vmem:[#allocation65_spill] sm:$0xff] }
 0x4e8   :  { %3805 = vmatprep.subr.bf16.mxu1 %v5711_v32 }
 0x4eb   :  { %3807 = vmatpush3.bf16.msra.mxu1 %v5711_v32  ;;  %v5737_v32 = vld [vmem:[#allocation66_spill] sm:$0xff] }
 0x4ec   :  { %3841 = vmatprep.subr.bf16.mxu1 %v5712_v9 }
 0x591   :  { %v5323_v49 = vpop.f32.mrb[32].mxu1 }
 0x592   :  { %v5325_v53 = vpop.f32.mrb[33].mxu1 }
 0x595   :  { %v5327_v38 = vpop.f32.mrb[34].mxu1 }
 0x596   :  { %v5329_v13 = vpop.f32.mrb[35].mxu1 }
 0x599   :  { %v5331_v8 = vpop.f32.mrb[36].mxu1 }
 0x59a   :  { %v5333_v0 = vpop.f32.mrb[37].mxu1 }
 0x59d   :  { %v5335_v50 = vpop.f32.mrb[38].mxu1 }
 0x59e   :  { %v5337_v34 = vpop.f32.mrb[39].mxu1 }
 0x5a1   :  { %v3282_v7 = vpop.f32.mrb[40].mxu1 }
 0x5a2   :  { %v1871_v48 = vpop.f32.mrb[41].mxu1 }
 0x5a3   :  { %1975 = vmatmul.mubr.f32.vlgmr.msra.gmra.mrb[48].mxu0 %v1871_v48  ;;  %3324 = vmatprep.mubr.f32.mxu1 %v1871_v48 }
 0x5a4   :  { %3325 = vmatmul.mubr.f32.vlgmr.msra.gmra.mrb[48].mxu1 %v3282_v7  ;;  %3811 = vmatpush1.bf16.msra.mxu0 %v5713_v26 }
 0x5a5   :  { %3843 = vmatpush3.bf16.msra.mxu1 %v5712_v9  ;;  %v3285_v12 = vpop.f32.mrb[42].mxu1  ;;  %1980 = vmatprep.mubr.f32.mxu0 %v5664_v28  ;;  %v5738_v9 = vld [vmem:[#allocation67_spill] sm:$0xff] }
 0x5a6   :  { %v1881_v39 = vpop.f32.mrb[43].mxu1  ;;  %3813 = vmatprep.subr.bf16.mxu0 %v5714_v14  ;;  %3845 = vmatprep.subr.bf16.mxu1 %v5715_v40 }
 0x5a7   :  { %1981 = vmatmul.mubr.f32.gmra.mrb[50].mxu0 %v3282_v7  ;;  %3327 = vmatprep.mubr.f32.mxu1 %v1881_v39 }
 0x5a8   :  { %3328 = vmatmul.mubr.f32.gmra.mrb[50].mxu1 %v3285_v12  ;;  %3815 = vmatpush1.bf16.msra.mxu0 %v5716_v57 }
 0x5a9   :  { %3847 = vmatpush3.bf16.msra.mxu1 %v5715_v40  ;;  %v3288_v44 = vpop.f32.mrb[44].mxu1  ;;  %1986 = vmatprep.mubr.f32.mxu0 %v5664_v28 }
 0x5aa   :  { %v1891_v31 = vpop.f32.mrb[45].mxu1  ;;  %3817 = vmatprep.subr.bf16.mxu0 %v5717_v35  ;;  %3849 = vmatprep.subr.bf16.mxu1 %v5718_v62 }
 0x5ab   :  { %1987 = vmatmul.mubr.f32.gmra.mrb[52].mxu0 %v1881_v39  ;;  %3330 = vmatprep.mubr.f32.mxu1 %v1891_v31 }
 0x5ac   :  { %3331 = vmatmul.mubr.f32.gmra.mrb[52].mxu1 %v3288_v44  ;;  %3819 = vmatpush1.bf16.msra.mxu0 %v5719_v20 }
 0x5ad   :  { %3851 = vmatpush3.bf16.msra.mxu1 %v5718_v62  ;;  %v3291_v19 = vpop.f32.mrb[46].mxu1  ;;  %1992 = vmatprep.mubr.f32.mxu0 %v5664_v28 }
 0x5ae   :  { %v1901_v6 = vpop.f32.mrb[47].mxu1  ;;  %3821 = vmatprep.subr.bf16.mxu0 %v5720_v60  ;;  %3853 = vmatprep.subr.bf16.mxu1 %v5721_v2 }
 0x5af   :  { %1993 = vmatmul.mubr.f32.gmra.mrb[54].mxu0 %v3285_v12  ;;  %3333 = vmatprep.mubr.f32.mxu1 %v1901_v6 }
 0x5b0   :  { %3334 = vmatmul.mubr.f32.gmra.mrb[54].mxu1 %v3291_v19  ;;  %3823 = vmatpush1.bf16.msra.mxu0 %v5722_v21 }
 0x5b1   :  { %3855 = vmatpush3.bf16.msra.mxu1 %v5721_v2  ;;  %3368 = vmatprep.mubr.f32.mxu1 %v5325_v53 }
 0x5b2   :  { %1998 = vmatprep.mubr.f32.mxu0 %v5664_v28  ;;  %3825 = vmatprep.subr.bf16.mxu0 %v5723_v10 }
 0x5b3   :  { %1999 = vmatmul.mubr.f32.gmra.mrb[56].mxu0 %v1891_v31  ;;  %3857 = vmatprep.subr.bf16.mxu1 %v4931_v61 }
 0x5b4   :  { %3827 = vmatpush1.bf16.msra.mxu0 %v5724_v52  ;;  %2004 = vmatprep.mubr.f32.mxu0 %v5664_v28 }
 0x5b5   :  { %3859 = vmatpush3.bf16.msra.mxu1 %v4931_v61  ;;  %3829 = vmatprep.subr.bf16.mxu0 %v5725_v42  ;;  %v5727_v61 = vld [vmem:[#allocation56_spill] sm:$0xff] }
 0x5b6   :  { %3861 = vmatprep.subr.bf16.mxu1 %v4943_v25 }
 0x5b7   :  { %2005 = vmatmul.mubr.f32.gmra.mrb[58].mxu0 %v3288_v44 }
 0x5b8   :  { %3831 = vmatpush1.bf16.msra.mxu0 %v5726_v30  ;;  %2010 = vmatprep.mubr.f32.mxu0 %v5664_v28 }
 0x5b9   :  { %3863 = vmatpush3.bf16.msra.mxu1 %v4943_v25  ;;  %3833 = vmatprep.subr.bf16.mxu0 %v4952_v16  ;;  %v5729_v25 = vld [vmem:[#allocation58_spill] sm:$0xff]  ;;  %v5730_v16 = vld [vmem:[#allocation59_spill] sm:$0xff] }
 0x5ba   :  { %3865 = vmatprep.subr.bf16.mxu1 %v4955_v43 }
 0x5bb   :  { %2011 = vmatmul.mubr.f32.gmra.mrb[60].mxu0 %v1901_v6 }
 0x5bc   :  { %3835 = vmatpush1.bf16.msra.mxu0 %v4959_v37  ;;  %2016 = vmatprep.mubr.f32.mxu0 %v5664_v28  ;;  %v5732_v37 = vld [vmem:[#allocation61_spill] sm:$0xff] }
 0x5bd   :  { %3867 = vmatpush3.bf16.msra.mxu1 %v4955_v43  ;;  %3837 = vmatprep.subr.bf16.mxu0 %v5727_v61  ;;  %v5731_v43 = vld [vmem:[#allocation60_spill] sm:$0xff] }
 0x5be   :  { %3869 = vmatprep.subr.bf16.mxu1 %v4966_v24 }
 0x5bf   :  { %2017 = vmatmul.mubr.f32.gmra.mrb[62].mxu0 %v3291_v19 }
 0x5c0   :  { %3839 = vmatpush1.bf16.msra.mxu0 %v5728_v56  ;;  %2192 = vmatprep.mubr.f32.mxu0 %v5664_v28 }
 0x5c1   :  { %3871 = vmatpush3.bf16.msra.mxu1 %v4966_v24  ;;  %3873 = vmatprep.subr.bf16.mxu0 %v5729_v25  ;;  %v5733_v24 = vld [vmem:[#allocation62_spill] sm:$0xff] }
 0x5c2   :  { %3905 = vmatprep.subr.bf16.mxu1 %v4977_v5 }
 0x5c3   :  { %2193 = vmatmul.mubr.f32.vlgmr.msra.gmra.mrb[48].mxu0 %v5325_v53  ;;  %v5740_v53 = vld [vmem:[#allocation69_spill] sm:$0xff] }
 0x5c4   :  { %3369 = vmatmul.mubr.f32.vlgmr.msra.gmra.mrb[48].mxu1 %v5323_v49  ;;  %3875 = vmatpush1.bf16.msra.mxu0 %v5730_v16 }
 0x5c5   :  { %3371 = vmatprep.mubr.f32.mxu1 %v5329_v13  ;;  %3907 = vmatpush3.bf16.msra.mxu1 %v4977_v5  ;;  %v5735_v5 = vld [vmem:[#allocation64_spill] sm:$0xff] }
 0x5c6   :  { %2198 = vmatprep.mubr.f32.mxu0 %v5664_v28  ;;  %3877 = vmatprep.subr.bf16.mxu0 %v5731_v43 }
 0x5c7   :  { %2199 = vmatmul.mubr.f32.gmra.mrb[50].mxu0 %v5323_v49  ;;  %3909 = vmatprep.subr.bf16.mxu1 %v5732_v37  ;;  %v5739_v49 = vld [vmem:[#allocation68_spill] sm:$0xff] }
 0x5c8   :  { %3372 = vmatmul.mubr.f32.gmra.mrb[50].mxu1 %v5327_v38  ;;  %3879 = vmatpush1.bf16.msra.mxu0 %v5733_v24 }
 0x5c9   :  { %3374 = vmatprep.mubr.f32.mxu1 %v5333_v0  ;;  %3911 = vmatpush3.bf16.msra.mxu1 %v5732_v37 }
 0x5ca   :  { %2204 = vmatprep.mubr.f32.mxu0 %v5664_v28  ;;  %3881 = vmatprep.subr.bf16.mxu0 %v5734_v4 }
 0x5cb   :  { %2205 = vmatmul.mubr.f32.gmra.mrb[52].mxu0 %v5329_v13  ;;  %3913 = vmatprep.subr.bf16.mxu1 %v5735_v5 }
 0x5cc   :  { %3375 = vmatmul.mubr.f32.gmra.mrb[52].mxu1 %v5331_v8  ;;  %3883 = vmatpush1.bf16.msra.mxu0 %v5736_v15 }
 0x5cd   :  { %3377 = vmatprep.mubr.f32.mxu1 %v5337_v34  ;;  %3915 = vmatpush3.bf16.msra.mxu1 %v5735_v5 }
 0x5ce   :  { %2210 = vmatprep.mubr.f32.mxu0 %v5664_v28  ;;  %3885 = vmatprep.subr.bf16.mxu0 %v5737_v32 }
 0x5cf   :  { %2211 = vmatmul.mubr.f32.gmra.mrb[54].mxu0 %v5327_v38  ;;  %3917 = vmatprep.subr.bf16.mxu1 %v5018_v36 }
 0x5d0   :  { %3378 = vmatmul.mubr.f32.gmra.mrb[54].mxu1 %v5335_v50  ;;  %3887 = vmatpush1.bf16.msra.mxu0 %v5738_v9 }
 0x5d1   :  { %3919 = vmatpush3.bf16.msra.mxu1 %v5018_v36  ;;  %3412 = vmatprep.mubr.f32.mxu1 %v5219_v29  ;;  %v5741_v36 = vld [vmem:[#allocation70_spill] sm:$0xff] }
 0x5d2   :  { %2216 = vmatprep.mubr.f32.mxu0 %v5664_v28  ;;  %3889 = vmatprep.subr.bf16.mxu0 %v5739_v49 }
 0x5d3   :  { %2217 = vmatmul.mubr.f32.gmra.mrb[56].mxu0 %v5333_v0  ;;  %3921 = vmatprep.subr.bf16.mxu1 %v5032_v11 }
 0x5d4   :  { %3891 = vmatpush1.bf16.msra.mxu0 %v5036_v46  ;;  %2222 = vmatprep.mubr.f32.mxu0 %v5664_v28 }
 0x5d5   :  { %3923 = vmatpush3.bf16.msra.mxu1 %v5032_v11  ;;  %3893 = vmatprep.subr.bf16.mxu0 %v5740_v53  ;;  %v5742_v11 = vld [vmem:[#allocation71_spill] sm:$0xff] }
 0x5d6   :  { %3925 = vmatprep.subr.bf16.mxu1 %v5046_v1 }
 0x5d7   :  { %2223 = vmatmul.mubr.f32.gmra.mrb[58].mxu0 %v5331_v8 }
 0x5d8   :  { %3895 = vmatpush1.bf16.msra.mxu0 %v5050_v59  ;;  %2228 = vmatprep.mubr.f32.mxu0 %v5664_v28 }
 0x5d9   :  { %3927 = vmatpush3.bf16.msra.mxu1 %v5046_v1  ;;  %3897 = vmatprep.subr.bf16.mxu0 %v5053_v58 }
 0x5da   :  { %3929 = vmatprep.subr.bf16.mxu1 %v5058_v41 }
 0x5db   :  { %2229 = vmatmul.mubr.f32.gmra.mrb[60].mxu0 %v5337_v34 }
 0x5dc   :  { %3899 = vmatpush1.bf16.msra.mxu0 %v5062_v47  ;;  %2234 = vmatprep.mubr.f32.mxu0 %v5664_v28 }
 0x5dd   :  { %3931 = vmatpush3.bf16.msra.mxu1 %v5058_v41  ;;  %3901 = vmatprep.subr.bf16.mxu0 %v5065_v22 }
 0x5de   :  { %3933 = vmatprep.subr.bf16.mxu1 %v5741_v36 }
 0x5df   :  { %2235 = vmatmul.mubr.f32.gmra.mrb[62].mxu0 %v5335_v50 }
 0x5e0   :  { %3903 = vmatpush1.bf16.msra.mxu0 %v5742_v11  ;;  %2434 = vmatprep.mubr.f32.mxu0 %v5664_v28 }
 0x5e1   :  { %3935 = vmatpush3.bf16.msra.mxu1 %v5741_v36 }
 0x5e3   :  { %2435 = vmatmul.mubr.f32.vlgmr.msra.gmra.mrb[48].mxu0 %v5219_v29 }
 0x5e4   :  { %3413 = vmatmul.mubr.f32.vlgmr.msra.gmra.mrb[56].mxu1 %v5226_v18  ;;  %2440 = vmatprep.mubr.f32.mxu0 %v5664_v28 }
 0x5e5   :  { %3415 = vmatprep.mubr.f32.mxu1 %v5234_v3 }
 0x5e7   :  { %2441 = vmatmul.mubr.f32.gmra.mrb[50].mxu0 %v5226_v18 }
 0x5e8   :  { %3416 = vmatmul.mubr.f32.gmra.mrb[58].mxu1 %v5240_v17  ;;  %2446 = vmatprep.mubr.f32.mxu0 %v5664_v28 }
 0x5e9   :  { %3418 = vmatprep.mubr.f32.mxu1 %v5247_v27 }
 0x5eb   :  { %2447 = vmatmul.mubr.f32.gmra.mrb[52].mxu0 %v5234_v3 }
 0x5ec   :  { %3419 = vmatmul.mubr.f32.gmra.mrb[60].mxu1 %v5254_v33  ;;  %2452 = vmatprep.mubr.f32.mxu0 %v5664_v28 }
 0x5ed   :  { %3421 = vmatprep.mubr.f32.mxu1 %v5259_v23 }
 0x5ef   :  { %2453 = vmatmul.mubr.f32.gmra.mrb[54].mxu0 %v5240_v17 }
 0x5f0   :  { %3422 = vmatmul.mubr.f32.gmra.mrb[62].mxu1 %v5269_v63  ;;  %2458 = vmatprep.mubr.f32.mxu0 %v5664_v28 }
 0x5f3   :  { %2459 = vmatmul.mubr.f32.gmra.mrb[56].mxu0 %v5247_v27 }
 0x5f4   :  { %2464 = vmatprep.mubr.f32.mxu0 %v5664_v28 }
 0x5f7   :  { %2465 = vmatmul.mubr.f32.gmra.mrb[58].mxu0 %v5254_v33 }
 0x5f8   :  { %2470 = vmatprep.mubr.f32.mxu0 %v5664_v28 }
 0x5fb   :  { %2471 = vmatmul.mubr.f32.gmra.mrb[60].mxu0 %v5259_v23 }
 0x5fc   :  { %2476 = vmatprep.mubr.f32.mxu0 %v5664_v28 }
 0x5ff   :  { %2477 = vmatmul.mubr.f32.gmra.mrb[62].mxu0 %v5269_v63 }
 0x697   :  { %v5456_v46 = vpop.f32.mrb[48].mxu1 }
 0x698   :  { %v5458_v1 = vpop.f32.mrb[49].mxu1 }
 0x69b   :  { %v5460_v59 = vpop.f32.mrb[50].mxu1 }
 0x69c   :  { %v5462_v58 = vpop.f32.mrb[51].mxu1 }
 0x69f   :  { %v5464_v41 = vpop.f32.mrb[52].mxu1 }
 0x6a0   :  { %v5466_v47 = vpop.f32.mrb[53].mxu1 }
 0x6a3   :  { %v5468_v22 = vpop.f32.mrb[54].mxu1 }
 0x6a4   :  { %v5470_v38 = vpop.f32.mrb[55].mxu1 }
 0x6b6   :  { %v2436_v13 = vpop.f32.mrb[48].mxu0 }
 0x6b7   :  { %v3969_v28 = vadd.f32 %v5153_v45, %v2436_v13  ;;  %v5473_v8 = vpop.f32.mrb[56].mxu1  ;;  %v2438_v0 = vpop.f32.mrb[49].mxu0 }
 0x6b8   :  { %v2549_v50 = vpop.f32.mrb[57].mxu1  ;;  %v3971_v39 = vadd.f32 %v5160_v55, %v2438_v0 }
 0x6b9   :  { %v2824_v34 = vmul.f32 -1.442695, %v3969_v28 }
 0x6ba   :  { %v2442_v7 = vpop.f32.mrb[50].mxu0  ;;  %v2832_v20 = vmul.f32 -1.442695, %v3971_v39 }
 0x6bb   :  { %4175 = vpow2.f32 %v2824_v34  ;;  %v3973_v48 = vadd.f32 %v5153_v45, %v2442_v7  ;;  %v5476_v26 = vpop.f32.mrb[58].mxu1  ;;  %v2444_v12 = vpop.f32.mrb[51].mxu0 }
 0x6bc   :  { %v5479_v14 = vpop.f32.mrb[59].mxu1  ;;  %v3975_v57 = vadd.f32 %v5160_v55, %v2444_v12 }
 0x6bd   :  { %v2825_v40 = vmul.f32 -1.442695, %v3973_v48 }
 0x6be   :  { %v2448_v44 = vpop.f32.mrb[52].mxu0  ;;  %v2833_v6 = vmul.f32 -1.442695, %v3975_v57 }
 0x6bf   :  { %4177 = vpow2.f32 %v2825_v40  ;;  %v3977_v31 = vadd.f32 %v5153_v45, %v2448_v44  ;;  %v5483_v35 = vpop.f32.mrb[60].mxu1  ;;  %v2450_v62 = vpop.f32.mrb[53].mxu0  ;;  %v2550_v44 = vadd.f32 %v2549_v50, %v5184_v51  ;;  %v2555_v50 = vadd.f32 %v5473_v8, %v5184_v51 }
 0x6c0   :  { %v5485_v19 = vpop.f32.mrb[61].mxu1  ;;  %v3979_v61 = vadd.f32 %v5160_v55, %v2450_v62  ;;  %v2560_v8 = vadd.f32 %v5479_v14, %v5184_v51 }
 0x6c1   :  { %v2826_v60 = vmul.f32 -1.442695, %v3977_v31 }
 0x6c2   :  { %v2454_v2 = vpop.f32.mrb[54].mxu0  ;;  %v2834_v4 = vmul.f32 -1.442695, %v3979_v61 }
 0x6c3   :  { %4179 = vpow2.f32 %v2826_v60  ;;  %v3981_v21 = vadd.f32 %v5153_v45, %v2454_v2  ;;  %v5488_v10 = vpop.f32.mrb[62].mxu1  ;;  %v2456_v52 = vpop.f32.mrb[55].mxu0  ;;  %v2348_v2 = vadd.f32 %v5458_v1, %v5186_v54 }
 0x6c4   :  { %4181 = vpow2.f32 %v2832_v20  ;;  %v5490_v42 = vpop.f32.mrb[63].mxu1  ;;  %v3983_v32 = vadd.f32 %v5160_v55, %v2456_v52 }
 0x6c5   :  { %v4176_v30 = vpop.eup %4175  ;;  %4183 = vpow2.f32 %v2833_v6  ;;  %v2827_v56 = vmul.f32 -1.442695, %v3981_v21 }
 0x6c6   :  { %v2620_v25 = vadd.f32 1.0, %v4176_v30  ;;  %v2460_v16 = vpop.f32.mrb[56].mxu0  ;;  %v2835_v0 = vmul.f32 -1.442695, %v3983_v32 }
 0x6c7   :  { %4185 = vpow2.f32 %v2827_v56  ;;  %v3985_v43 = vadd.f32 %v5153_v45, %v2460_v16  ;;  %v2462_v37 = vpop.f32.mrb[57].mxu0 }
 0x6c8   :  { %4187 = vrcp.f32 %v2620_v25  ;;  %v3987_v39 = vadd.f32 %v5160_v55, %v2462_v37 }
 0x6c9   :  { %v4178_v24 = vpop.eup %4177  ;;  %v2828_v5 = vmul.f32 -1.442695, %v3985_v43 }
 0x6ca   :  { %v2621_v15 = vadd.f32 1.0, %v4178_v24  ;;  %v2466_v9 = vpop.f32.mrb[58].mxu0  ;;  %v2836_v61 = vmul.f32 -1.442695, %v3987_v39 }
 0x6cb   :  { %4189 = vpow2.f32 %v2828_v5  ;;  %v3989_v49 = vadd.f32 %v5153_v45, %v2466_v9  ;;  %v2468_v53 = vpop.f32.mrb[59].mxu0 }
 0x6cc   :  { %4191 = vrcp.f32 %v2621_v15  ;;  %v3991_v56 = vadd.f32 %v5160_v55, %v2468_v53 }
 0x6cd   :  { %v4180_v36 = vpop.eup %4179  ;;  %4193 = vpow2.f32 %v2834_v4  ;;  %v2829_v11 = vmul.f32 -1.442695, %v3989_v49  ;;  %v2351_v4 = vadd.f32 %v5456_v46, %v5186_v54 }
 0x6ce   :  { %v4182_v13 = vpop.eup %4181  ;;  %v2622_v28 = vadd.f32 1.0, %v4180_v36  ;;  %v2472_v34 = vpop.f32.mrb[60].mxu0  ;;  %v2837_v5 = vmul.f32 -1.442695, %v3991_v56 }
 0x6cf   :  { %v4184_v7 = vpop.eup %4183  ;;  %4195 = vpow2.f32 %v2829_v11  ;;  %v3993_v48 = vadd.f32 %v5153_v45, %v2472_v34  ;;  %v2474_v12 = vpop.f32.mrb[61].mxu0  ;;  %v2676_v57 = vadd.f32 1.0, %v4182_v13  ;;  %v2354_v11 = vadd.f32 %v5462_v58, %v5186_v54 }
 0x6d0   :  { %4197 = vrcp.f32 %v2622_v28  ;;  %v2677_v20 = vadd.f32 1.0, %v4184_v7  ;;  %v3995_v15 = vadd.f32 %v5160_v55, %v2474_v12  ;;  %v2565_v34 = vadd.f32 %v5476_v26, %v5184_v51 }
 0x6d1   :  { %v4186_v40 = vpop.eup %4185  ;;  %v2830_v31 = vmul.f32 -1.442695, %v3993_v48  ;;  %4199 = vpow2.f32 %v2835_v0  ;;  %v2357_v58 = vadd.f32 %v5460_v59, %v5186_v54  ;;  %v2360_v59 = vadd.f32 %v5466_v47, %v5186_v54 }
 0x6d2   :  { %v4188_v62 = vpop.eup %4187  ;;  %v2623_v6 = vadd.f32 1.0, %v4186_v40  ;;  %v2478_v60 = vpop.f32.mrb[62].mxu0  ;;  %v2838_v28 = vmul.f32 -1.442695, %v3995_v15  ;;  %v2363_v47 = vadd.f32 %v5464_v41, %v5186_v54 }
 0x6d3   :  { %v2700_v21 = vmul.f32 %v4188_v62, %v2550_v44  ;;  %4201 = vpow2.f32 %v2830_v31  ;;  %v3997_v52 = vadd.f32 %v5153_v45, %v2478_v60  ;;  %v2480_v30 = vpop.f32.mrb[63].mxu0 }
 0x6d4   :  { %4203 = vrcp.f32 %v2623_v6  ;;  %v3999_v12 = vadd.f32 %v5160_v55, %v2480_v30  ;;  %v2570_v6 = vadd.f32 %v5485_v19, %v5184_v51 }
 0x6d5   :  { %v4190_v25 = vpop.eup %4189  ;;  %4205 = vrcp.f32 %v2676_v57  ;;  %v2708_v16 = vadd.f32 %v2700_v21, %v2348_v2  ;;  %v2831_v24 = vmul.f32 -1.442695, %v3997_v52 }
 0x6d6   :  { %v4192_v43 = vpop.eup %4191  ;;  %4207 = vrcp.f32 %v2677_v20  ;;  %v2624_v37 = vadd.f32 1.0, %v4190_v25  ;;  %v2839_v60 = vmul.f32 -1.442695, %v3999_v12 }
 0x6d7   :  { %v4194_v1 = vpop.eup %4193  ;;  %4209 = vtanh.f32 %v2708_v16  ;;  %v2701_v45 = vmul.f32 %v4192_v43, %v2555_v50 }
 0x6d8   :  { %4211 = vpow2.f32 %v2836_v61  ;;  %v2678_v53 = vadd.f32 1.0, %v4194_v1  ;;  %v2575_v61 = vadd.f32 %v5483_v35, %v5184_v51 }
 0x6d9   :  { %v4196_v32 = vpop.eup %4195  ;;  %v2709_v9 = vadd.f32 %v2701_v45, %v2351_v4  ;;  %4213 = vrcp.f32 %v2624_v37  ;;  %v2580_v4 = vadd.f32 %v5490_v42, %v5184_v51 }
 0x6da   :  { %v4198_v49 = vpop.eup %4197  ;;  %v2625_v36 = vadd.f32 1.0, %v4196_v32  ;;  %4215 = vpow2.f32 %v2831_v24 }
 0x6db   :  { %4217 = vtanh.f32 %v2709_v9  ;;  %v2702_v46 = vmul.f32 %v4198_v49, %v2560_v8  ;;  %v4200_v13 = vpop.eup %4199  ;;  %v2366_v8 = vadd.f32 %v5470_v38, %v5186_v54 }
 0x6dc   :  { %4219 = vpow2.f32 %v2837_v5  ;;  %v2679_v62 = vadd.f32 1.0, %v4200_v13 }
 0x6dd   :  { %v4202_v0 = vpop.eup %4201  ;;  %v2710_v7 = vadd.f32 %v2702_v46, %v2354_v11  ;;  %4221 = vrcp.f32 %v2625_v36 }
 0x6de   :  { %v4204_v14 = vpop.eup %4203  ;;  %4223 = vrcp.f32 %v2678_v53  ;;  %v2626_v48 = vadd.f32 1.0, %v4202_v0 }
 0x6df   :  { %v4206_v39 = vpop.eup %4205  ;;  %4225 = vtanh.f32 %v2710_v7  ;;  %v2703_v40 = vmul.f32 %v4204_v14, %v2565_v34  ;;  %v2369_v7 = vadd.f32 %v5468_v22, %v5186_v54 }
 0x6e0   :  { %v4208_v57 = vpop.eup %4207  ;;  %4227 = vpow2.f32 %v2838_v28 }
 0x6e1   :  { %v4210_v44 = vpop.eup %4209  ;;  %v2711_v31 = vadd.f32 %v2703_v40, %v2357_v58  ;;  %4229 = vrcp.f32 %v2626_v48 }
 0x6e2   :  { %v4212_v26 = vpop.eup %4211  ;;  %v2724_v20 = vsub.f32 %v5219_v29, %v4210_v44 }
 0x6e3   :  { %v4214_v55 = vpop.eup %4213  ;;  %4231 = vtanh.f32 %v2711_v31  ;;  %v2680_v56 = vadd.f32 1.0, %v4212_v26 }
 0x6e4   :  { %v4216_v2 = vpop.eup %4215  ;;  %v2732_v21 = vmul.f32 %v4206_v39, %v2724_v20  ;;  %v2704_v52 = vmul.f32 %v4214_v55, %v2570_v6  ;;  %4233 = vrcp.f32 %v2679_v62 }
 0x6e5   :  { %v4218_v30 = vpop.eup %4217  ;;  %v2627_v25 = vadd.f32 1.0, %v4216_v2  ;;  %4235 = vpow2.f32 %v2839_v60 }
 0x6e6   :  { %v4220_v29 = vpop.eup %4219  ;;  %v2740_v50 = vadd.f32 %v4210_v44, %v2732_v21  ;;  %v2725_v19 = vsub.f32 %v5226_v18, %v4218_v30  ;;  %v2712_v16 = vadd.f32 %v2704_v52, %v2360_v59 }
 0x6e7   :  { %v4222_v43 = vpop.eup %4221  ;;  %4237 = vrcp.f32 %v2627_v25  ;;  %v2681_v45 = vadd.f32 1.0, %v4220_v29 }
 0x6e8   :  { %v4224_v37 = vpop.eup %4223  ;;  %2748 = vst [vmem:[#allocation14] sm:$0xff] %v2740_v50  ;;  %v2733_v24 = vmul.f32 %v4208_v57, %v2725_v19  ;;  %4239 = vtanh.f32 %v2712_v16  ;;  %v2705_v1 = vmul.f32 %v4222_v43, %v2575_v61 }
 0x6e9   :  { %v4226_v35 = vpop.eup %4225  ;;  %4241 = vrcp.f32 %v2680_v56 }
 0x6ea   :  { %v4228_v5 = vpop.eup %4227  ;;  %v2741_v15 = vadd.f32 %v4218_v30, %v2733_v24  ;;  %v2726_v18 = vsub.f32 %v5234_v3, %v4226_v35  ;;  %v2713_v32 = vadd.f32 %v2705_v1, %v2363_v47  ;;  %v2585_v3 = vadd.f32 %v5488_v10, %v5184_v51 }
 0x6eb   :  { %v4230_v9 = vpop.eup %4229  ;;  %v2682_v46 = vadd.f32 1.0, %v4228_v5 }
 0x6ec   :  { %2749 = vst [vmem:[#allocation14 + $0x8] sm:$0xff] %v2741_v15  ;;  %v2734_v41 = vmul.f32 %v4224_v37, %v2726_v18  ;;  %4243 = vtanh.f32 %v2713_v32  ;;  %v2706_v49 = vmul.f32 %v4230_v9, %v2580_v4 }
 0x6ed   :  { %v4232_v53 = vpop.eup %4231  ;;  %4245 = vrcp.f32 %v2681_v45 }
 0x6ee   :  { %v2742_v36 = vadd.f32 %v4226_v35, %v2734_v41  ;;  %v2727_v42 = vsub.f32 %v5240_v17, %v4232_v53  ;;  %v2714_v11 = vadd.f32 %v2706_v49, %v2366_v8  ;;  %v4234_v13 = vpop.eup %4233 }
 0x6ef   :  { %v4236_v28 = vpop.eup %4235 }
 0x6f0   :  { %2750 = vst [vmem:[#allocation14 + $0x10] sm:$0xff] %v2742_v36  ;;  %v2735_v0 = vmul.f32 %v4234_v13, %v2727_v42  ;;  %4247 = vtanh.f32 %v2714_v11  ;;  %v2683_v58 = vadd.f32 1.0, %v4236_v28 }
 0x6f1   :  { %v4238_v38 = vpop.eup %4237  ;;  %4249 = vrcp.f32 %v2682_v46 }
 0x6f2   :  { %v4240_v34 = vpop.eup %4239  ;;  %v2743_v14 = vadd.f32 %v4232_v53, %v2735_v0  ;;  %v2707_v48 = vmul.f32 %v4238_v38, %v2585_v3 }
 0x6f3   :  { %v2728_v17 = vsub.f32 %v5247_v27, %v4240_v34  ;;  %v4242_v12 = vpop.eup %4241 }
 0x6f4   :  { %2751 = vst [vmem:[#allocation14 + $0x18] sm:$0xff] %v2743_v14  ;;  %v2715_v39 = vadd.f32 %v2707_v48, %v2369_v7 }
 0x6f5   :  { %v2736_v40 = vmul.f32 %v4242_v12, %v2728_v17 }
 0x6f6   :  { %v4244_v57 = vpop.eup %4243  ;;  %4251 = vtanh.f32 %v2715_v39 }
 0x6f7   :  { %v4246_v51 = vpop.eup %4245  ;;  %v2744_v10 = vadd.f32 %v4240_v34, %v2736_v40  ;;  %v2729_v44 = vsub.f32 %v5254_v33, %v4244_v57  ;;  %4253 = vrcp.f32 %v2683_v58 }
 0x6f9   :  { %2752 = vst [vmem:[#allocation14 + $0x20] sm:$0xff] %v2744_v10  ;;  %v2737_v31 = vmul.f32 %v4246_v51, %v2729_v44 }
 0x6fa   :  { %v4248_v54 = vpop.eup %4247 }
 0x6fb   :  { %v2745_v22 = vadd.f32 %v4244_v57, %v2737_v31  ;;  %v2730_v62 = vsub.f32 %v5259_v23, %v4248_v54  ;;  %v4250_v26 = vpop.eup %4249 }
 0x6fd   :  { %2753 = vst [vmem:[#allocation14 + $0x28] sm:$0xff] %v2745_v22  ;;  %v2738_v27 = vmul.f32 %v4250_v26, %v2730_v62 }
 0x6ff   :  { %v2746_v20 = vadd.f32 %v4248_v54, %v2738_v27 }
 0x700   :  { %v4252_v6 = vpop.eup %4251 }
 0x701   :  { %2754 = vst [vmem:[#allocation14 + $0x30] sm:$0xff] %v2746_v20  ;;  %v2731_v60 = vsub.f32 %v5269_v63, %v4252_v6  ;;  %v4254_v55 = vpop.eup %4253 }
 0x703   :  { %v2739_v2 = vmul.f32 %v4254_v55, %v2731_v60 }
 0x705   :  { %v2747_v33 = vadd.f32 %v4252_v6, %v2739_v2 }
 0x707   :  { %2755 = vst [vmem:[#allocation14 + $0x38] sm:$0xff] %v2747_v33 }
 0x708   :  { %4443 = shalt.err (!%p4440_p4)
}
 0x709   :  { %s4444_s22 = scalar_lea.hbm %s5566_s10, 1024 }
 0x70a   :  { %p4445_p5 = scmp.ne.s32.totalorder %s5566_s10, %s4444_s22  ;;  %p4448_p6 = scmp.lt.u32.totalorder %s4444_s22, %s5566_s10 }
 0x70c   :  { %p4450_p7 = pnand %p4448_p6, %p4445_p5 }
 0x70e   :  { %4453 = shalt.err (!%p4450_p7)
}
 0x70f   :  { %2767 = dma.vmem_to_hbm [thread:$0]  %s2762_s9, 1024, %s5566_s10, [#allocation4], %s4466_s25, %s4466_s25, %s4467_s26  }
 0x710   :  { %4462 = dma.done.wait [#allocation4], 1024  }
 0x711   :  { %4463 = vsyncadd [#allocation4], 4294966272 }
 0x712   :  { %2771 = vsyncpa [#allocation3], 1 }
 0x713   :  { %2772 = vsyncpa [#allocation6], 1 }
 0x714   :  { %2773 = vsyncpa [#allocation9], 1 }
 0x715   :  { %2774 = vsyncpa [#allocation12], 1 }
 0x716   :  { %2775 = vsyncpa [#allocation4], 1 }

</bundles_post_ra>
